<compile_context>
chip_gen: v5e
topology: v5e:2x2
jax: 0.10.0
libtpu: 0.0.40
codegen_flags: <defaults>
</compile_context>

<pallas_src>
import functools

import jax
import jax.numpy as jnp
from jax import lax
from jax.experimental import pallas as pl
from jax.experimental.pallas import tpu as pltpu

SPECIAL_SYMBOLS = 3  # undreamt.data: special tokens are encoded as negative ids


def _round_up(x, m):
    return -(-x // m) * m


def _lstm_block_kernel(len_ref, x_ref, wx_ref, wh_ref, b_ref,
                       out_ref, hid_ref,
                       h_sc, c_sc, gx_sc):
    """One grid step = one time block of Tb fused LSTM cell updates."""
    tb = pl.program_id(0)
    Tb, Bs, Ep = x_ref.shape
    Hp = h_sc.shape[1]

    @pl.when(tb == 0)
    def _():
        h_sc[...] = jnp.zeros_like(h_sc)
        c_sc[...] = jnp.zeros_like(c_sc)

    wh = wh_ref[...]                                    # (Hp, 4*Hp) bf16, resident

    # Block-wide input projection (hoisted out of the recurrence): one big GEMM
    # with Tb*Bs LHS rows instead of Tb tiny Bs-row matmuls.  Bias folded in once.
    x_flat = x_ref[...].reshape(Tb * Bs, Ep)            # tile-aligned (Bs % 8 == 0)
    gates_x = (jnp.dot(x_flat, wx_ref[...], preferred_element_type=jnp.float32)
               + b_ref[...])                            # (Tb*Bs, 4*Hp) f32
    gx_sc[...] = gates_x.reshape(Tb, Bs, 4 * Hp)

    # Hoist loop-invariant broadcasts (JAX does not CSE broadcast_in_dim).
    lens_b = jnp.broadcast_to(len_ref[...], (Bs, Hp))   # (Bs, Hp) int32
    t0 = tb * Tb

    def step(s, carry):
        h, c = carry                                    # f32 (Bs, Hp)
        # only the genuinely sequential recurrent matmul stays on the critical path
        gates = gx_sc[s] + jnp.dot(h.astype(wh.dtype), wh,
                                   preferred_element_type=jnp.float32)
        i_g = jax.nn.sigmoid(gates[:, 0 * Hp:1 * Hp])
        f_g = jax.nn.sigmoid(gates[:, 1 * Hp:2 * Hp])
        g_g = jnp.tanh(gates[:, 2 * Hp:3 * Hp])
        o_g = jax.nn.sigmoid(gates[:, 3 * Hp:4 * Hp])

        c_new = f_g * c + i_g * g_g
        h_new = o_g * jnp.tanh(c_new)

        # packed-sequence semantics: freeze state / zero output past each length
        valid = (t0 + s) < lens_b                       # (Bs, Hp) bool
        h_upd = jnp.where(valid, h_new, h)
        c_upd = jnp.where(valid, c_new, c)
        out_ref[s] = jnp.where(valid, h_new, 0.0).astype(out_ref.dtype)
        return h_upd, c_upd

    h, c = lax.fori_loop(0, Tb, step, (h_sc[...], c_sc[...]), unroll=8)
    h_sc[...] = h
    c_sc[...] = c

    # store the final hidden state only on the last time block
    @pl.when(tb == pl.num_programs(0) - 1)
    def _():
        hid_ref[0] = h.astype(hid_ref.dtype)


def _run_encoder_kernel(lengths_p, x_p, wx, wh, b4, *, time_block,
                        vmem_limit_bytes, out_dtype, single_buffer_weights):
    Tp, Bp, Ep = x_p.shape
    Hp = wh.shape[0]
    NT = Tp // time_block

    def resident(shape):
        # constant index_map => block never changes; single-buffer it to save VMEM.
        kwargs = dict(pipeline_mode=pl.Buffered(1)) if single_buffer_weights else {}
        return pl.BlockSpec(shape, lambda t: (0,) * len(shape), **kwargs)

    out_shape = (jax.ShapeDtypeStruct((Tp, Bp, Hp), out_dtype),   # output
                 jax.ShapeDtypeStruct((1, Bp, Hp), out_dtype))    # final hidden

    grid_spec = pltpu.PrefetchScalarGridSpec(
        num_scalar_prefetch=0,
        grid=(NT,),
        in_specs=[
            resident((Bp, 1)),                                        # lengths
            pl.BlockSpec((time_block, Bp, Ep), lambda t: (t, 0, 0)),  # embeddings tile
            resident((Ep, 4 * Hp)),                                   # fused W_x
            resident((Hp, 4 * Hp)),                                   # fused W_h
            resident((1, 4 * Hp)),                                    # fused bias
        ],
        out_specs=[
            pl.BlockSpec((time_block, Bp, Hp), lambda t: (t, 0, 0)),  # output tile
            pl.BlockSpec((1, Bp, Hp), lambda t: (0, 0, 0)),           # final hidden
        ],
        scratch_shapes=[pltpu.VMEM((Bp, Hp), jnp.float32),            # h state
                        pltpu.VMEM((Bp, Hp), jnp.float32),            # c state
                        pltpu.VMEM((time_block, Bp, 4 * Hp), jnp.float32)],  # gates_x
    )

    return pl.pallas_call(
        _lstm_block_kernel,
        out_shape=out_shape,
        grid_spec=grid_spec,
        compiler_params=pltpu.CompilerParams(
            dimension_semantics=("arbitrary",),
            vmem_limit_bytes=vmem_limit_bytes),
    )(lengths_p, x_p, wx, wh, b4)


def _pack_gates(w, in_p, h_p):
    """(4, In, H) torch-gate-order weights -> zero-padded fused (in_p, 4*h_p)."""
    _, In, H = w.shape
    out = jnp.zeros((in_p, 4 * h_p), dtype=w.dtype)
    for k in range(4):
        out = out.at[:In, k * h_p:k * h_p + H].set(w[k])
    return out


def _pack_bias(b, h_p):
    """(4, 1, H) -> (1, 4*h_p)."""
    _, _, H = b.shape
    out = jnp.zeros((1, 4 * h_p), dtype=b.dtype)
    for k in range(4):
        out = out.at[0, k * h_p:k * h_p + H].set(b[k, 0])
    return out


@functools.partial(jax.jit, static_argnames=("time_block", "compute_dtype",
                                             "single_buffer_weights"))
def _rnn_encoder_forward_impl(ids, lengths, word_table, special_table, w_ih, w_hh,
                              bias, *, time_block, compute_dtype,
                              single_buffer_weights):
    """ids: (T, B) int32 (negative=special, 0=pad, positive=word); lengths: (B,)."""
    T, B = ids.shape
    E = word_table.shape[1]
    H = w_hh.shape[-1]

    # 1. sort batch by descending length (stable), as in the PyTorch forward
    true2sorted = jnp.argsort(-lengths, stable=True)
    sorted2true = jnp.argsort(true2sorted, stable=True)
    ids_s = ids[:, true2sorted]
    len_s = lengths[true2sorted].astype(jnp.int32)

    # 2. embeddings: word_table[word_ids] + special_table[special_ids]
    #    (padding row 0 of each table is zero — matches padding_idx=0)
    word_idx = jnp.maximum(ids_s, 0)
    spec_idx = jnp.maximum(-ids_s, 0)
    x = word_table[word_idx] + special_table[spec_idx]            # (T, B, E) f32

    # 3. lane/sublane-dense padding + adaptive time block against the VMEM budget
    Hp = _round_up(H, 128)
    Ep = _round_up(E, 128)
    Bp = _round_up(B, 8)
    cbytes = jnp.dtype(compute_dtype).itemsize

    def footprint(tb):
        weights = (Ep + Hp) * 4 * Hp * cbytes + 4 * Hp * 4
        bufs = 2 * tb * Bp * (Ep + Hp) * cbytes            # double-buffered x / out
        scratch = tb * Bp * 4 * Hp * 4 + 2 * Bp * Hp * 4   # gates_x + h + c
        return weights + bufs + scratch

    Tb = max(8, min(time_block, _round_up(T, 8)))          # cap padded-time waste
    while Tb > 8 and footprint(Tb) > (40 << 20):           # fit v7x's 64 MiB VMEM
        Tb = max(8, Tb // 2)
    Tp = _round_up(T, Tb)
    vmem_limit = int(min(64 << 20, max(32 << 20, 1.25 * footprint(Tb) + (2 << 20))))

    x_p = jnp.pad(x, ((0, Tp - T), (0, Bp - B), (0, Ep - E))).astype(compute_dtype)
    len_p = jnp.pad(len_s, (0, Bp - B))[:, None]            # (Bp, 1) int32

    # 4. fuse per-gate weights (torch order i,f,g,o) into single wide matmul operands
    wx = _pack_gates(w_ih, Ep, Hp).astype(compute_dtype)    # (Ep, 4*Hp)
    wh = _pack_gates(w_hh, Hp, Hp).astype(compute_dtype)    # (Hp, 4*Hp)
    b4 = _pack_bias(bias, Hp).astype(jnp.float32)           # (1, 4*Hp)

    output_p, hidden_p = _run_encoder_kernel(
        len_p, x_p, wx, wh, b4, time_block=Tb, vmem_limit_bytes=vmem_limit,
        out_dtype=compute_dtype, single_buffer_weights=single_buffer_weights)

    # 5. strip padding, un-sort back to original batch order, restore f32
    output = output_p[:T, :B, :H][:, sorted2true, :].astype(jnp.float32)
    hidden = hidden_p[:, :B, :H][:, sorted2true, :].astype(jnp.float32)
    return hidden, output


def rnn_encoder_forward(ids, lengths, word_table, special_table, w_ih, w_hh, bias,
                        *, time_block=32, compute_dtype=jnp.bfloat16):
    # Prefer single-buffered resident weights (saves VMEM); fall back transparently
    # if this Pallas/Mosaic build rejects pipeline_mode on the top-level pipeline.
    try:
        return _rnn_encoder_forward_impl(
            ids, lengths, word_table, special_table, w_ih, w_hh, bias,
            time_block=time_block, compute_dtype=compute_dtype,
            single_buffer_weights=True)
    except Exception:
        return _rnn_encoder_forward_impl(
            ids, lengths, word_table, special_table, w_ih, w_hh, bias,
            time_block=time_block, compute_dtype=compute_dtype,
            single_buffer_weights=False)


def _reference_forward(ids, lengths, word_table, special_table, w_ih, w_hh, bias):
    """Pure-JAX f32 reference with identical semantics (for tolerance check)."""
    T, B = ids.shape
    H = w_hh.shape[-1]
    order = jnp.argsort(-lengths, stable=True)
    inv = jnp.argsort(order, stable=True)
    ids_s = ids[:, order]
    len_s = lengths[order]
    x = word_table[jnp.maximum(ids_s, 0)] + special_table[jnp.maximum(-ids_s, 0)]
    h = jnp.zeros((B, H), jnp.float32)
    c = jnp.zeros((B, H), jnp.float32)
    outs = []
    for t in range(T):
        gate = lambda k: x[t] @ w_ih[k] + h @ w_hh[k] + bias[k, 0]
        i_g, f_g = jax.nn.sigmoid(gate(0)), jax.nn.sigmoid(gate(1))
        g_g, o_g = jnp.tanh(gate(2)), jax.nn.sigmoid(gate(3))
        c_new = f_g * c + i_g * g_g
        h_new = o_g * jnp.tanh(c_new)
        valid = (t < len_s)[:, None]
        h = jnp.where(valid, h_new, h)
        c = jnp.where(valid, c_new, c)
        outs.append(jnp.where(valid, h_new, 0.0))
    return h[None, :, :][:, inv, :], jnp.stack(outs, 0)[:, inv, :]


if __name__ == "__main__":
    # small shapes: seq T=8, batch B=4, embedding E=32, hidden H=32, word vocab Vw=32
    T, B, E, H, Vw = 8, 4, 32, 32, 32
    Vs = SPECIAL_SYMBOLS + 1

    key = jax.random.PRNGKey(0)
    k_ids, k_wt, k_st, k_ih, k_hh, k_b = jax.random.split(key, 6)

    # deterministic parameter init (padding_idx=0 rows zeroed)
    word_table = jax.random.uniform(k_wt, (Vw, E), jnp.float32, -0.1, 0.1).at[0].set(0.0)
    special_table = jax.random.uniform(k_st, (Vs, E), jnp.float32, -0.1, 0.1).at[0].set(0.0)
    w_ih = jax.random.uniform(k_ih, (4, E, H), jnp.float32, -0.1, 0.1)
    w_hh = jax.random.uniform(k_hh, (4, H, H), jnp.float32, -0.1, 0.1)
    bias = jax.random.uniform(k_b, (4, 1, H), jnp.float32, -0.1, 0.1)

    # variable-length, unsorted batch; position 0 carries a special (negative) symbol
    lengths = jnp.array([6, 8, 5, 7], dtype=jnp.int32)
    ids = jax.random.randint(k_ids, (T, B), 1, Vw).astype(jnp.int32)
    ids = jnp.where(jnp.arange(T)[:, None] < lengths[None, :], ids, 0)   # pad with 0
    ids = ids.at[0, :].set(-1)                                           # special SOS

    hidden, output = rnn_encoder_forward(
        ids, lengths, word_table, special_table, w_ih, w_hh, bias)
    jax.block_until_ready((hidden, output))
    assert hidden.shape == (1, B, H) and output.shape == (T, B, H)

    # tolerance-asserted pure-JAX reference (bf16 matmuls vs f32 reference)
    hidden_ref, output_ref = _reference_forward(
        ids, lengths, word_table, special_table, w_ih, w_hh, bias)
    err_h = float(jnp.max(jnp.abs(hidden - hidden_ref)))
    err_o = float(jnp.max(jnp.abs(output - output_ref)))
    assert err_h < 5e-2 and err_o < 5e-2, (err_h, err_o)

    print("KERNEL_OK")
</pallas_src>

<mosaic_0001>
module attributes {stable_mosaic.version = 11 : i64} {
  func.func @_lstm_block_kernel(%arg0: i32, %arg1: memref<8x1xi32, #tpu.memory_space<vmem>>, %arg2: memref<8x8x128xbf16, #tpu.memory_space<vmem>>, %arg3: memref<128x512xbf16, #tpu.memory_space<vmem>>, %arg4: memref<128x512xbf16, #tpu.memory_space<vmem>>, %arg5: memref<1x512xf32, #tpu.memory_space<vmem>>, %arg6: memref<8x8x128xbf16, #tpu.memory_space<vmem>>, %arg7: memref<1x8x128xbf16, #tpu.memory_space<vmem>>, %arg8: memref<8x128xf32, #tpu.memory_space<vmem>>, %arg9: memref<8x128xf32, #tpu.memory_space<vmem>>, %arg10: memref<8x8x512xf32, #tpu.memory_space<vmem>>) attributes {dimension_semantics = [#tpu.dimension_semantics<arbitrary>], iteration_bounds = array<i64: 1>, scalar_prefetch = 0 : i64, scratch_operands = 3 : i64, tpu.core_type = #tpu.core_type<tc>, window_params = [{pipeline_mode = #tpu.pipeline_mode<synchronous>, transform_indices = @transform_0, window_bounds = array<i64: 8, 1>}, {transform_indices = @transform_1, window_bounds = array<i64: 8, 8, 128>}, {pipeline_mode = #tpu.pipeline_mode<synchronous>, transform_indices = @transform_2, window_bounds = array<i64: 128, 512>}, {pipeline_mode = #tpu.pipeline_mode<synchronous>, transform_indices = @transform_3, window_bounds = array<i64: 128, 512>}, {pipeline_mode = #tpu.pipeline_mode<synchronous>, transform_indices = @transform_4, window_bounds = array<i64: 1, 512>}, {transform_indices = @transform_5, window_bounds = array<i64: 8, 8, 128>}, {pipeline_mode = #tpu.pipeline_mode<synchronous>, transform_indices = @transform_6, window_bounds = array<i64: 1, 8, 128>}]} {
    %c0_i32 = arith.constant 0 : i32
    %0 = arith.cmpi eq, %arg0, %c0_i32 : i32
    %1 = arith.extui %0 : i1 to i32
    %c0_i32_0 = arith.constant 0 : i32
    %2 = arith.cmpi ne, %1, %c0_i32_0 : i32
    scf.if %2 {
      %cst_98 = arith.constant 0.000000e+00 : f32
      %368 = vector.broadcast %cst_98 : f32 to vector<8x128xf32>
      %c0_99 = arith.constant 0 : index
      %c0_100 = arith.constant 0 : index
      %369 = vector.load %arg8[%c0_99, %c0_100] : memref<8x128xf32, #tpu.memory_space<vmem>>, vector<8x128xf32>
      tpu.vector_store %arg8[%c0_99, %c0_100], %368 {strides = array<i32>} : memref<8x128xf32, #tpu.memory_space<vmem>>, vector<8x128xf32>,
      %cst_101 = arith.constant 0.000000e+00 : f32
      %370 = vector.broadcast %cst_101 : f32 to vector<8x128xf32>
      %c0_102 = arith.constant 0 : index
      %c0_103 = arith.constant 0 : index
      %371 = vector.load %arg9[%c0_102, %c0_103] : memref<8x128xf32, #tpu.memory_space<vmem>>, vector<8x128xf32>
      tpu.vector_store %arg9[%c0_102, %c0_103], %370 {strides = array<i32>} : memref<8x128xf32, #tpu.memory_space<vmem>>, vector<8x128xf32>,
    } else {
    }
    %c0 = arith.constant 0 : index
    %c0_1 = arith.constant 0 : index
    %3 = vector.load %arg4[%c0, %c0_1] : memref<128x512xbf16, #tpu.memory_space<vmem>>, vector<128x512xbf16>
    %c0_2 = arith.constant 0 : index
    %c0_3 = arith.constant 0 : index
    %c0_4 = arith.constant 0 : index
    %4 = vector.load %arg2[%c0_2, %c0_3, %c0_4] : memref<8x8x128xbf16, #tpu.memory_space<vmem>>, vector<8x8x128xbf16>
    %5 = vector.shape_cast %4 : vector<8x8x128xbf16> to vector<64x128xbf16>
    %c0_5 = arith.constant 0 : index
    %c0_6 = arith.constant 0 : index
    %6 = vector.load %arg3[%c0_5, %c0_6] : memref<128x512xbf16, #tpu.memory_space<vmem>>, vector<128x512xbf16>
    %cst = arith.constant dense<0.000000e+00> : vector<64x512xf32>
    %7 = tpu.matmul %5, %6, %cst {dimension_numbers = #tpu.dot_dimension_numbers<[1], [0], [0], [1], [0, 0, 1, 1], [], []>} : vector<64x128xbf16>, vector<128x512xbf16>, vector<64x512xf32> -> vector<64x512xf32>
    %c0_7 = arith.constant 0 : index
    %c0_8 = arith.constant 0 : index
    %8 = vector.load %arg5[%c0_7, %c0_8] : memref<1x512xf32, #tpu.memory_space<vmem>>, vector<1x512xf32>
    %9 = vector.broadcast %8 : vector<1x512xf32> to vector<64x512xf32>
    %10 = arith.addf %7, %9 : vector<64x512xf32>
    %11 = vector.shape_cast %10 : vector<64x512xf32> to vector<8x8x512xf32>
    %c0_9 = arith.constant 0 : index
    %c0_10 = arith.constant 0 : index
    %c0_11 = arith.constant 0 : index
    %12 = vector.load %arg10[%c0_9, %c0_10, %c0_11] : memref<8x8x512xf32, #tpu.memory_space<vmem>>, vector<8x8x512xf32>
    tpu.vector_store %arg10[%c0_9, %c0_10, %c0_11], %11 {strides = array<i32>} : memref<8x8x512xf32, #tpu.memory_space<vmem>>, vector<8x8x512xf32>,
    %c0_12 = arith.constant 0 : index
    %c0_13 = arith.constant 0 : index
    %13 = vector.load %arg1[%c0_12, %c0_13] : memref<8x1xi32, #tpu.memory_space<vmem>>, vector<8x1xi32>
    %14 = vector.shape_cast %13 : vector<8x1xi32> to vector<8x1xi32>
    %15 = vector.broadcast %14 : vector<8x1xi32> to vector<8x128xi32>
    %c8_i32 = arith.constant 8 : i32
    %16 = arith.muli %arg0, %c8_i32 : i32
    %c0_14 = arith.constant 0 : index
    %c0_15 = arith.constant 0 : index
    %17 = vector.load %arg8[%c0_14, %c0_15] : memref<8x128xf32, #tpu.memory_space<vmem>>, vector<8x128xf32>
    %c0_16 = arith.constant 0 : index
    %c0_17 = arith.constant 0 : index
    %18 = vector.load %arg9[%c0_16, %c0_17] : memref<8x128xf32, #tpu.memory_space<vmem>>, vector<8x128xf32>
    %c0_i32_18 = arith.constant 0 : i32
    %19 = arith.index_cast %c0_i32_18 : i32 to index
    %c0_19 = arith.constant 0 : index
    %c0_20 = arith.constant 0 : index
    %20 = vector.load %arg10[%19, %c0_19, %c0_20] : memref<8x8x512xf32, #tpu.memory_space<vmem>>, vector<1x8x512xf32>
    %21 = vector.shape_cast %20 : vector<1x8x512xf32> to vector<8x512xf32>
    %22 = arith.truncf %17 : vector<8x128xf32> to vector<8x128xbf16>
    %cst_21 = arith.constant dense<0.000000e+00> : vector<8x512xf32>
    %23 = tpu.matmul %22, %3, %cst_21 {dimension_numbers = #tpu.dot_dimension_numbers<[1], [0], [0], [1], [0, 0, 1, 1], [], []>} : vector<8x128xbf16>, vector<128x512xbf16>, vector<8x512xf32> -> vector<8x512xf32>
    %24 = arith.addf %21, %23 : vector<8x512xf32>
    %25 = vector.extract_strided_slice %24 {offsets = [0, 0], sizes = [8, 128], strides = [1, 1]} : vector<8x512xf32> to vector<8x128xf32>
    %26 = arith.negf %25 : vector<8x128xf32>
    %27 = math.exp %26 : vector<8x128xf32>
    %cst_22 = arith.constant 1.000000e+00 : f32
    %28 = vector.broadcast %cst_22 : f32 to vector<8x128xf32>
    %29 = arith.addf %28, %27 : vector<8x128xf32>
    %30 = arith.divf %28, %29 : vector<8x128xf32>
    %31 = vector.extract_strided_slice %24 {offsets = [0, 128], sizes = [8, 128], strides = [1, 1]} : vector<8x512xf32> to vector<8x128xf32>
    %32 = arith.negf %31 : vector<8x128xf32>
    %33 = math.exp %32 : vector<8x128xf32>
    %cst_23 = arith.constant 1.000000e+00 : f32
    %34 = vector.broadcast %cst_23 : f32 to vector<8x128xf32>
    %35 = arith.addf %34, %33 : vector<8x128xf32>
    %36 = arith.divf %34, %35 : vector<8x128xf32>
    %37 = vector.extract_strided_slice %24 {offsets = [0, 256], sizes = [8, 128], strides = [1, 1]} : vector<8x512xf32> to vector<8x128xf32>
    %38 = math.tanh %37 : vector<8x128xf32>
    %39 = vector.extract_strided_slice %24 {offsets = [0, 384], sizes = [8, 128], strides = [1, 1]} : vector<8x512xf32> to vector<8x128xf32>
    %40 = arith.negf %39 : vector<8x128xf32>
    %41 = math.exp %40 : vector<8x128xf32>
    %cst_24 = arith.constant 1.000000e+00 : f32
    %42 = vector.broadcast %cst_24 : f32 to vector<8x128xf32>
    %43 = arith.addf %42, %41 : vector<8x128xf32>
    %44 = arith.divf %42, %43 : vector<8x128xf32>
    %45 = arith.mulf %36, %18 : vector<8x128xf32>
    %46 = arith.mulf %30, %38 : vector<8x128xf32>
    %47 = arith.addf %45, %46 : vector<8x128xf32>
    %48 = math.tanh %47 : vector<8x128xf32>
    %49 = arith.mulf %44, %48 : vector<8x128xf32>
    %50 = arith.addi %16, %c0_i32_18 : i32
    %51 = vector.broadcast %50 : i32 to vector<8x128xi32>
    %52 = arith.cmpi slt, %51, %15 : vector<8x128xi32>
    %53 = arith.select %52, %49, %17 : vector<8x128xi1>, vector<8x128xf32>
    %54 = arith.select %52, %47, %18 : vector<8x128xi1>, vector<8x128xf32>
    %cst_25 = arith.constant 0.000000e+00 : f32
    %55 = vector.broadcast %cst_25 : f32 to vector<8x128xf32>
    %56 = arith.select %52, %49, %55 : vector<8x128xi1>, vector<8x128xf32>
    %57 = arith.truncf %56 : vector<8x128xf32> to vector<8x128xbf16>
    %58 = arith.index_cast %c0_i32_18 : i32 to index
    %c0_26 = arith.constant 0 : index
    %c0_27 = arith.constant 0 : index
    %59 = vector.load %arg6[%58, %c0_26, %c0_27] : memref<8x8x128xbf16, #tpu.memory_space<vmem>>, vector<1x8x128xbf16>
    %60 = vector.shape_cast %59 : vector<1x8x128xbf16> to vector<8x128xbf16>
    %61 = vector.shape_cast %57 : vector<8x128xbf16> to vector<1x8x128xbf16>
    tpu.vector_store %arg6[%58, %c0_26, %c0_27], %61 {strides = array<i32>} : memref<8x8x128xbf16, #tpu.memory_space<vmem>>, vector<1x8x128xbf16>,
    %c1_i32 = arith.constant 1 : i32
    %62 = arith.index_cast %c1_i32 : i32 to index
    %c0_28 = arith.constant 0 : index
    %c0_29 = arith.constant 0 : index
    %63 = vector.load %arg10[%62, %c0_28, %c0_29] : memref<8x8x512xf32, #tpu.memory_space<vmem>>, vector<1x8x512xf32>
    %64 = vector.shape_cast %63 : vector<1x8x512xf32> to vector<8x512xf32>
    %65 = arith.truncf %53 : vector<8x128xf32> to vector<8x128xbf16>
    %cst_30 = arith.constant dense<0.000000e+00> : vector<8x512xf32>
    %66 = tpu.matmul %65, %3, %cst_30 {dimension_numbers = #tpu.dot_dimension_numbers<[1], [0], [0], [1], [0, 0, 1, 1], [], []>} : vector<8x128xbf16>, vector<128x512xbf16>, vector<8x512xf32> -> vector<8x512xf32>
    %67 = arith.addf %64, %66 : vector<8x512xf32>
    %68 = vector.extract_strided_slice %67 {offsets = [0, 0], sizes = [8, 128], strides = [1, 1]} : vector<8x512xf32> to vector<8x128xf32>
    %69 = arith.negf %68 : vector<8x128xf32>
    %70 = math.exp %69 : vector<8x128xf32>
    %cst_31 = arith.constant 1.000000e+00 : f32
    %71 = vector.broadcast %cst_31 : f32 to vector<8x128xf32>
    %72 = arith.addf %71, %70 : vector<8x128xf32>
    %73 = arith.divf %71, %72 : vector<8x128xf32>
    %74 = vector.extract_strided_slice %67 {offsets = [0, 128], sizes = [8, 128], strides = [1, 1]} : vector<8x512xf32> to vector<8x128xf32>
    %75 = arith.negf %74 : vector<8x128xf32>
    %76 = math.exp %75 : vector<8x128xf32>
    %cst_32 = arith.constant 1.000000e+00 : f32
    %77 = vector.broadcast %cst_32 : f32 to vector<8x128xf32>
    %78 = arith.addf %77, %76 : vector<8x128xf32>
    %79 = arith.divf %77, %78 : vector<8x128xf32>
    %80 = vector.extract_strided_slice %67 {offsets = [0, 256], sizes = [8, 128], strides = [1, 1]} : vector<8x512xf32> to vector<8x128xf32>
    %81 = math.tanh %80 : vector<8x128xf32>
    %82 = vector.extract_strided_slice %67 {offsets = [0, 384], sizes = [8, 128], strides = [1, 1]} : vector<8x512xf32> to vector<8x128xf32>
    %83 = arith.negf %82 : vector<8x128xf32>
    %84 = math.exp %83 : vector<8x128xf32>
    %cst_33 = arith.constant 1.000000e+00 : f32
    %85 = vector.broadcast %cst_33 : f32 to vector<8x128xf32>
    %86 = arith.addf %85, %84 : vector<8x128xf32>
    %87 = arith.divf %85, %86 : vector<8x128xf32>
    %88 = arith.mulf %79, %54 : vector<8x128xf32>
    %89 = arith.mulf %73, %81 : vector<8x128xf32>
    %90 = arith.addf %88, %89 : vector<8x128xf32>
    %91 = math.tanh %90 : vector<8x128xf32>
    %92 = arith.mulf %87, %91 : vector<8x128xf32>
    %93 = arith.addi %16, %c1_i32 : i32
    %94 = vector.broadcast %93 : i32 to vector<8x128xi32>
    %95 = arith.cmpi slt, %94, %15 : vector<8x128xi32>
    %96 = arith.select %95, %92, %53 : vector<8x128xi1>, vector<8x128xf32>
    %97 = arith.select %95, %90, %54 : vector<8x128xi1>, vector<8x128xf32>
    %cst_34 = arith.constant 0.000000e+00 : f32
    %98 = vector.broadcast %cst_34 : f32 to vector<8x128xf32>
    %99 = arith.select %95, %92, %98 : vector<8x128xi1>, vector<8x128xf32>
    %100 = arith.truncf %99 : vector<8x128xf32> to vector<8x128xbf16>
    %101 = arith.index_cast %c1_i32 : i32 to index
    %c0_35 = arith.constant 0 : index
    %c0_36 = arith.constant 0 : index
    %102 = vector.load %arg6[%101, %c0_35, %c0_36] : memref<8x8x128xbf16, #tpu.memory_space<vmem>>, vector<1x8x128xbf16>
    %103 = vector.shape_cast %102 : vector<1x8x128xbf16> to vector<8x128xbf16>
    %104 = vector.shape_cast %100 : vector<8x128xbf16> to vector<1x8x128xbf16>
    tpu.vector_store %arg6[%101, %c0_35, %c0_36], %104 {strides = array<i32>} : memref<8x8x128xbf16, #tpu.memory_space<vmem>>, vector<1x8x128xbf16>,
    %c2_i32 = arith.constant 2 : i32
    %105 = arith.index_cast %c2_i32 : i32 to index
    %c0_37 = arith.constant 0 : index
    %c0_38 = arith.constant 0 : index
    %106 = vector.load %arg10[%105, %c0_37, %c0_38] : memref<8x8x512xf32, #tpu.memory_space<vmem>>, vector<1x8x512xf32>
    %107 = vector.shape_cast %106 : vector<1x8x512xf32> to vector<8x512xf32>
    %108 = arith.truncf %96 : vector<8x128xf32> to vector<8x128xbf16>
    %cst_39 = arith.constant dense<0.000000e+00> : vector<8x512xf32>
    %109 = tpu.matmul %108, %3, %cst_39 {dimension_numbers = #tpu.dot_dimension_numbers<[1], [0], [0], [1], [0, 0, 1, 1], [], []>} : vector<8x128xbf16>, vector<128x512xbf16>, vector<8x512xf32> -> vector<8x512xf32>
    %110 = arith.addf %107, %109 : vector<8x512xf32>
    %111 = vector.extract_strided_slice %110 {offsets = [0, 0], sizes = [8, 128], strides = [1, 1]} : vector<8x512xf32> to vector<8x128xf32>
    %112 = arith.negf %111 : vector<8x128xf32>
    %113 = math.exp %112 : vector<8x128xf32>
    %cst_40 = arith.constant 1.000000e+00 : f32
    %114 = vector.broadcast %cst_40 : f32 to vector<8x128xf32>
    %115 = arith.addf %114, %113 : vector<8x128xf32>
    %116 = arith.divf %114, %115 : vector<8x128xf32>
    %117 = vector.extract_strided_slice %110 {offsets = [0, 128], sizes = [8, 128], strides = [1, 1]} : vector<8x512xf32> to vector<8x128xf32>
    %118 = arith.negf %117 : vector<8x128xf32>
    %119 = math.exp %118 : vector<8x128xf32>
    %cst_41 = arith.constant 1.000000e+00 : f32
    %120 = vector.broadcast %cst_41 : f32 to vector<8x128xf32>
    %121 = arith.addf %120, %119 : vector<8x128xf32>
    %122 = arith.divf %120, %121 : vector<8x128xf32>
    %123 = vector.extract_strided_slice %110 {offsets = [0, 256], sizes = [8, 128], strides = [1, 1]} : vector<8x512xf32> to vector<8x128xf32>
    %124 = math.tanh %123 : vector<8x128xf32>
    %125 = vector.extract_strided_slice %110 {offsets = [0, 384], sizes = [8, 128], strides = [1, 1]} : vector<8x512xf32> to vector<8x128xf32>
    %126 = arith.negf %125 : vector<8x128xf32>
    %127 = math.exp %126 : vector<8x128xf32>
    %cst_42 = arith.constant 1.000000e+00 : f32
    %128 = vector.broadcast %cst_42 : f32 to vector<8x128xf32>
    %129 = arith.addf %128, %127 : vector<8x128xf32>
    %130 = arith.divf %128, %129 : vector<8x128xf32>
    %131 = arith.mulf %122, %97 : vector<8x128xf32>
    %132 = arith.mulf %116, %124 : vector<8x128xf32>
    %133 = arith.addf %131, %132 : vector<8x128xf32>
    %134 = math.tanh %133 : vector<8x128xf32>
    %135 = arith.mulf %130, %134 : vector<8x128xf32>
    %136 = arith.addi %16, %c2_i32 : i32
    %137 = vector.broadcast %136 : i32 to vector<8x128xi32>
    %138 = arith.cmpi slt, %137, %15 : vector<8x128xi32>
    %139 = arith.select %138, %135, %96 : vector<8x128xi1>, vector<8x128xf32>
    %140 = arith.select %138, %133, %97 : vector<8x128xi1>, vector<8x128xf32>
    %cst_43 = arith.constant 0.000000e+00 : f32
    %141 = vector.broadcast %cst_43 : f32 to vector<8x128xf32>
    %142 = arith.select %138, %135, %141 : vector<8x128xi1>, vector<8x128xf32>
    %143 = arith.truncf %142 : vector<8x128xf32> to vector<8x128xbf16>
    %144 = arith.index_cast %c2_i32 : i32 to index
    %c0_44 = arith.constant 0 : index
    %c0_45 = arith.constant 0 : index
    %145 = vector.load %arg6[%144, %c0_44, %c0_45] : memref<8x8x128xbf16, #tpu.memory_space<vmem>>, vector<1x8x128xbf16>
    %146 = vector.shape_cast %145 : vector<1x8x128xbf16> to vector<8x128xbf16>
    %147 = vector.shape_cast %143 : vector<8x128xbf16> to vector<1x8x128xbf16>
    tpu.vector_store %arg6[%144, %c0_44, %c0_45], %147 {strides = array<i32>} : memref<8x8x128xbf16, #tpu.memory_space<vmem>>, vector<1x8x128xbf16>,
    %c3_i32 = arith.constant 3 : i32
    %148 = arith.index_cast %c3_i32 : i32 to index
    %c0_46 = arith.constant 0 : index
    %c0_47 = arith.constant 0 : index
    %149 = vector.load %arg10[%148, %c0_46, %c0_47] : memref<8x8x512xf32, #tpu.memory_space<vmem>>, vector<1x8x512xf32>
    %150 = vector.shape_cast %149 : vector<1x8x512xf32> to vector<8x512xf32>
    %151 = arith.truncf %139 : vector<8x128xf32> to vector<8x128xbf16>
    %cst_48 = arith.constant dense<0.000000e+00> : vector<8x512xf32>
    %152 = tpu.matmul %151, %3, %cst_48 {dimension_numbers = #tpu.dot_dimension_numbers<[1], [0], [0], [1], [0, 0, 1, 1], [], []>} : vector<8x128xbf16>, vector<128x512xbf16>, vector<8x512xf32> -> vector<8x512xf32>
    %153 = arith.addf %150, %152 : vector<8x512xf32>
    %154 = vector.extract_strided_slice %153 {offsets = [0, 0], sizes = [8, 128], strides = [1, 1]} : vector<8x512xf32> to vector<8x128xf32>
    %155 = arith.negf %154 : vector<8x128xf32>
    %156 = math.exp %155 : vector<8x128xf32>
    %cst_49 = arith.constant 1.000000e+00 : f32
    %157 = vector.broadcast %cst_49 : f32 to vector<8x128xf32>
    %158 = arith.addf %157, %156 : vector<8x128xf32>
    %159 = arith.divf %157, %158 : vector<8x128xf32>
    %160 = vector.extract_strided_slice %153 {offsets = [0, 128], sizes = [8, 128], strides = [1, 1]} : vector<8x512xf32> to vector<8x128xf32>
    %161 = arith.negf %160 : vector<8x128xf32>
    %162 = math.exp %161 : vector<8x128xf32>
    %cst_50 = arith.constant 1.000000e+00 : f32
    %163 = vector.broadcast %cst_50 : f32 to vector<8x128xf32>
    %164 = arith.addf %163, %162 : vector<8x128xf32>
    %165 = arith.divf %163, %164 : vector<8x128xf32>
    %166 = vector.extract_strided_slice %153 {offsets = [0, 256], sizes = [8, 128], strides = [1, 1]} : vector<8x512xf32> to vector<8x128xf32>
    %167 = math.tanh %166 : vector<8x128xf32>
    %168 = vector.extract_strided_slice %153 {offsets = [0, 384], sizes = [8, 128], strides = [1, 1]} : vector<8x512xf32> to vector<8x128xf32>
    %169 = arith.negf %168 : vector<8x128xf32>
    %170 = math.exp %169 : vector<8x128xf32>
    %cst_51 = arith.constant 1.000000e+00 : f32
    %171 = vector.broadcast %cst_51 : f32 to vector<8x128xf32>
    %172 = arith.addf %171, %170 : vector<8x128xf32>
    %173 = arith.divf %171, %172 : vector<8x128xf32>
    %174 = arith.mulf %165, %140 : vector<8x128xf32>
    %175 = arith.mulf %159, %167 : vector<8x128xf32>
    %176 = arith.addf %174, %175 : vector<8x128xf32>
    %177 = math.tanh %176 : vector<8x128xf32>
    %178 = arith.mulf %173, %177 : vector<8x128xf32>
    %179 = arith.addi %16, %c3_i32 : i32
    %180 = vector.broadcast %179 : i32 to vector<8x128xi32>
    %181 = arith.cmpi slt, %180, %15 : vector<8x128xi32>
    %182 = arith.select %181, %178, %139 : vector<8x128xi1>, vector<8x128xf32>
    %183 = arith.select %181, %176, %140 : vector<8x128xi1>, vector<8x128xf32>
    %cst_52 = arith.constant 0.000000e+00 : f32
    %184 = vector.broadcast %cst_52 : f32 to vector<8x128xf32>
    %185 = arith.select %181, %178, %184 : vector<8x128xi1>, vector<8x128xf32>
    %186 = arith.truncf %185 : vector<8x128xf32> to vector<8x128xbf16>
    %187 = arith.index_cast %c3_i32 : i32 to index
    %c0_53 = arith.constant 0 : index
    %c0_54 = arith.constant 0 : index
    %188 = vector.load %arg6[%187, %c0_53, %c0_54] : memref<8x8x128xbf16, #tpu.memory_space<vmem>>, vector<1x8x128xbf16>
    %189 = vector.shape_cast %188 : vector<1x8x128xbf16> to vector<8x128xbf16>
    %190 = vector.shape_cast %186 : vector<8x128xbf16> to vector<1x8x128xbf16>
    tpu.vector_store %arg6[%187, %c0_53, %c0_54], %190 {strides = array<i32>} : memref<8x8x128xbf16, #tpu.memory_space<vmem>>, vector<1x8x128xbf16>,
    %c4_i32 = arith.constant 4 : i32
    %191 = arith.index_cast %c4_i32 : i32 to index
    %c0_55 = arith.constant 0 : index
    %c0_56 = arith.constant 0 : index
    %192 = vector.load %arg10[%191, %c0_55, %c0_56] : memref<8x8x512xf32, #tpu.memory_space<vmem>>, vector<1x8x512xf32>
    %193 = vector.shape_cast %192 : vector<1x8x512xf32> to vector<8x512xf32>
    %194 = arith.truncf %182 : vector<8x128xf32> to vector<8x128xbf16>
    %cst_57 = arith.constant dense<0.000000e+00> : vector<8x512xf32>
    %195 = tpu.matmul %194, %3, %cst_57 {dimension_numbers = #tpu.dot_dimension_numbers<[1], [0], [0], [1], [0, 0, 1, 1], [], []>} : vector<8x128xbf16>, vector<128x512xbf16>, vector<8x512xf32> -> vector<8x512xf32>
    %196 = arith.addf %193, %195 : vector<8x512xf32>
    %197 = vector.extract_strided_slice %196 {offsets = [0, 0], sizes = [8, 128], strides = [1, 1]} : vector<8x512xf32> to vector<8x128xf32>
    %198 = arith.negf %197 : vector<8x128xf32>
    %199 = math.exp %198 : vector<8x128xf32>
    %cst_58 = arith.constant 1.000000e+00 : f32
    %200 = vector.broadcast %cst_58 : f32 to vector<8x128xf32>
    %201 = arith.addf %200, %199 : vector<8x128xf32>
    %202 = arith.divf %200, %201 : vector<8x128xf32>
    %203 = vector.extract_strided_slice %196 {offsets = [0, 128], sizes = [8, 128], strides = [1, 1]} : vector<8x512xf32> to vector<8x128xf32>
    %204 = arith.negf %203 : vector<8x128xf32>
    %205 = math.exp %204 : vector<8x128xf32>
    %cst_59 = arith.constant 1.000000e+00 : f32
    %206 = vector.broadcast %cst_59 : f32 to vector<8x128xf32>
    %207 = arith.addf %206, %205 : vector<8x128xf32>
    %208 = arith.divf %206, %207 : vector<8x128xf32>
    %209 = vector.extract_strided_slice %196 {offsets = [0, 256], sizes = [8, 128], strides = [1, 1]} : vector<8x512xf32> to vector<8x128xf32>
    %210 = math.tanh %209 : vector<8x128xf32>
    %211 = vector.extract_strided_slice %196 {offsets = [0, 384], sizes = [8, 128], strides = [1, 1]} : vector<8x512xf32> to vector<8x128xf32>
    %212 = arith.negf %211 : vector<8x128xf32>
    %213 = math.exp %212 : vector<8x128xf32>
    %cst_60 = arith.constant 1.000000e+00 : f32
    %214 = vector.broadcast %cst_60 : f32 to vector<8x128xf32>
    %215 = arith.addf %214, %213 : vector<8x128xf32>
    %216 = arith.divf %214, %215 : vector<8x128xf32>
    %217 = arith.mulf %208, %183 : vector<8x128xf32>
    %218 = arith.mulf %202, %210 : vector<8x128xf32>
    %219 = arith.addf %217, %218 : vector<8x128xf32>
    %220 = math.tanh %219 : vector<8x128xf32>
    %221 = arith.mulf %216, %220 : vector<8x128xf32>
    %222 = arith.addi %16, %c4_i32 : i32
    %223 = vector.broadcast %222 : i32 to vector<8x128xi32>
    %224 = arith.cmpi slt, %223, %15 : vector<8x128xi32>
    %225 = arith.select %224, %221, %182 : vector<8x128xi1>, vector<8x128xf32>
    %226 = arith.select %224, %219, %183 : vector<8x128xi1>, vector<8x128xf32>
    %cst_61 = arith.constant 0.000000e+00 : f32
    %227 = vector.broadcast %cst_61 : f32 to vector<8x128xf32>
    %228 = arith.select %224, %221, %227 : vector<8x128xi1>, vector<8x128xf32>
    %229 = arith.truncf %228 : vector<8x128xf32> to vector<8x128xbf16>
    %230 = arith.index_cast %c4_i32 : i32 to index
    %c0_62 = arith.constant 0 : index
    %c0_63 = arith.constant 0 : index
    %231 = vector.load %arg6[%230, %c0_62, %c0_63] : memref<8x8x128xbf16, #tpu.memory_space<vmem>>, vector<1x8x128xbf16>
    %232 = vector.shape_cast %231 : vector<1x8x128xbf16> to vector<8x128xbf16>
    %233 = vector.shape_cast %229 : vector<8x128xbf16> to vector<1x8x128xbf16>
    tpu.vector_store %arg6[%230, %c0_62, %c0_63], %233 {strides = array<i32>} : memref<8x8x128xbf16, #tpu.memory_space<vmem>>, vector<1x8x128xbf16>,
    %c5_i32 = arith.constant 5 : i32
    %234 = arith.index_cast %c5_i32 : i32 to index
    %c0_64 = arith.constant 0 : index
    %c0_65 = arith.constant 0 : index
    %235 = vector.load %arg10[%234, %c0_64, %c0_65] : memref<8x8x512xf32, #tpu.memory_space<vmem>>, vector<1x8x512xf32>
    %236 = vector.shape_cast %235 : vector<1x8x512xf32> to vector<8x512xf32>
    %237 = arith.truncf %225 : vector<8x128xf32> to vector<8x128xbf16>
    %cst_66 = arith.constant dense<0.000000e+00> : vector<8x512xf32>
    %238 = tpu.matmul %237, %3, %cst_66 {dimension_numbers = #tpu.dot_dimension_numbers<[1], [0], [0], [1], [0, 0, 1, 1], [], []>} : vector<8x128xbf16>, vector<128x512xbf16>, vector<8x512xf32> -> vector<8x512xf32>
    %239 = arith.addf %236, %238 : vector<8x512xf32>
    %240 = vector.extract_strided_slice %239 {offsets = [0, 0], sizes = [8, 128], strides = [1, 1]} : vector<8x512xf32> to vector<8x128xf32>
    %241 = arith.negf %240 : vector<8x128xf32>
    %242 = math.exp %241 : vector<8x128xf32>
    %cst_67 = arith.constant 1.000000e+00 : f32
    %243 = vector.broadcast %cst_67 : f32 to vector<8x128xf32>
    %244 = arith.addf %243, %242 : vector<8x128xf32>
    %245 = arith.divf %243, %244 : vector<8x128xf32>
    %246 = vector.extract_strided_slice %239 {offsets = [0, 128], sizes = [8, 128], strides = [1, 1]} : vector<8x512xf32> to vector<8x128xf32>
    %247 = arith.negf %246 : vector<8x128xf32>
    %248 = math.exp %247 : vector<8x128xf32>
    %cst_68 = arith.constant 1.000000e+00 : f32
    %249 = vector.broadcast %cst_68 : f32 to vector<8x128xf32>
    %250 = arith.addf %249, %248 : vector<8x128xf32>
    %251 = arith.divf %249, %250 : vector<8x128xf32>
    %252 = vector.extract_strided_slice %239 {offsets = [0, 256], sizes = [8, 128], strides = [1, 1]} : vector<8x512xf32> to vector<8x128xf32>
    %253 = math.tanh %252 : vector<8x128xf32>
    %254 = vector.extract_strided_slice %239 {offsets = [0, 384], sizes = [8, 128], strides = [1, 1]} : vector<8x512xf32> to vector<8x128xf32>
    %255 = arith.negf %254 : vector<8x128xf32>
    %256 = math.exp %255 : vector<8x128xf32>
    %cst_69 = arith.constant 1.000000e+00 : f32
    %257 = vector.broadcast %cst_69 : f32 to vector<8x128xf32>
    %258 = arith.addf %257, %256 : vector<8x128xf32>
    %259 = arith.divf %257, %258 : vector<8x128xf32>
    %260 = arith.mulf %251, %226 : vector<8x128xf32>
    %261 = arith.mulf %245, %253 : vector<8x128xf32>
    %262 = arith.addf %260, %261 : vector<8x128xf32>
    %263 = math.tanh %262 : vector<8x128xf32>
    %264 = arith.mulf %259, %263 : vector<8x128xf32>
    %265 = arith.addi %16, %c5_i32 : i32
    %266 = vector.broadcast %265 : i32 to vector<8x128xi32>
    %267 = arith.cmpi slt, %266, %15 : vector<8x128xi32>
    %268 = arith.select %267, %264, %225 : vector<8x128xi1>, vector<8x128xf32>
    %269 = arith.select %267, %262, %226 : vector<8x128xi1>, vector<8x128xf32>
    %cst_70 = arith.constant 0.000000e+00 : f32
    %270 = vector.broadcast %cst_70 : f32 to vector<8x128xf32>
    %271 = arith.select %267, %264, %270 : vector<8x128xi1>, vector<8x128xf32>
    %272 = arith.truncf %271 : vector<8x128xf32> to vector<8x128xbf16>
    %273 = arith.index_cast %c5_i32 : i32 to index
    %c0_71 = arith.constant 0 : index
    %c0_72 = arith.constant 0 : index
    %274 = vector.load %arg6[%273, %c0_71, %c0_72] : memref<8x8x128xbf16, #tpu.memory_space<vmem>>, vector<1x8x128xbf16>
    %275 = vector.shape_cast %274 : vector<1x8x128xbf16> to vector<8x128xbf16>
    %276 = vector.shape_cast %272 : vector<8x128xbf16> to vector<1x8x128xbf16>
    tpu.vector_store %arg6[%273, %c0_71, %c0_72], %276 {strides = array<i32>} : memref<8x8x128xbf16, #tpu.memory_space<vmem>>, vector<1x8x128xbf16>,
    %c6_i32 = arith.constant 6 : i32
    %277 = arith.index_cast %c6_i32 : i32 to index
    %c0_73 = arith.constant 0 : index
    %c0_74 = arith.constant 0 : index
    %278 = vector.load %arg10[%277, %c0_73, %c0_74] : memref<8x8x512xf32, #tpu.memory_space<vmem>>, vector<1x8x512xf32>
    %279 = vector.shape_cast %278 : vector<1x8x512xf32> to vector<8x512xf32>
    %280 = arith.truncf %268 : vector<8x128xf32> to vector<8x128xbf16>
    %cst_75 = arith.constant dense<0.000000e+00> : vector<8x512xf32>
    %281 = tpu.matmul %280, %3, %cst_75 {dimension_numbers = #tpu.dot_dimension_numbers<[1], [0], [0], [1], [0, 0, 1, 1], [], []>} : vector<8x128xbf16>, vector<128x512xbf16>, vector<8x512xf32> -> vector<8x512xf32>
    %282 = arith.addf %279, %281 : vector<8x512xf32>
    %283 = vector.extract_strided_slice %282 {offsets = [0, 0], sizes = [8, 128], strides = [1, 1]} : vector<8x512xf32> to vector<8x128xf32>
    %284 = arith.negf %283 : vector<8x128xf32>
    %285 = math.exp %284 : vector<8x128xf32>
    %cst_76 = arith.constant 1.000000e+00 : f32
    %286 = vector.broadcast %cst_76 : f32 to vector<8x128xf32>
    %287 = arith.addf %286, %285 : vector<8x128xf32>
    %288 = arith.divf %286, %287 : vector<8x128xf32>
    %289 = vector.extract_strided_slice %282 {offsets = [0, 128], sizes = [8, 128], strides = [1, 1]} : vector<8x512xf32> to vector<8x128xf32>
    %290 = arith.negf %289 : vector<8x128xf32>
    %291 = math.exp %290 : vector<8x128xf32>
    %cst_77 = arith.constant 1.000000e+00 : f32
    %292 = vector.broadcast %cst_77 : f32 to vector<8x128xf32>
    %293 = arith.addf %292, %291 : vector<8x128xf32>
    %294 = arith.divf %292, %293 : vector<8x128xf32>
    %295 = vector.extract_strided_slice %282 {offsets = [0, 256], sizes = [8, 128], strides = [1, 1]} : vector<8x512xf32> to vector<8x128xf32>
    %296 = math.tanh %295 : vector<8x128xf32>
    %297 = vector.extract_strided_slice %282 {offsets = [0, 384], sizes = [8, 128], strides = [1, 1]} : vector<8x512xf32> to vector<8x128xf32>
    %298 = arith.negf %297 : vector<8x128xf32>
    %299 = math.exp %298 : vector<8x128xf32>
    %cst_78 = arith.constant 1.000000e+00 : f32
    %300 = vector.broadcast %cst_78 : f32 to vector<8x128xf32>
    %301 = arith.addf %300, %299 : vector<8x128xf32>
    %302 = arith.divf %300, %301 : vector<8x128xf32>
    %303 = arith.mulf %294, %269 : vector<8x128xf32>
    %304 = arith.mulf %288, %296 : vector<8x128xf32>
    %305 = arith.addf %303, %304 : vector<8x128xf32>
    %306 = math.tanh %305 : vector<8x128xf32>
    %307 = arith.mulf %302, %306 : vector<8x128xf32>
    %308 = arith.addi %16, %c6_i32 : i32
    %309 = vector.broadcast %308 : i32 to vector<8x128xi32>
    %310 = arith.cmpi slt, %309, %15 : vector<8x128xi32>
    %311 = arith.select %310, %307, %268 : vector<8x128xi1>, vector<8x128xf32>
    %312 = arith.select %310, %305, %269 : vector<8x128xi1>, vector<8x128xf32>
    %cst_79 = arith.constant 0.000000e+00 : f32
    %313 = vector.broadcast %cst_79 : f32 to vector<8x128xf32>
    %314 = arith.select %310, %307, %313 : vector<8x128xi1>, vector<8x128xf32>
    %315 = arith.truncf %314 : vector<8x128xf32> to vector<8x128xbf16>
    %316 = arith.index_cast %c6_i32 : i32 to index
    %c0_80 = arith.constant 0 : index
    %c0_81 = arith.constant 0 : index
    %317 = vector.load %arg6[%316, %c0_80, %c0_81] : memref<8x8x128xbf16, #tpu.memory_space<vmem>>, vector<1x8x128xbf16>
    %318 = vector.shape_cast %317 : vector<1x8x128xbf16> to vector<8x128xbf16>
    %319 = vector.shape_cast %315 : vector<8x128xbf16> to vector<1x8x128xbf16>
    tpu.vector_store %arg6[%316, %c0_80, %c0_81], %319 {strides = array<i32>} : memref<8x8x128xbf16, #tpu.memory_space<vmem>>, vector<1x8x128xbf16>,
    %c7_i32 = arith.constant 7 : i32
    %320 = arith.index_cast %c7_i32 : i32 to index
    %c0_82 = arith.constant 0 : index
    %c0_83 = arith.constant 0 : index
    %321 = vector.load %arg10[%320, %c0_82, %c0_83] : memref<8x8x512xf32, #tpu.memory_space<vmem>>, vector<1x8x512xf32>
    %322 = vector.shape_cast %321 : vector<1x8x512xf32> to vector<8x512xf32>
    %323 = arith.truncf %311 : vector<8x128xf32> to vector<8x128xbf16>
    %cst_84 = arith.constant dense<0.000000e+00> : vector<8x512xf32>
    %324 = tpu.matmul %323, %3, %cst_84 {dimension_numbers = #tpu.dot_dimension_numbers<[1], [0], [0], [1], [0, 0, 1, 1], [], []>} : vector<8x128xbf16>, vector<128x512xbf16>, vector<8x512xf32> -> vector<8x512xf32>
    %325 = arith.addf %322, %324 : vector<8x512xf32>
    %326 = vector.extract_strided_slice %325 {offsets = [0, 0], sizes = [8, 128], strides = [1, 1]} : vector<8x512xf32> to vector<8x128xf32>
    %327 = arith.negf %326 : vector<8x128xf32>
    %328 = math.exp %327 : vector<8x128xf32>
    %cst_85 = arith.constant 1.000000e+00 : f32
    %329 = vector.broadcast %cst_85 : f32 to vector<8x128xf32>
    %330 = arith.addf %329, %328 : vector<8x128xf32>
    %331 = arith.divf %329, %330 : vector<8x128xf32>
    %332 = vector.extract_strided_slice %325 {offsets = [0, 128], sizes = [8, 128], strides = [1, 1]} : vector<8x512xf32> to vector<8x128xf32>
    %333 = arith.negf %332 : vector<8x128xf32>
    %334 = math.exp %333 : vector<8x128xf32>
    %cst_86 = arith.constant 1.000000e+00 : f32
    %335 = vector.broadcast %cst_86 : f32 to vector<8x128xf32>
    %336 = arith.addf %335, %334 : vector<8x128xf32>
    %337 = arith.divf %335, %336 : vector<8x128xf32>
    %338 = vector.extract_strided_slice %325 {offsets = [0, 256], sizes = [8, 128], strides = [1, 1]} : vector<8x512xf32> to vector<8x128xf32>
    %339 = math.tanh %338 : vector<8x128xf32>
    %340 = vector.extract_strided_slice %325 {offsets = [0, 384], sizes = [8, 128], strides = [1, 1]} : vector<8x512xf32> to vector<8x128xf32>
    %341 = arith.negf %340 : vector<8x128xf32>
    %342 = math.exp %341 : vector<8x128xf32>
    %cst_87 = arith.constant 1.000000e+00 : f32
    %343 = vector.broadcast %cst_87 : f32 to vector<8x128xf32>
    %344 = arith.addf %343, %342 : vector<8x128xf32>
    %345 = arith.divf %343, %344 : vector<8x128xf32>
    %346 = arith.mulf %337, %312 : vector<8x128xf32>
    %347 = arith.mulf %331, %339 : vector<8x128xf32>
    %348 = arith.addf %346, %347 : vector<8x128xf32>
    %349 = math.tanh %348 : vector<8x128xf32>
    %350 = arith.mulf %345, %349 : vector<8x128xf32>
    %351 = arith.addi %16, %c7_i32 : i32
    %352 = vector.broadcast %351 : i32 to vector<8x128xi32>
    %353 = arith.cmpi slt, %352, %15 : vector<8x128xi32>
    %354 = arith.select %353, %350, %311 : vector<8x128xi1>, vector<8x128xf32>
    %355 = arith.select %353, %348, %312 : vector<8x128xi1>, vector<8x128xf32>
    %cst_88 = arith.constant 0.000000e+00 : f32
    %356 = vector.broadcast %cst_88 : f32 to vector<8x128xf32>
    %357 = arith.select %353, %350, %356 : vector<8x128xi1>, vector<8x128xf32>
    %358 = arith.truncf %357 : vector<8x128xf32> to vector<8x128xbf16>
    %359 = arith.index_cast %c7_i32 : i32 to index
    %c0_89 = arith.constant 0 : index
    %c0_90 = arith.constant 0 : index
    %360 = vector.load %arg6[%359, %c0_89, %c0_90] : memref<8x8x128xbf16, #tpu.memory_space<vmem>>, vector<1x8x128xbf16>
    %361 = vector.shape_cast %360 : vector<1x8x128xbf16> to vector<8x128xbf16>
    %362 = vector.shape_cast %358 : vector<8x128xbf16> to vector<1x8x128xbf16>
    tpu.vector_store %arg6[%359, %c0_89, %c0_90], %362 {strides = array<i32>} : memref<8x8x128xbf16, #tpu.memory_space<vmem>>, vector<1x8x128xbf16>,
    %c8_i32_91 = arith.constant 8 : i32
    %c0_92 = arith.constant 0 : index
    %c0_93 = arith.constant 0 : index
    %363 = vector.load %arg8[%c0_92, %c0_93] : memref<8x128xf32, #tpu.memory_space<vmem>>, vector<8x128xf32>
    tpu.vector_store %arg8[%c0_92, %c0_93], %354 {strides = array<i32>} : memref<8x128xf32, #tpu.memory_space<vmem>>, vector<8x128xf32>,
    %c0_94 = arith.constant 0 : index
    %c0_95 = arith.constant 0 : index
    %364 = vector.load %arg9[%c0_94, %c0_95] : memref<8x128xf32, #tpu.memory_space<vmem>>, vector<8x128xf32>
    tpu.vector_store %arg9[%c0_94, %c0_95], %355 {strides = array<i32>} : memref<8x128xf32, #tpu.memory_space<vmem>>, vector<8x128xf32>,
    %c0_i32_96 = arith.constant 0 : i32
    %365 = arith.cmpi eq, %arg0, %c0_i32_96 : i32
    %366 = arith.extui %365 : i1 to i32
    %c0_i32_97 = arith.constant 0 : i32
    %367 = arith.cmpi ne, %366, %c0_i32_97 : i32
    scf.if %367 {
      %368 = arith.truncf %354 : vector<8x128xf32> to vector<8x128xbf16>
      %c0_98 = arith.constant 0 : index
      %c0_99 = arith.constant 0 : index
      %c0_100 = arith.constant 0 : index
      %369 = vector.load %arg7[%c0_98, %c0_99, %c0_100] : memref<1x8x128xbf16, #tpu.memory_space<vmem>>, vector<1x8x128xbf16>
      %370 = vector.shape_cast %369 : vector<1x8x128xbf16> to vector<8x128xbf16>
      %371 = vector.shape_cast %368 : vector<8x128xbf16> to vector<1x8x128xbf16>
      tpu.vector_store %arg7[%c0_98, %c0_99, %c0_100], %371 {strides = array<i32>} : memref<1x8x128xbf16, #tpu.memory_space<vmem>>, vector<1x8x128xbf16>,
    } else {
    }
    return
  }
  func.func @transform_0(%arg0: i32) -> (i32, i32) {
    %c0_i32 = arith.constant 0 : i32
    %c0_i32_0 = arith.constant 0 : i32
    %c0_i32_1 = arith.constant 0 : i32
    return %c0_i32, %c0_i32_0 : i32, i32
  }
  func.func @transform_1(%arg0: i32) -> (i32, i32, i32) {
    %c0_i32 = arith.constant 0 : i32
    %c0_i32_0 = arith.constant 0 : i32
    %c0_i32_1 = arith.constant 0 : i32
    return %arg0, %c0_i32, %c0_i32_0 : i32, i32, i32
  }
  func.func @transform_2(%arg0: i32) -> (i32, i32) {
    %c0_i32 = arith.constant 0 : i32
    %c0_i32_0 = arith.constant 0 : i32
    %c0_i32_1 = arith.constant 0 : i32
    return %c0_i32, %c0_i32_0 : i32, i32
  }
  func.func @transform_3(%arg0: i32) -> (i32, i32) {
    %c0_i32 = arith.constant 0 : i32
    %c0_i32_0 = arith.constant 0 : i32
    %c0_i32_1 = arith.constant 0 : i32
    return %c0_i32, %c0_i32_0 : i32, i32
  }
  func.func @transform_4(%arg0: i32) -> (i32, i32) {
    %c0_i32 = arith.constant 0 : i32
    %c0_i32_0 = arith.constant 0 : i32
    %c0_i32_1 = arith.constant 0 : i32
    return %c0_i32, %c0_i32_0 : i32, i32
  }
  func.func @transform_5(%arg0: i32) -> (i32, i32, i32) {
    %c0_i32 = arith.constant 0 : i32
    %c0_i32_0 = arith.constant 0 : i32
    %c0_i32_1 = arith.constant 0 : i32
    return %arg0, %c0_i32, %c0_i32_0 : i32, i32, i32
  }
  func.func @transform_6(%arg0: i32) -> (i32, i32, i32) {
    %c0_i32 = arith.constant 0 : i32
    %c0_i32_0 = arith.constant 0 : i32
    %c0_i32_1 = arith.constant 0 : i32
    %c0_i32_2 = arith.constant 0 : i32
    return %c0_i32, %c0_i32_0, %c0_i32_1 : i32, i32, i32
  }
}

module attributes {stable_mosaic.version = 11 : i64} {
  func.func @_lstm_block_kernel(%arg0: i32, %arg1: memref<8x1xi32, #tpu.memory_space<vmem>>, %arg2: memref<8x8x128xbf16, #tpu.memory_space<vmem>>, %arg3: memref<128x512xbf16, #tpu.memory_space<vmem>>, %arg4: memref<128x512xbf16, #tpu.memory_space<vmem>>, %arg5: memref<1x512xf32, #tpu.memory_space<vmem>>, %arg6: memref<8x8x128xbf16, #tpu.memory_space<vmem>>, %arg7: memref<1x8x128xbf16, #tpu.memory_space<vmem>>, %arg8: memref<8x128xf32, #tpu.memory_space<vmem>>, %arg9: memref<8x128xf32, #tpu.memory_space<vmem>>, %arg10: memref<8x8x512xf32, #tpu.memory_space<vmem>>) attributes {dimension_semantics = [#tpu.dimension_semantics<arbitrary>], iteration_bounds = array<i64: 1>, scalar_prefetch = 0 : i64, scratch_operands = 3 : i64, tpu.core_type = #tpu.core_type<tc>, window_params = [{pipeline_mode = #tpu.pipeline_mode<synchronous>, transform_indices = @transform_0, window_bounds = array<i64: 8, 1>}, {transform_indices = @transform_1, window_bounds = array<i64: 8, 8, 128>}, {pipeline_mode = #tpu.pipeline_mode<synchronous>, transform_indices = @transform_2, window_bounds = array<i64: 128, 512>}, {pipeline_mode = #tpu.pipeline_mode<synchronous>, transform_indices = @transform_3, window_bounds = array<i64: 128, 512>}, {pipeline_mode = #tpu.pipeline_mode<synchronous>, transform_indices = @transform_4, window_bounds = array<i64: 1, 512>}, {transform_indices = @transform_5, window_bounds = array<i64: 8, 8, 128>}, {pipeline_mode = #tpu.pipeline_mode<synchronous>, transform_indices = @transform_6, window_bounds = array<i64: 1, 8, 128>}]} {
    %c0_i32 = arith.constant 0 : i32
    %0 = arith.cmpi eq, %arg0, %c0_i32 : i32
    %1 = arith.extui %0 : i1 to i32
    %c0_i32_0 = arith.constant 0 : i32
    %2 = arith.cmpi ne, %1, %c0_i32_0 : i32
    scf.if %2 {
      %cst_98 = arith.constant 0.000000e+00 : f32
      %368 = vector.broadcast %cst_98 : f32 to vector<8x128xf32>
      %c0_99 = arith.constant 0 : index
      %c0_100 = arith.constant 0 : index
      %369 = vector.load %arg8[%c0_99, %c0_100] : memref<8x128xf32, #tpu.memory_space<vmem>>, vector<8x128xf32>
      tpu.vector_store %arg8[%c0_99, %c0_100], %368 {strides = array<i32>} : memref<8x128xf32, #tpu.memory_space<vmem>>, vector<8x128xf32>,
      %cst_101 = arith.constant 0.000000e+00 : f32
      %370 = vector.broadcast %cst_101 : f32 to vector<8x128xf32>
      %c0_102 = arith.constant 0 : index
      %c0_103 = arith.constant 0 : index
      %371 = vector.load %arg9[%c0_102, %c0_103] : memref<8x128xf32, #tpu.memory_space<vmem>>, vector<8x128xf32>
      tpu.vector_store %arg9[%c0_102, %c0_103], %370 {strides = array<i32>} : memref<8x128xf32, #tpu.memory_space<vmem>>, vector<8x128xf32>,
    } else {
    }
    %c0 = arith.constant 0 : index
    %c0_1 = arith.constant 0 : index
    %3 = vector.load %arg4[%c0, %c0_1] : memref<128x512xbf16, #tpu.memory_space<vmem>>, vector<128x512xbf16>
    %c0_2 = arith.constant 0 : index
    %c0_3 = arith.constant 0 : index
    %c0_4 = arith.constant 0 : index
    %4 = vector.load %arg2[%c0_2, %c0_3, %c0_4] : memref<8x8x128xbf16, #tpu.memory_space<vmem>>, vector<8x8x128xbf16>
    %5 = vector.shape_cast %4 : vector<8x8x128xbf16> to vector<64x128xbf16>
    %c0_5 = arith.constant 0 : index
    %c0_6 = arith.constant 0 : index
    %6 = vector.load %arg3[%c0_5, %c0_6] : memref<128x512xbf16, #tpu.memory_space<vmem>>, vector<128x512xbf16>
    %cst = arith.constant dense<0.000000e+00> : vector<64x512xf32>
    %7 = tpu.matmul %5, %6, %cst {dimension_numbers = #tpu.dot_dimension_numbers<[1], [0], [0], [1], [0, 0, 1, 1], [], []>} : vector<64x128xbf16>, vector<128x512xbf16>, vector<64x512xf32> -> vector<64x512xf32>
    %c0_7 = arith.constant 0 : index
    %c0_8 = arith.constant 0 : index
    %8 = vector.load %arg5[%c0_7, %c0_8] : memref<1x512xf32, #tpu.memory_space<vmem>>, vector<1x512xf32>
    %9 = vector.broadcast %8 : vector<1x512xf32> to vector<64x512xf32>
    %10 = arith.addf %7, %9 : vector<64x512xf32>
    %11 = vector.shape_cast %10 : vector<64x512xf32> to vector<8x8x512xf32>
    %c0_9 = arith.constant 0 : index
    %c0_10 = arith.constant 0 : index
    %c0_11 = arith.constant 0 : index
    %12 = vector.load %arg10[%c0_9, %c0_10, %c0_11] : memref<8x8x512xf32, #tpu.memory_space<vmem>>, vector<8x8x512xf32>
    tpu.vector_store %arg10[%c0_9, %c0_10, %c0_11], %11 {strides = array<i32>} : memref<8x8x512xf32, #tpu.memory_space<vmem>>, vector<8x8x512xf32>,
    %c0_12 = arith.constant 0 : index
    %c0_13 = arith.constant 0 : index
    %13 = vector.load %arg1[%c0_12, %c0_13] : memref<8x1xi32, #tpu.memory_space<vmem>>, vector<8x1xi32>
    %14 = vector.shape_cast %13 : vector<8x1xi32> to vector<8x1xi32>
    %15 = vector.broadcast %14 : vector<8x1xi32> to vector<8x128xi32>
    %c8_i32 = arith.constant 8 : i32
    %16 = arith.muli %arg0, %c8_i32 : i32
    %c0_14 = arith.constant 0 : index
    %c0_15 = arith.constant 0 : index
    %17 = vector.load %arg8[%c0_14, %c0_15] : memref<8x128xf32, #tpu.memory_space<vmem>>, vector<8x128xf32>
    %c0_16 = arith.constant 0 : index
    %c0_17 = arith.constant 0 : index
    %18 = vector.load %arg9[%c0_16, %c0_17] : memref<8x128xf32, #tpu.memory_space<vmem>>, vector<8x128xf32>
    %c0_i32_18 = arith.constant 0 : i32
    %19 = arith.index_cast %c0_i32_18 : i32 to index
    %c0_19 = arith.constant 0 : index
    %c0_20 = arith.constant 0 : index
    %20 = vector.load %arg10[%19, %c0_19, %c0_20] : memref<8x8x512xf32, #tpu.memory_space<vmem>>, vector<1x8x512xf32>
    %21 = vector.shape_cast %20 : vector<1x8x512xf32> to vector<8x512xf32>
    %22 = arith.truncf %17 : vector<8x128xf32> to vector<8x128xbf16>
    %cst_21 = arith.constant dense<0.000000e+00> : vector<8x512xf32>
    %23 = tpu.matmul %22, %3, %cst_21 {dimension_numbers = #tpu.dot_dimension_numbers<[1], [0], [0], [1], [0, 0, 1, 1], [], []>} : vector<8x128xbf16>, vector<128x512xbf16>, vector<8x512xf32> -> vector<8x512xf32>
    %24 = arith.addf %21, %23 : vector<8x512xf32>
    %25 = vector.extract_strided_slice %24 {offsets = [0, 0], sizes = [8, 128], strides = [1, 1]} : vector<8x512xf32> to vector<8x128xf32>
    %26 = arith.negf %25 : vector<8x128xf32>
    %27 = math.exp %26 : vector<8x128xf32>
    %cst_22 = arith.constant 1.000000e+00 : f32
    %28 = vector.broadcast %cst_22 : f32 to vector<8x128xf32>
    %29 = arith.addf %28, %27 : vector<8x128xf32>
    %30 = arith.divf %28, %29 : vector<8x128xf32>
    %31 = vector.extract_strided_slice %24 {offsets = [0, 128], sizes = [8, 128], strides = [1, 1]} : vector<8x512xf32> to vector<8x128xf32>
    %32 = arith.negf %31 : vector<8x128xf32>
    %33 = math.exp %32 : vector<8x128xf32>
    %cst_23 = arith.constant 1.000000e+00 : f32
    %34 = vector.broadcast %cst_23 : f32 to vector<8x128xf32>
    %35 = arith.addf %34, %33 : vector<8x128xf32>
    %36 = arith.divf %34, %35 : vector<8x128xf32>
    %37 = vector.extract_strided_slice %24 {offsets = [0, 256], sizes = [8, 128], strides = [1, 1]} : vector<8x512xf32> to vector<8x128xf32>
    %38 = math.tanh %37 : vector<8x128xf32>
    %39 = vector.extract_strided_slice %24 {offsets = [0, 384], sizes = [8, 128], strides = [1, 1]} : vector<8x512xf32> to vector<8x128xf32>
    %40 = arith.negf %39 : vector<8x128xf32>
    %41 = math.exp %40 : vector<8x128xf32>
    %cst_24 = arith.constant 1.000000e+00 : f32
    %42 = vector.broadcast %cst_24 : f32 to vector<8x128xf32>
    %43 = arith.addf %42, %41 : vector<8x128xf32>
    %44 = arith.divf %42, %43 : vector<8x128xf32>
    %45 = arith.mulf %36, %18 : vector<8x128xf32>
    %46 = arith.mulf %30, %38 : vector<8x128xf32>
    %47 = arith.addf %45, %46 : vector<8x128xf32>
    %48 = math.tanh %47 : vector<8x128xf32>
    %49 = arith.mulf %44, %48 : vector<8x128xf32>
    %50 = arith.addi %16, %c0_i32_18 : i32
    %51 = vector.broadcast %50 : i32 to vector<8x128xi32>
    %52 = arith.cmpi slt, %51, %15 : vector<8x128xi32>
    %53 = arith.select %52, %49, %17 : vector<8x128xi1>, vector<8x128xf32>
    %54 = arith.select %52, %47, %18 : vector<8x128xi1>, vector<8x128xf32>
    %cst_25 = arith.constant 0.000000e+00 : f32
    %55 = vector.broadcast %cst_25 : f32 to vector<8x128xf32>
    %56 = arith.select %52, %49, %55 : vector<8x128xi1>, vector<8x128xf32>
    %57 = arith.truncf %56 : vector<8x128xf32> to vector<8x128xbf16>
    %58 = arith.index_cast %c0_i32_18 : i32 to index
    %c0_26 = arith.constant 0 : index
    %c0_27 = arith.constant 0 : index
    %59 = vector.load %arg6[%58, %c0_26, %c0_27] : memref<8x8x128xbf16, #tpu.memory_space<vmem>>, vector<1x8x128xbf16>
    %60 = vector.shape_cast %59 : vector<1x8x128xbf16> to vector<8x128xbf16>
    %61 = vector.shape_cast %57 : vector<8x128xbf16> to vector<1x8x128xbf16>
    tpu.vector_store %arg6[%58, %c0_26, %c0_27], %61 {strides = array<i32>} : memref<8x8x128xbf16, #tpu.memory_space<vmem>>, vector<1x8x128xbf16>,
    %c1_i32 = arith.constant 1 : i32
    %62 = arith.index_cast %c1_i32 : i32 to index
    %c0_28 = arith.constant 0 : index
    %c0_29 = arith.constant 0 : index
    %63 = vector.load %arg10[%62, %c0_28, %c0_29] : memref<8x8x512xf32, #tpu.memory_space<vmem>>, vector<1x8x512xf32>
    %64 = vector.shape_cast %63 : vector<1x8x512xf32> to vector<8x512xf32>
    %65 = arith.truncf %53 : vector<8x128xf32> to vector<8x128xbf16>
    %cst_30 = arith.constant dense<0.000000e+00> : vector<8x512xf32>
    %66 = tpu.matmul %65, %3, %cst_30 {dimension_numbers = #tpu.dot_dimension_numbers<[1], [0], [0], [1], [0, 0, 1, 1], [], []>} : vector<8x128xbf16>, vector<128x512xbf16>, vector<8x512xf32> -> vector<8x512xf32>
    %67 = arith.addf %64, %66 : vector<8x512xf32>
    %68 = vector.extract_strided_slice %67 {offsets = [0, 0], sizes = [8, 128], strides = [1, 1]} : vector<8x512xf32> to vector<8x128xf32>
    %69 = arith.negf %68 : vector<8x128xf32>
    %70 = math.exp %69 : vector<8x128xf32>
    %cst_31 = arith.constant 1.000000e+00 : f32
    %71 = vector.broadcast %cst_31 : f32 to vector<8x128xf32>
    %72 = arith.addf %71, %70 : vector<8x128xf32>
    %73 = arith.divf %71, %72 : vector<8x128xf32>
    %74 = vector.extract_strided_slice %67 {offsets = [0, 128], sizes = [8, 128], strides = [1, 1]} : vector<8x512xf32> to vector<8x128xf32>
    %75 = arith.negf %74 : vector<8x128xf32>
    %76 = math.exp %75 : vector<8x128xf32>
    %cst_32 = arith.constant 1.000000e+00 : f32
    %77 = vector.broadcast %cst_32 : f32 to vector<8x128xf32>
    %78 = arith.addf %77, %76 : vector<8x128xf32>
    %79 = arith.divf %77, %78 : vector<8x128xf32>
    %80 = vector.extract_strided_slice %67 {offsets = [0, 256], sizes = [8, 128], strides = [1, 1]} : vector<8x512xf32> to vector<8x128xf32>
    %81 = math.tanh %80 : vector<8x128xf32>
    %82 = vector.extract_strided_slice %67 {offsets = [0, 384], sizes = [8, 128], strides = [1, 1]} : vector<8x512xf32> to vector<8x128xf32>
    %83 = arith.negf %82 : vector<8x128xf32>
    %84 = math.exp %83 : vector<8x128xf32>
    %cst_33 = arith.constant 1.000000e+00 : f32
    %85 = vector.broadcast %cst_33 : f32 to vector<8x128xf32>
    %86 = arith.addf %85, %84 : vector<8x128xf32>
    %87 = arith.divf %85, %86 : vector<8x128xf32>
    %88 = arith.mulf %79, %54 : vector<8x128xf32>
    %89 = arith.mulf %73, %81 : vector<8x128xf32>
    %90 = arith.addf %88, %89 : vector<8x128xf32>
    %91 = math.tanh %90 : vector<8x128xf32>
    %92 = arith.mulf %87, %91 : vector<8x128xf32>
    %93 = arith.addi %16, %c1_i32 : i32
    %94 = vector.broadcast %93 : i32 to vector<8x128xi32>
    %95 = arith.cmpi slt, %94, %15 : vector<8x128xi32>
    %96 = arith.select %95, %92, %53 : vector<8x128xi1>, vector<8x128xf32>
    %97 = arith.select %95, %90, %54 : vector<8x128xi1>, vector<8x128xf32>
    %cst_34 = arith.constant 0.000000e+00 : f32
    %98 = vector.broadcast %cst_34 : f32 to vector<8x128xf32>
    %99 = arith.select %95, %92, %98 : vector<8x128xi1>, vector<8x128xf32>
    %100 = arith.truncf %99 : vector<8x128xf32> to vector<8x128xbf16>
    %101 = arith.index_cast %c1_i32 : i32 to index
    %c0_35 = arith.constant 0 : index
    %c0_36 = arith.constant 0 : index
    %102 = vector.load %arg6[%101, %c0_35, %c0_36] : memref<8x8x128xbf16, #tpu.memory_space<vmem>>, vector<1x8x128xbf16>
    %103 = vector.shape_cast %102 : vector<1x8x128xbf16> to vector<8x128xbf16>
    %104 = vector.shape_cast %100 : vector<8x128xbf16> to vector<1x8x128xbf16>
    tpu.vector_store %arg6[%101, %c0_35, %c0_36], %104 {strides = array<i32>} : memref<8x8x128xbf16, #tpu.memory_space<vmem>>, vector<1x8x128xbf16>,
    %c2_i32 = arith.constant 2 : i32
    %105 = arith.index_cast %c2_i32 : i32 to index
    %c0_37 = arith.constant 0 : index
    %c0_38 = arith.constant 0 : index
    %106 = vector.load %arg10[%105, %c0_37, %c0_38] : memref<8x8x512xf32, #tpu.memory_space<vmem>>, vector<1x8x512xf32>
    %107 = vector.shape_cast %106 : vector<1x8x512xf32> to vector<8x512xf32>
    %108 = arith.truncf %96 : vector<8x128xf32> to vector<8x128xbf16>
    %cst_39 = arith.constant dense<0.000000e+00> : vector<8x512xf32>
    %109 = tpu.matmul %108, %3, %cst_39 {dimension_numbers = #tpu.dot_dimension_numbers<[1], [0], [0], [1], [0, 0, 1, 1], [], []>} : vector<8x128xbf16>, vector<128x512xbf16>, vector<8x512xf32> -> vector<8x512xf32>
    %110 = arith.addf %107, %109 : vector<8x512xf32>
    %111 = vector.extract_strided_slice %110 {offsets = [0, 0], sizes = [8, 128], strides = [1, 1]} : vector<8x512xf32> to vector<8x128xf32>
    %112 = arith.negf %111 : vector<8x128xf32>
    %113 = math.exp %112 : vector<8x128xf32>
    %cst_40 = arith.constant 1.000000e+00 : f32
    %114 = vector.broadcast %cst_40 : f32 to vector<8x128xf32>
    %115 = arith.addf %114, %113 : vector<8x128xf32>
    %116 = arith.divf %114, %115 : vector<8x128xf32>
    %117 = vector.extract_strided_slice %110 {offsets = [0, 128], sizes = [8, 128], strides = [1, 1]} : vector<8x512xf32> to vector<8x128xf32>
    %118 = arith.negf %117 : vector<8x128xf32>
    %119 = math.exp %118 : vector<8x128xf32>
    %cst_41 = arith.constant 1.000000e+00 : f32
    %120 = vector.broadcast %cst_41 : f32 to vector<8x128xf32>
    %121 = arith.addf %120, %119 : vector<8x128xf32>
    %122 = arith.divf %120, %121 : vector<8x128xf32>
    %123 = vector.extract_strided_slice %110 {offsets = [0, 256], sizes = [8, 128], strides = [1, 1]} : vector<8x512xf32> to vector<8x128xf32>
    %124 = math.tanh %123 : vector<8x128xf32>
    %125 = vector.extract_strided_slice %110 {offsets = [0, 384], sizes = [8, 128], strides = [1, 1]} : vector<8x512xf32> to vector<8x128xf32>
    %126 = arith.negf %125 : vector<8x128xf32>
    %127 = math.exp %126 : vector<8x128xf32>
    %cst_42 = arith.constant 1.000000e+00 : f32
    %128 = vector.broadcast %cst_42 : f32 to vector<8x128xf32>
    %129 = arith.addf %128, %127 : vector<8x128xf32>
    %130 = arith.divf %128, %129 : vector<8x128xf32>
    %131 = arith.mulf %122, %97 : vector<8x128xf32>
    %132 = arith.mulf %116, %124 : vector<8x128xf32>
    %133 = arith.addf %131, %132 : vector<8x128xf32>
    %134 = math.tanh %133 : vector<8x128xf32>
    %135 = arith.mulf %130, %134 : vector<8x128xf32>
    %136 = arith.addi %16, %c2_i32 : i32
    %137 = vector.broadcast %136 : i32 to vector<8x128xi32>
    %138 = arith.cmpi slt, %137, %15 : vector<8x128xi32>
    %139 = arith.select %138, %135, %96 : vector<8x128xi1>, vector<8x128xf32>
    %140 = arith.select %138, %133, %97 : vector<8x128xi1>, vector<8x128xf32>
    %cst_43 = arith.constant 0.000000e+00 : f32
    %141 = vector.broadcast %cst_43 : f32 to vector<8x128xf32>
    %142 = arith.select %138, %135, %141 : vector<8x128xi1>, vector<8x128xf32>
    %143 = arith.truncf %142 : vector<8x128xf32> to vector<8x128xbf16>
    %144 = arith.index_cast %c2_i32 : i32 to index
    %c0_44 = arith.constant 0 : index
    %c0_45 = arith.constant 0 : index
    %145 = vector.load %arg6[%144, %c0_44, %c0_45] : memref<8x8x128xbf16, #tpu.memory_space<vmem>>, vector<1x8x128xbf16>
    %146 = vector.shape_cast %145 : vector<1x8x128xbf16> to vector<8x128xbf16>
    %147 = vector.shape_cast %143 : vector<8x128xbf16> to vector<1x8x128xbf16>
    tpu.vector_store %arg6[%144, %c0_44, %c0_45], %147 {strides = array<i32>} : memref<8x8x128xbf16, #tpu.memory_space<vmem>>, vector<1x8x128xbf16>,
    %c3_i32 = arith.constant 3 : i32
    %148 = arith.index_cast %c3_i32 : i32 to index
    %c0_46 = arith.constant 0 : index
    %c0_47 = arith.constant 0 : index
    %149 = vector.load %arg10[%148, %c0_46, %c0_47] : memref<8x8x512xf32, #tpu.memory_space<vmem>>, vector<1x8x512xf32>
    %150 = vector.shape_cast %149 : vector<1x8x512xf32> to vector<8x512xf32>
    %151 = arith.truncf %139 : vector<8x128xf32> to vector<8x128xbf16>
    %cst_48 = arith.constant dense<0.000000e+00> : vector<8x512xf32>
    %152 = tpu.matmul %151, %3, %cst_48 {dimension_numbers = #tpu.dot_dimension_numbers<[1], [0], [0], [1], [0, 0, 1, 1], [], []>} : vector<8x128xbf16>, vector<128x512xbf16>, vector<8x512xf32> -> vector<8x512xf32>
    %153 = arith.addf %150, %152 : vector<8x512xf32>
    %154 = vector.extract_strided_slice %153 {offsets = [0, 0], sizes = [8, 128], strides = [1, 1]} : vector<8x512xf32> to vector<8x128xf32>
    %155 = arith.negf %154 : vector<8x128xf32>
    %156 = math.exp %155 : vector<8x128xf32>
    %cst_49 = arith.constant 1.000000e+00 : f32
    %157 = vector.broadcast %cst_49 : f32 to vector<8x128xf32>
    %158 = arith.addf %157, %156 : vector<8x128xf32>
    %159 = arith.divf %157, %158 : vector<8x128xf32>
    %160 = vector.extract_strided_slice %153 {offsets = [0, 128], sizes = [8, 128], strides = [1, 1]} : vector<8x512xf32> to vector<8x128xf32>
    %161 = arith.negf %160 : vector<8x128xf32>
    %162 = math.exp %161 : vector<8x128xf32>
    %cst_50 = arith.constant 1.000000e+00 : f32
    %163 = vector.broadcast %cst_50 : f32 to vector<8x128xf32>
    %164 = arith.addf %163, %162 : vector<8x128xf32>
    %165 = arith.divf %163, %164 : vector<8x128xf32>
    %166 = vector.extract_strided_slice %153 {offsets = [0, 256], sizes = [8, 128], strides = [1, 1]} : vector<8x512xf32> to vector<8x128xf32>
    %167 = math.tanh %166 : vector<8x128xf32>
    %168 = vector.extract_strided_slice %153 {offsets = [0, 384], sizes = [8, 128], strides = [1, 1]} : vector<8x512xf32> to vector<8x128xf32>
    %169 = arith.negf %168 : vector<8x128xf32>
    %170 = math.exp %169 : vector<8x128xf32>
    %cst_51 = arith.constant 1.000000e+00 : f32
    %171 = vector.broadcast %cst_51 : f32 to vector<8x128xf32>
    %172 = arith.addf %171, %170 : vector<8x128xf32>
    %173 = arith.divf %171, %172 : vector<8x128xf32>
    %174 = arith.mulf %165, %140 : vector<8x128xf32>
    %175 = arith.mulf %159, %167 : vector<8x128xf32>
    %176 = arith.addf %174, %175 : vector<8x128xf32>
    %177 = math.tanh %176 : vector<8x128xf32>
    %178 = arith.mulf %173, %177 : vector<8x128xf32>
    %179 = arith.addi %16, %c3_i32 : i32
    %180 = vector.broadcast %179 : i32 to vector<8x128xi32>
    %181 = arith.cmpi slt, %180, %15 : vector<8x128xi32>
    %182 = arith.select %181, %178, %139 : vector<8x128xi1>, vector<8x128xf32>
    %183 = arith.select %181, %176, %140 : vector<8x128xi1>, vector<8x128xf32>
    %cst_52 = arith.constant 0.000000e+00 : f32
    %184 = vector.broadcast %cst_52 : f32 to vector<8x128xf32>
    %185 = arith.select %181, %178, %184 : vector<8x128xi1>, vector<8x128xf32>
    %186 = arith.truncf %185 : vector<8x128xf32> to vector<8x128xbf16>
    %187 = arith.index_cast %c3_i32 : i32 to index
    %c0_53 = arith.constant 0 : index
    %c0_54 = arith.constant 0 : index
    %188 = vector.load %arg6[%187, %c0_53, %c0_54] : memref<8x8x128xbf16, #tpu.memory_space<vmem>>, vector<1x8x128xbf16>
    %189 = vector.shape_cast %188 : vector<1x8x128xbf16> to vector<8x128xbf16>
    %190 = vector.shape_cast %186 : vector<8x128xbf16> to vector<1x8x128xbf16>
    tpu.vector_store %arg6[%187, %c0_53, %c0_54], %190 {strides = array<i32>} : memref<8x8x128xbf16, #tpu.memory_space<vmem>>, vector<1x8x128xbf16>,
    %c4_i32 = arith.constant 4 : i32
    %191 = arith.index_cast %c4_i32 : i32 to index
    %c0_55 = arith.constant 0 : index
    %c0_56 = arith.constant 0 : index
    %192 = vector.load %arg10[%191, %c0_55, %c0_56] : memref<8x8x512xf32, #tpu.memory_space<vmem>>, vector<1x8x512xf32>
    %193 = vector.shape_cast %192 : vector<1x8x512xf32> to vector<8x512xf32>
    %194 = arith.truncf %182 : vector<8x128xf32> to vector<8x128xbf16>
    %cst_57 = arith.constant dense<0.000000e+00> : vector<8x512xf32>
    %195 = tpu.matmul %194, %3, %cst_57 {dimension_numbers = #tpu.dot_dimension_numbers<[1], [0], [0], [1], [0, 0, 1, 1], [], []>} : vector<8x128xbf16>, vector<128x512xbf16>, vector<8x512xf32> -> vector<8x512xf32>
    %196 = arith.addf %193, %195 : vector<8x512xf32>
    %197 = vector.extract_strided_slice %196 {offsets = [0, 0], sizes = [8, 128], strides = [1, 1]} : vector<8x512xf32> to vector<8x128xf32>
    %198 = arith.negf %197 : vector<8x128xf32>
    %199 = math.exp %198 : vector<8x128xf32>
    %cst_58 = arith.constant 1.000000e+00 : f32
    %200 = vector.broadcast %cst_58 : f32 to vector<8x128xf32>
    %201 = arith.addf %200, %199 : vector<8x128xf32>
    %202 = arith.divf %200, %201 : vector<8x128xf32>
    %203 = vector.extract_strided_slice %196 {offsets = [0, 128], sizes = [8, 128], strides = [1, 1]} : vector<8x512xf32> to vector<8x128xf32>
    %204 = arith.negf %203 : vector<8x128xf32>
    %205 = math.exp %204 : vector<8x128xf32>
    %cst_59 = arith.constant 1.000000e+00 : f32
    %206 = vector.broadcast %cst_59 : f32 to vector<8x128xf32>
    %207 = arith.addf %206, %205 : vector<8x128xf32>
    %208 = arith.divf %206, %207 : vector<8x128xf32>
    %209 = vector.extract_strided_slice %196 {offsets = [0, 256], sizes = [8, 128], strides = [1, 1]} : vector<8x512xf32> to vector<8x128xf32>
    %210 = math.tanh %209 : vector<8x128xf32>
    %211 = vector.extract_strided_slice %196 {offsets = [0, 384], sizes = [8, 128], strides = [1, 1]} : vector<8x512xf32> to vector<8x128xf32>
    %212 = arith.negf %211 : vector<8x128xf32>
    %213 = math.exp %212 : vector<8x128xf32>
    %cst_60 = arith.constant 1.000000e+00 : f32
    %214 = vector.broadcast %cst_60 : f32 to vector<8x128xf32>
    %215 = arith.addf %214, %213 : vector<8x128xf32>
    %216 = arith.divf %214, %215 : vector<8x128xf32>
    %217 = arith.mulf %208, %183 : vector<8x128xf32>
    %218 = arith.mulf %202, %210 : vector<8x128xf32>
    %219 = arith.addf %217, %218 : vector<8x128xf32>
    %220 = math.tanh %219 : vector<8x128xf32>
    %221 = arith.mulf %216, %220 : vector<8x128xf32>
    %222 = arith.addi %16, %c4_i32 : i32
    %223 = vector.broadcast %222 : i32 to vector<8x128xi32>
    %224 = arith.cmpi slt, %223, %15 : vector<8x128xi32>
    %225 = arith.select %224, %221, %182 : vector<8x128xi1>, vector<8x128xf32>
    %226 = arith.select %224, %219, %183 : vector<8x128xi1>, vector<8x128xf32>
    %cst_61 = arith.constant 0.000000e+00 : f32
    %227 = vector.broadcast %cst_61 : f32 to vector<8x128xf32>
    %228 = arith.select %224, %221, %227 : vector<8x128xi1>, vector<8x128xf32>
    %229 = arith.truncf %228 : vector<8x128xf32> to vector<8x128xbf16>
    %230 = arith.index_cast %c4_i32 : i32 to index
    %c0_62 = arith.constant 0 : index
    %c0_63 = arith.constant 0 : index
    %231 = vector.load %arg6[%230, %c0_62, %c0_63] : memref<8x8x128xbf16, #tpu.memory_space<vmem>>, vector<1x8x128xbf16>
    %232 = vector.shape_cast %231 : vector<1x8x128xbf16> to vector<8x128xbf16>
    %233 = vector.shape_cast %229 : vector<8x128xbf16> to vector<1x8x128xbf16>
    tpu.vector_store %arg6[%230, %c0_62, %c0_63], %233 {strides = array<i32>} : memref<8x8x128xbf16, #tpu.memory_space<vmem>>, vector<1x8x128xbf16>,
    %c5_i32 = arith.constant 5 : i32
    %234 = arith.index_cast %c5_i32 : i32 to index
    %c0_64 = arith.constant 0 : index
    %c0_65 = arith.constant 0 : index
    %235 = vector.load %arg10[%234, %c0_64, %c0_65] : memref<8x8x512xf32, #tpu.memory_space<vmem>>, vector<1x8x512xf32>
    %236 = vector.shape_cast %235 : vector<1x8x512xf32> to vector<8x512xf32>
    %237 = arith.truncf %225 : vector<8x128xf32> to vector<8x128xbf16>
    %cst_66 = arith.constant dense<0.000000e+00> : vector<8x512xf32>
    %238 = tpu.matmul %237, %3, %cst_66 {dimension_numbers = #tpu.dot_dimension_numbers<[1], [0], [0], [1], [0, 0, 1, 1], [], []>} : vector<8x128xbf16>, vector<128x512xbf16>, vector<8x512xf32> -> vector<8x512xf32>
    %239 = arith.addf %236, %238 : vector<8x512xf32>
    %240 = vector.extract_strided_slice %239 {offsets = [0, 0], sizes = [8, 128], strides = [1, 1]} : vector<8x512xf32> to vector<8x128xf32>
    %241 = arith.negf %240 : vector<8x128xf32>
    %242 = math.exp %241 : vector<8x128xf32>
    %cst_67 = arith.constant 1.000000e+00 : f32
    %243 = vector.broadcast %cst_67 : f32 to vector<8x128xf32>
    %244 = arith.addf %243, %242 : vector<8x128xf32>
    %245 = arith.divf %243, %244 : vector<8x128xf32>
    %246 = vector.extract_strided_slice %239 {offsets = [0, 128], sizes = [8, 128], strides = [1, 1]} : vector<8x512xf32> to vector<8x128xf32>
    %247 = arith.negf %246 : vector<8x128xf32>
    %248 = math.exp %247 : vector<8x128xf32>
    %cst_68 = arith.constant 1.000000e+00 : f32
    %249 = vector.broadcast %cst_68 : f32 to vector<8x128xf32>
    %250 = arith.addf %249, %248 : vector<8x128xf32>
    %251 = arith.divf %249, %250 : vector<8x128xf32>
    %252 = vector.extract_strided_slice %239 {offsets = [0, 256], sizes = [8, 128], strides = [1, 1]} : vector<8x512xf32> to vector<8x128xf32>
    %253 = math.tanh %252 : vector<8x128xf32>
    %254 = vector.extract_strided_slice %239 {offsets = [0, 384], sizes = [8, 128], strides = [1, 1]} : vector<8x512xf32> to vector<8x128xf32>
    %255 = arith.negf %254 : vector<8x128xf32>
    %256 = math.exp %255 : vector<8x128xf32>
    %cst_69 = arith.constant 1.000000e+00 : f32
    %257 = vector.broadcast %cst_69 : f32 to vector<8x128xf32>
    %258 = arith.addf %257, %256 : vector<8x128xf32>
    %259 = arith.divf %257, %258 : vector<8x128xf32>
    %260 = arith.mulf %251, %226 : vector<8x128xf32>
    %261 = arith.mulf %245, %253 : vector<8x128xf32>
    %262 = arith.addf %260, %261 : vector<8x128xf32>
    %263 = math.tanh %262 : vector<8x128xf32>
    %264 = arith.mulf %259, %263 : vector<8x128xf32>
    %265 = arith.addi %16, %c5_i32 : i32
    %266 = vector.broadcast %265 : i32 to vector<8x128xi32>
    %267 = arith.cmpi slt, %266, %15 : vector<8x128xi32>
    %268 = arith.select %267, %264, %225 : vector<8x128xi1>, vector<8x128xf32>
    %269 = arith.select %267, %262, %226 : vector<8x128xi1>, vector<8x128xf32>
    %cst_70 = arith.constant 0.000000e+00 : f32
    %270 = vector.broadcast %cst_70 : f32 to vector<8x128xf32>
    %271 = arith.select %267, %264, %270 : vector<8x128xi1>, vector<8x128xf32>
    %272 = arith.truncf %271 : vector<8x128xf32> to vector<8x128xbf16>
    %273 = arith.index_cast %c5_i32 : i32 to index
    %c0_71 = arith.constant 0 : index
    %c0_72 = arith.constant 0 : index
    %274 = vector.load %arg6[%273, %c0_71, %c0_72] : memref<8x8x128xbf16, #tpu.memory_space<vmem>>, vector<1x8x128xbf16>
    %275 = vector.shape_cast %274 : vector<1x8x128xbf16> to vector<8x128xbf16>
    %276 = vector.shape_cast %272 : vector<8x128xbf16> to vector<1x8x128xbf16>
    tpu.vector_store %arg6[%273, %c0_71, %c0_72], %276 {strides = array<i32>} : memref<8x8x128xbf16, #tpu.memory_space<vmem>>, vector<1x8x128xbf16>,
    %c6_i32 = arith.constant 6 : i32
    %277 = arith.index_cast %c6_i32 : i32 to index
    %c0_73 = arith.constant 0 : index
    %c0_74 = arith.constant 0 : index
    %278 = vector.load %arg10[%277, %c0_73, %c0_74] : memref<8x8x512xf32, #tpu.memory_space<vmem>>, vector<1x8x512xf32>
    %279 = vector.shape_cast %278 : vector<1x8x512xf32> to vector<8x512xf32>
    %280 = arith.truncf %268 : vector<8x128xf32> to vector<8x128xbf16>
    %cst_75 = arith.constant dense<0.000000e+00> : vector<8x512xf32>
    %281 = tpu.matmul %280, %3, %cst_75 {dimension_numbers = #tpu.dot_dimension_numbers<[1], [0], [0], [1], [0, 0, 1, 1], [], []>} : vector<8x128xbf16>, vector<128x512xbf16>, vector<8x512xf32> -> vector<8x512xf32>
    %282 = arith.addf %279, %281 : vector<8x512xf32>
    %283 = vector.extract_strided_slice %282 {offsets = [0, 0], sizes = [8, 128], strides = [1, 1]} : vector<8x512xf32> to vector<8x128xf32>
    %284 = arith.negf %283 : vector<8x128xf32>
    %285 = math.exp %284 : vector<8x128xf32>
    %cst_76 = arith.constant 1.000000e+00 : f32
    %286 = vector.broadcast %cst_76 : f32 to vector<8x128xf32>
    %287 = arith.addf %286, %285 : vector<8x128xf32>
    %288 = arith.divf %286, %287 : vector<8x128xf32>
    %289 = vector.extract_strided_slice %282 {offsets = [0, 128], sizes = [8, 128], strides = [1, 1]} : vector<8x512xf32> to vector<8x128xf32>
    %290 = arith.negf %289 : vector<8x128xf32>
    %291 = math.exp %290 : vector<8x128xf32>
    %cst_77 = arith.constant 1.000000e+00 : f32
    %292 = vector.broadcast %cst_77 : f32 to vector<8x128xf32>
    %293 = arith.addf %292, %291 : vector<8x128xf32>
    %294 = arith.divf %292, %293 : vector<8x128xf32>
    %295 = vector.extract_strided_slice %282 {offsets = [0, 256], sizes = [8, 128], strides = [1, 1]} : vector<8x512xf32> to vector<8x128xf32>
    %296 = math.tanh %295 : vector<8x128xf32>
    %297 = vector.extract_strided_slice %282 {offsets = [0, 384], sizes = [8, 128], strides = [1, 1]} : vector<8x512xf32> to vector<8x128xf32>
    %298 = arith.negf %297 : vector<8x128xf32>
    %299 = math.exp %298 : vector<8x128xf32>
    %cst_78 = arith.constant 1.000000e+00 : f32
    %300 = vector.broadcast %cst_78 : f32 to vector<8x128xf32>
    %301 = arith.addf %300, %299 : vector<8x128xf32>
    %302 = arith.divf %300, %301 : vector<8x128xf32>
    %303 = arith.mulf %294, %269 : vector<8x128xf32>
    %304 = arith.mulf %288, %296 : vector<8x128xf32>
    %305 = arith.addf %303, %304 : vector<8x128xf32>
    %306 = math.tanh %305 : vector<8x128xf32>
    %307 = arith.mulf %302, %306 : vector<8x128xf32>
    %308 = arith.addi %16, %c6_i32 : i32
    %309 = vector.broadcast %308 : i32 to vector<8x128xi32>
    %310 = arith.cmpi slt, %309, %15 : vector<8x128xi32>
    %311 = arith.select %310, %307, %268 : vector<8x128xi1>, vector<8x128xf32>
    %312 = arith.select %310, %305, %269 : vector<8x128xi1>, vector<8x128xf32>
    %cst_79 = arith.constant 0.000000e+00 : f32
    %313 = vector.broadcast %cst_79 : f32 to vector<8x128xf32>
    %314 = arith.select %310, %307, %313 : vector<8x128xi1>, vector<8x128xf32>
    %315 = arith.truncf %314 : vector<8x128xf32> to vector<8x128xbf16>
    %316 = arith.index_cast %c6_i32 : i32 to index
    %c0_80 = arith.constant 0 : index
    %c0_81 = arith.constant 0 : index
    %317 = vector.load %arg6[%316, %c0_80, %c0_81] : memref<8x8x128xbf16, #tpu.memory_space<vmem>>, vector<1x8x128xbf16>
    %318 = vector.shape_cast %317 : vector<1x8x128xbf16> to vector<8x128xbf16>
    %319 = vector.shape_cast %315 : vector<8x128xbf16> to vector<1x8x128xbf16>
    tpu.vector_store %arg6[%316, %c0_80, %c0_81], %319 {strides = array<i32>} : memref<8x8x128xbf16, #tpu.memory_space<vmem>>, vector<1x8x128xbf16>,
    %c7_i32 = arith.constant 7 : i32
    %320 = arith.index_cast %c7_i32 : i32 to index
    %c0_82 = arith.constant 0 : index
    %c0_83 = arith.constant 0 : index
    %321 = vector.load %arg10[%320, %c0_82, %c0_83] : memref<8x8x512xf32, #tpu.memory_space<vmem>>, vector<1x8x512xf32>
    %322 = vector.shape_cast %321 : vector<1x8x512xf32> to vector<8x512xf32>
    %323 = arith.truncf %311 : vector<8x128xf32> to vector<8x128xbf16>
    %cst_84 = arith.constant dense<0.000000e+00> : vector<8x512xf32>
    %324 = tpu.matmul %323, %3, %cst_84 {dimension_numbers = #tpu.dot_dimension_numbers<[1], [0], [0], [1], [0, 0, 1, 1], [], []>} : vector<8x128xbf16>, vector<128x512xbf16>, vector<8x512xf32> -> vector<8x512xf32>
    %325 = arith.addf %322, %324 : vector<8x512xf32>
    %326 = vector.extract_strided_slice %325 {offsets = [0, 0], sizes = [8, 128], strides = [1, 1]} : vector<8x512xf32> to vector<8x128xf32>
    %327 = arith.negf %326 : vector<8x128xf32>
    %328 = math.exp %327 : vector<8x128xf32>
    %cst_85 = arith.constant 1.000000e+00 : f32
    %329 = vector.broadcast %cst_85 : f32 to vector<8x128xf32>
    %330 = arith.addf %329, %328 : vector<8x128xf32>
    %331 = arith.divf %329, %330 : vector<8x128xf32>
    %332 = vector.extract_strided_slice %325 {offsets = [0, 128], sizes = [8, 128], strides = [1, 1]} : vector<8x512xf32> to vector<8x128xf32>
    %333 = arith.negf %332 : vector<8x128xf32>
    %334 = math.exp %333 : vector<8x128xf32>
    %cst_86 = arith.constant 1.000000e+00 : f32
    %335 = vector.broadcast %cst_86 : f32 to vector<8x128xf32>
    %336 = arith.addf %335, %334 : vector<8x128xf32>
    %337 = arith.divf %335, %336 : vector<8x128xf32>
    %338 = vector.extract_strided_slice %325 {offsets = [0, 256], sizes = [8, 128], strides = [1, 1]} : vector<8x512xf32> to vector<8x128xf32>
    %339 = math.tanh %338 : vector<8x128xf32>
    %340 = vector.extract_strided_slice %325 {offsets = [0, 384], sizes = [8, 128], strides = [1, 1]} : vector<8x512xf32> to vector<8x128xf32>
    %341 = arith.negf %340 : vector<8x128xf32>
    %342 = math.exp %341 : vector<8x128xf32>
    %cst_87 = arith.constant 1.000000e+00 : f32
    %343 = vector.broadcast %cst_87 : f32 to vector<8x128xf32>
    %344 = arith.addf %343, %342 : vector<8x128xf32>
    %345 = arith.divf %343, %344 : vector<8x128xf32>
    %346 = arith.mulf %337, %312 : vector<8x128xf32>
    %347 = arith.mulf %331, %339 : vector<8x128xf32>
    %348 = arith.addf %346, %347 : vector<8x128xf32>
    %349 = math.tanh %348 : vector<8x128xf32>
    %350 = arith.mulf %345, %349 : vector<8x128xf32>
    %351 = arith.addi %16, %c7_i32 : i32
    %352 = vector.broadcast %351 : i32 to vector<8x128xi32>
    %353 = arith.cmpi slt, %352, %15 : vector<8x128xi32>
    %354 = arith.select %353, %350, %311 : vector<8x128xi1>, vector<8x128xf32>
    %355 = arith.select %353, %348, %312 : vector<8x128xi1>, vector<8x128xf32>
    %cst_88 = arith.constant 0.000000e+00 : f32
    %356 = vector.broadcast %cst_88 : f32 to vector<8x128xf32>
    %357 = arith.select %353, %350, %356 : vector<8x128xi1>, vector<8x128xf32>
    %358 = arith.truncf %357 : vector<8x128xf32> to vector<8x128xbf16>
    %359 = arith.index_cast %c7_i32 : i32 to index
    %c0_89 = arith.constant 0 : index
    %c0_90 = arith.constant 0 : index
    %360 = vector.load %arg6[%359, %c0_89, %c0_90] : memref<8x8x128xbf16, #tpu.memory_space<vmem>>, vector<1x8x128xbf16>
    %361 = vector.shape_cast %360 : vector<1x8x128xbf16> to vector<8x128xbf16>
    %362 = vector.shape_cast %358 : vector<8x128xbf16> to vector<1x8x128xbf16>
    tpu.vector_store %arg6[%359, %c0_89, %c0_90], %362 {strides = array<i32>} : memref<8x8x128xbf16, #tpu.memory_space<vmem>>, vector<1x8x128xbf16>,
    %c8_i32_91 = arith.constant 8 : i32
    %c0_92 = arith.constant 0 : index
    %c0_93 = arith.constant 0 : index
    %363 = vector.load %arg8[%c0_92, %c0_93] : memref<8x128xf32, #tpu.memory_space<vmem>>, vector<8x128xf32>
    tpu.vector_store %arg8[%c0_92, %c0_93], %354 {strides = array<i32>} : memref<8x128xf32, #tpu.memory_space<vmem>>, vector<8x128xf32>,
    %c0_94 = arith.constant 0 : index
    %c0_95 = arith.constant 0 : index
    %364 = vector.load %arg9[%c0_94, %c0_95] : memref<8x128xf32, #tpu.memory_space<vmem>>, vector<8x128xf32>
    tpu.vector_store %arg9[%c0_94, %c0_95], %355 {strides = array<i32>} : memref<8x128xf32, #tpu.memory_space<vmem>>, vector<8x128xf32>,
    %c0_i32_96 = arith.constant 0 : i32
    %365 = arith.cmpi eq, %arg0, %c0_i32_96 : i32
    %366 = arith.extui %365 : i1 to i32
    %c0_i32_97 = arith.constant 0 : i32
    %367 = arith.cmpi ne, %366, %c0_i32_97 : i32
    scf.if %367 {
      %368 = arith.truncf %354 : vector<8x128xf32> to vector<8x128xbf16>
      %c0_98 = arith.constant 0 : index
      %c0_99 = arith.constant 0 : index
      %c0_100 = arith.constant 0 : index
      %369 = vector.load %arg7[%c0_98, %c0_99, %c0_100] : memref<1x8x128xbf16, #tpu.memory_space<vmem>>, vector<1x8x128xbf16>
      %370 = vector.shape_cast %369 : vector<1x8x128xbf16> to vector<8x128xbf16>
      %371 = vector.shape_cast %368 : vector<8x128xbf16> to vector<1x8x128xbf16>
      tpu.vector_store %arg7[%c0_98, %c0_99, %c0_100], %371 {strides = array<i32>} : memref<1x8x128xbf16, #tpu.memory_space<vmem>>, vector<1x8x128xbf16>,
    } else {
    }
    return
  }
  func.func @transform_0(%arg0: i32) -> (i32, i32) {
    %c0_i32 = arith.constant 0 : i32
    %c0_i32_0 = arith.constant 0 : i32
    %c0_i32_1 = arith.constant 0 : i32
    return %c0_i32, %c0_i32_0 : i32, i32
  }
  func.func @transform_1(%arg0: i32) -> (i32, i32, i32) {
    %c0_i32 = arith.constant 0 : i32
    %c0_i32_0 = arith.constant 0 : i32
    %c0_i32_1 = arith.constant 0 : i32
    return %arg0, %c0_i32, %c0_i32_0 : i32, i32, i32
  }
  func.func @transform_2(%arg0: i32) -> (i32, i32) {
    %c0_i32 = arith.constant 0 : i32
    %c0_i32_0 = arith.constant 0 : i32
    %c0_i32_1 = arith.constant 0 : i32
    return %c0_i32, %c0_i32_0 : i32, i32
  }
  func.func @transform_3(%arg0: i32) -> (i32, i32) {
    %c0_i32 = arith.constant 0 : i32
    %c0_i32_0 = arith.constant 0 : i32
    %c0_i32_1 = arith.constant 0 : i32
    return %c0_i32, %c0_i32_0 : i32, i32
  }
  func.func @transform_4(%arg0: i32) -> (i32, i32) {
    %c0_i32 = arith.constant 0 : i32
    %c0_i32_0 = arith.constant 0 : i32
    %c0_i32_1 = arith.constant 0 : i32
    return %c0_i32, %c0_i32_0 : i32, i32
  }
  func.func @transform_5(%arg0: i32) -> (i32, i32, i32) {
    %c0_i32 = arith.constant 0 : i32
    %c0_i32_0 = arith.constant 0 : i32
    %c0_i32_1 = arith.constant 0 : i32
    return %arg0, %c0_i32, %c0_i32_0 : i32, i32, i32
  }
  func.func @transform_6(%arg0: i32) -> (i32, i32, i32) {
    %c0_i32 = arith.constant 0 : i32
    %c0_i32_0 = arith.constant 0 : i32
    %c0_i32_1 = arith.constant 0 : i32
    %c0_i32_2 = arith.constant 0 : i32
    return %c0_i32, %c0_i32_0, %c0_i32_1 : i32, i32, i32
  }
}

</mosaic_0001>

<bundles_post_ra>
// kernel: neg.2
= control target key start
LH: loop header
LB: loop body
LE: loop exit
PB: predicated region body
PF: predicated region fallthrough
CT: control target
= control target key end

     0   :  { %s24_s0 = inlined_call_operand.vmem [shape: s32[4], index: 0, kind: input, shape index: {}]   ;;  %s25_s1 = inlined_call_operand.vmem [shape: s32[4], index: 1, kind: output, shape index: {}]  }
   0x1   :  { %v2_v0 = vld [vmem:[%s24_s0] sm:$0x1] }
   0x2   :  { %v5_v1 = vsub.s32 0, %v2_v0 }
   0x4   :  { %7 = vst [vmem:[%s25_s1] sm:$0x1] %v5_v1 }

// kernel: _rnn_encoder_forward_impl.1
= control target key start
LH: loop header
LB: loop body
LE: loop exit
PB: predicated region body
PF: predicated region fallthrough
CT: control target
= control target key end

     0   :  { %s3190_s2 = inlined_call_operand.vmem [shape: bf16[128,512], index: 2, kind: input, shape index: {}]   ;;  %s3191_s3 = inlined_call_operand.vmem [shape: bf16[128,512], index: 3, kind: input, shape index: {}]   ;;  %s3192_s1 = inlined_call_operand.vmem [shape: bf16[8,8,128], index: 1, kind: input, shape index: {}]   ;;  %s3193_s0 = inlined_call_operand.vmem [shape: s32[8,1], index: 0, kind: input, shape index: {}]   ;;  %s3194_s4 = inlined_call_operand.vmem [shape: f32[1,512], index: 4, kind: input, shape index: {}]   ;;  %s3195_s5 = inlined_call_operand.vmem [shape: bf16[8,8,128], index: 5, kind: output, shape index: {0}]   ;;  %s3196_s6 = inlined_call_operand.vmem [shape: bf16[1,8,128], index: 6, kind: output, shape index: {1}]  }
   0x1   :  { %v1823_v0 = vld [vmem:[%s3190_s2 + $0xe0] sm:$0xf]  ;;  %v2070_v1 = vld [vmem:[%s3190_s2 + $0xec] sm:$0xf0]  ;;  %v2068_v2 = vld [vmem:[%s3190_s2 + $0xe4] sm:$0xf] }
   0x2   :  { %v1824_v3 = vor.u32 %v2070_v1, %v1823_v0  ;;  %v1825_v4 = vld [vmem:[%s3190_s2 + $0xf0] sm:$0xf0]  ;;  %v1831_v5 = vld [vmem:[%s3190_s2 + $0xe8] sm:$0xf]  ;;  %v2071_v6 = vld [vmem:[%s3190_s2 + $0xf4] sm:$0xf0] }
   0x3   :  { %v1828_v7 = vor.u32 %v2068_v2, %v1825_v4  ;;  %v1832_v8 = vor.u32 %v2071_v6, %v1831_v5  ;;  %v2069_v9 = vld [vmem:[%s3190_s2 + $0xec] sm:$0xf]  ;;  %v1833_v10 = vld [vmem:[%s3190_s2 + $0xf8] sm:$0xf0]  ;;  %v1807_v11 = vld [vmem:[%s3190_s2 + $0xc0] sm:$0xf] }
   0x4   :  { %294 = vmatpush.bf16.msra.mxu0 %v1824_v3  ;;  %v1836_v12 = vor.u32 %v2069_v9, %v1833_v10  ;;  %v2066_v13 = vld [vmem:[%s3190_s2 + $0xcc] sm:$0xf0]  ;;  %v2064_v14 = vld [vmem:[%s3190_s2 + $0xc4] sm:$0xf]  ;;  %v1809_v15 = vld [vmem:[%s3190_s2 + $0xd0] sm:$0xf0] }
   0x5   :  { %323 = vmatpush.bf16.msra.mxu1 %v1828_v7  ;;  %352 = vmatpush.bf16.msra.mxu2 %v1832_v8  ;;  %v1808_v16 = vor.u32 %v2066_v13, %v1807_v11  ;;  %v1812_v17 = vor.u32 %v2064_v14, %v1809_v15  ;;  %v1815_v18 = vld [vmem:[%s3190_s2 + $0xc8] sm:$0xf]  ;;  %v2067_v19 = vld [vmem:[%s3190_s2 + $0xd4] sm:$0xf0]  ;;  %v2065_v20 = vld [vmem:[%s3190_s2 + $0xcc] sm:$0xf] }
   0x6   :  { %381 = vmatpush.bf16.msra.mxu3 %v1836_v12  ;;  %v1816_v21 = vor.u32 %v2067_v19, %v1815_v18  ;;  %v1817_v22 = vld [vmem:[%s3190_s2 + $0xd8] sm:$0xf0]  ;;  %v1791_v23 = vld [vmem:[%s3190_s2 + $0xa0] sm:$0xf]  ;;  %v2062_v24 = vld [vmem:[%s3190_s2 + $0xac] sm:$0xf0] }
   0x7   :  { %v1820_v25 = vor.u32 %v2065_v20, %v1817_v22  ;;  %v2060_v26 = vld [vmem:[%s3190_s2 + $0xa4] sm:$0xf]  ;;  %v1793_v27 = vld [vmem:[%s3190_s2 + $0xb0] sm:$0xf0]  ;;  %v1799_v28 = vld [vmem:[%s3190_s2 + $0xa8] sm:$0xf]  ;;  %v1792_v29 = vor.u32 %v2062_v24, %v1791_v23 }
   0x8   :  { %295 = vmatpush.bf16.msra.mxu0 %v1808_v16  ;;  %v2063_v30 = vld [vmem:[%s3190_s2 + $0xb4] sm:$0xf0]  ;;  %v2061_v31 = vld [vmem:[%s3190_s2 + $0xac] sm:$0xf]  ;;  %v1801_v32 = vld [vmem:[%s3190_s2 + $0xb8] sm:$0xf0]  ;;  %v1796_v33 = vor.u32 %v2060_v26, %v1793_v27 }
   0x9   :  { %324 = vmatpush.bf16.msra.mxu1 %v1812_v17  ;;  %353 = vmatpush.bf16.msra.mxu2 %v1816_v21  ;;  %v1800_v34 = vor.u32 %v2063_v30, %v1799_v28  ;;  %v1775_v35 = vld [vmem:[%s3190_s2 + $0x80] sm:$0xf]  ;;  %v2058_v36 = vld [vmem:[%s3190_s2 + $0x8c] sm:$0xf0]  ;;  %v2056_v37 = vld [vmem:[%s3190_s2 + $0x84] sm:$0xf]  ;;  %v1804_v38 = vor.u32 %v2061_v31, %v1801_v32 }
   0xa   :  { %382 = vmatpush.bf16.msra.mxu3 %v1820_v25  ;;  %v1777_v39 = vld [vmem:[%s3190_s2 + $0x90] sm:$0xf0]  ;;  %v1783_v40 = vld [vmem:[%s3190_s2 + $0x88] sm:$0xf]  ;;  %v2059_v41 = vld [vmem:[%s3190_s2 + $0x94] sm:$0xf0]  ;;  %v1776_v44 = vor.u32 %v2058_v36, %v1775_v35 }
   0xb   :  { %v2057_v42 = vld [vmem:[%s3190_s2 + $0x8c] sm:$0xf]  ;;  %v1785_v43 = vld [vmem:[%s3190_s2 + $0x98] sm:$0xf0]  ;;  %v1780_v45 = vor.u32 %v2056_v37, %v1777_v39  ;;  %v1784_v46 = vor.u32 %v2059_v41, %v1783_v40  ;;  %v1759_v47 = vld [vmem:[%s3190_s2 + $0x60] sm:$0xf] }
   0xc   :  { %296 = vmatpush.bf16.msra.mxu0 %v1792_v29  ;;  %v2054_v48 = vld [vmem:[%s3190_s2 + $0x6c] sm:$0xf0]  ;;  %v2052_v49 = vld [vmem:[%s3190_s2 + $0x64] sm:$0xf]  ;;  %v1788_v50 = vor.u32 %v2057_v42, %v1785_v43  ;;  %v1761_v51 = vld [vmem:[%s3190_s2 + $0x70] sm:$0xf0] }
   0xd   :  { %325 = vmatpush.bf16.msra.mxu1 %v1796_v33  ;;  %354 = vmatpush.bf16.msra.mxu2 %v1800_v34  ;;  %v1767_v52 = vld [vmem:[%s3190_s2 + $0x68] sm:$0xf]  ;;  %v2055_v53 = vld [vmem:[%s3190_s2 + $0x74] sm:$0xf0]  ;;  %v2053_v54 = vld [vmem:[%s3190_s2 + $0x6c] sm:$0xf]  ;;  %v1760_v56 = vor.u32 %v2054_v48, %v1759_v47  ;;  %v1764_v57 = vor.u32 %v2052_v49, %v1761_v51 }
   0xe   :  { %383 = vmatpush.bf16.msra.mxu3 %v1804_v38  ;;  %v1769_v55 = vld [vmem:[%s3190_s2 + $0x78] sm:$0xf0]  ;;  %v1768_v58 = vor.u32 %v2055_v53, %v1767_v52  ;;  %v1743_v59 = vld [vmem:[%s3190_s2 + $0x40] sm:$0xf]  ;;  %v2050_v60 = vld [vmem:[%s3190_s2 + $0x4c] sm:$0xf0] }
   0xf   :  { %v2048_v61 = vld [vmem:[%s3190_s2 + $0x44] sm:$0xf]  ;;  %v1772_v62 = vor.u32 %v2053_v54, %v1769_v55  ;;  %v1745_v63 = vld [vmem:[%s3190_s2 + $0x50] sm:$0xf0]  ;;  %v1751_v0 = vld [vmem:[%s3190_s2 + $0x48] sm:$0xf]  ;;  %v1744_v4 = vor.u32 %v2050_v60, %v1743_v59 }
  0x10   :  { %297 = vmatpush.bf16.msra.mxu0 %v1776_v44  ;;  %v2051_v1 = vld [vmem:[%s3190_s2 + $0x54] sm:$0xf0]  ;;  %v2049_v2 = vld [vmem:[%s3190_s2 + $0x4c] sm:$0xf]  ;;  %v1753_v3 = vld [vmem:[%s3190_s2 + $0x58] sm:$0xf0]  ;;  %v1748_v5 = vor.u32 %v2048_v61, %v1745_v63 }
  0x11   :  { %326 = vmatpush.bf16.msra.mxu1 %v1780_v45  ;;  %355 = vmatpush.bf16.msra.mxu2 %v1784_v46  ;;  %v1752_v6 = vor.u32 %v2051_v1, %v1751_v0  ;;  %v1727_v7 = vld [vmem:[%s3190_s2 + $0x20] sm:$0xf]  ;;  %v2046_v8 = vld [vmem:[%s3190_s2 + $0x2c] sm:$0xf0]  ;;  %v2044_v9 = vld [vmem:[%s3190_s2 + $0x24] sm:$0xf]  ;;  %v1756_v10 = vor.u32 %v2049_v2, %v1753_v3 }
  0x12   :  { %384 = vmatpush.bf16.msra.mxu3 %v1788_v50  ;;  %v1729_v11 = vld [vmem:[%s3190_s2 + $0x30] sm:$0xf0]  ;;  %v1735_v12 = vld [vmem:[%s3190_s2 + $0x28] sm:$0xf]  ;;  %v2047_v13 = vld [vmem:[%s3190_s2 + $0x34] sm:$0xf0]  ;;  %v1728_v16 = vor.u32 %v2046_v8, %v1727_v7 }
  0x13   :  { %v2045_v14 = vld [vmem:[%s3190_s2 + $0x2c] sm:$0xf]  ;;  %v1737_v15 = vld [vmem:[%s3190_s2 + $0x38] sm:$0xf0]  ;;  %v1711_v17 = vld [vmem:[%s3190_s2] sm:$0xf]  ;;  %v1732_v18 = vor.u32 %v2044_v9, %v1729_v11  ;;  %v1736_v19 = vor.u32 %v2047_v13, %v1735_v12 }
  0x14   :  { %298 = vmatpush.bf16.msra.mxu0 %v1760_v56  ;;  %v2042_v20 = vld [vmem:[%s3190_s2 + $0xc] sm:$0xf0]  ;;  %v2040_v21 = vld [vmem:[%s3190_s2 + $0x4] sm:$0xf]  ;;  %v1713_v22 = vld [vmem:[%s3190_s2 + $0x10] sm:$0xf0]  ;;  %v1740_v23 = vor.u32 %v2045_v14, %v1737_v15 }
  0x15   :  { %327 = vmatpush.bf16.msra.mxu1 %v1764_v57  ;;  %356 = vmatpush.bf16.msra.mxu2 %v1768_v58  ;;  %v1719_v24 = vld [vmem:[%s3190_s2 + $0x8] sm:$0xf]  ;;  %v2043_v25 = vld [vmem:[%s3190_s2 + $0x14] sm:$0xf0]  ;;  %v2041_v26 = vld [vmem:[%s3190_s2 + $0xc] sm:$0xf]  ;;  %v1712_v30 = vor.u32 %v2042_v20, %v1711_v17  ;;  %v1716_v33 = vor.u32 %v2040_v21, %v1713_v22 }
  0x16   :  { %385 = vmatpush.bf16.msra.mxu3 %v1772_v62  ;;  %v1721_v27 = vld [vmem:[%s3190_s2 + $0x18] sm:$0xf0]  ;;  %v1951_v28 = vld [vmem:[%s3191_s3 + $0xe0] sm:$0xf]  ;;  %v2034_v29 = vld [vmem:[%s3191_s3 + $0xec] sm:$0xf0]  ;;  %v1720_v34 = vor.u32 %v2043_v25, %v1719_v24 }
  0x17   :  { %v2032_v31 = vld [vmem:[%s3191_s3 + $0xe4] sm:$0xf]  ;;  %v1953_v32 = vld [vmem:[%s3191_s3 + $0xf0] sm:$0xf0]  ;;  %v1724_v36 = vor.u32 %v2041_v26, %v1721_v27  ;;  %v2459_v37 = vor.u32 %v2034_v29, %v1951_v28  ;;  %v2033_v38 = vld [vmem:[%s3191_s3 + $0xec] sm:$0xf] }
  0x18   :  { %299 = vmatpush.bf16.msra.mxu0 %v1744_v4  ;;  %v2036_v35 = vld [vmem:[%s3192_s1] sm:$0xff]  ;;  %v1959_v39 = vld [vmem:[%s3191_s3 + $0xe8] sm:$0xf]  ;;  %v2035_v40 = vld [vmem:[%s3191_s3 + $0xf4] sm:$0xf0]  ;;  %v2470_v41 = vor.u32 %v2032_v31, %v1953_v32 }
  0x19   :  { %328 = vmatpush.bf16.msra.mxu1 %v1748_v5  ;;  %357 = vmatpush.bf16.msra.mxu2 %v1752_v6  ;;  %v1961_v42 = vld [vmem:[%s3191_s3 + $0xf8] sm:$0xf0]  ;;  %v1935_v43 = vld [vmem:[%s3191_s3 + $0xc0] sm:$0xf]  ;;  %v2030_v44 = vld [vmem:[%s3191_s3 + $0xcc] sm:$0xf0]  ;;  %v2487_v47 = vor.u32 %v2035_v40, %v1959_v39 }
  0x1a   :  { %386 = vmatpush.bf16.msra.mxu3 %v1756_v10  ;;  %v2028_v45 = vld [vmem:[%s3191_s3 + $0xc4] sm:$0xf]  ;;  %v1937_v46 = vld [vmem:[%s3191_s3 + $0xd0] sm:$0xf0]  ;;  %v2490_v48 = vor.u32 %v2033_v38, %v1961_v42  ;;  %v2492_v49 = vor.u32 %v2030_v44, %v1935_v43  ;;  %v2029_v50 = vld [vmem:[%s3191_s3 + $0xcc] sm:$0xf] }
  0x1b   :  { %v1943_v51 = vld [vmem:[%s3191_s3 + $0xc8] sm:$0xf]  ;;  %v2031_v52 = vld [vmem:[%s3191_s3 + $0xd4] sm:$0xf0]  ;;  %v2504_v53 = vor.u32 %v2028_v45, %v1937_v46  ;;  %v1945_v54 = vld [vmem:[%s3191_s3 + $0xd8] sm:$0xf0] }
  0x1c   :  { %300 = vmatpush.bf16.msra.mxu0 %v1728_v16  ;;  %v1919_v55 = vld [vmem:[%s3191_s3 + $0xa0] sm:$0xf]  ;;  %v2026_v56 = vld [vmem:[%s3191_s3 + $0xac] sm:$0xf0]  ;;  %v2024_v57 = vld [vmem:[%s3191_s3 + $0xa4] sm:$0xf]  ;;  %v2522_v59 = vor.u32 %v2031_v52, %v1943_v51  ;;  %v2526_v60 = vor.u32 %v2029_v50, %v1945_v54 }
  0x1d   :  { %329 = vmatpush.bf16.msra.mxu1 %v1732_v18  ;;  %358 = vmatpush.bf16.msra.mxu2 %v1736_v19  ;;  %v1921_v58 = vld [vmem:[%s3191_s3 + $0xb0] sm:$0xf0]  ;;  %v2528_v61 = vor.u32 %v2026_v56, %v1919_v55  ;;  %v2025_v62 = vld [vmem:[%s3191_s3 + $0xac] sm:$0xf]  ;;  %v1927_v63 = vld [vmem:[%s3191_s3 + $0xa8] sm:$0xf] }
  0x1e   :  { %387 = vmatpush.bf16.msra.mxu3 %v1740_v23  ;;  %v2027_v0 = vld [vmem:[%s3191_s3 + $0xb4] sm:$0xf0]  ;;  %v2540_v1 = vor.u32 %v2024_v57, %v1921_v58  ;;  %v1929_v2 = vld [vmem:[%s3191_s3 + $0xb8] sm:$0xf0]  ;;  %v1903_v3 = vld [vmem:[%s3191_s3 + $0x80] sm:$0xf] }
  0x1f   :  { %v2022_v4 = vld [vmem:[%s3191_s3 + $0x8c] sm:$0xf0]  ;;  %v2020_v5 = vld [vmem:[%s3191_s3 + $0x84] sm:$0xf]  ;;  %v1905_v6 = vld [vmem:[%s3191_s3 + $0x90] sm:$0xf0]  ;;  %v2558_v7 = vor.u32 %v2027_v0, %v1927_v63  ;;  %v2562_v8 = vor.u32 %v2025_v62, %v1929_v2 }
  0x20   :  { %301 = vmatpush.bf16.msra.mxu0 %v1712_v30  ;;  %v2564_v9 = vor.u32 %v2022_v4, %v1903_v3  ;;  %v2021_v10 = vld [vmem:[%s3191_s3 + $0x8c] sm:$0xf]  ;;  %v1911_v11 = vld [vmem:[%s3191_s3 + $0x88] sm:$0xf]  ;;  %v2023_v12 = vld [vmem:[%s3191_s3 + $0x94] sm:$0xf0]  ;;  %v2576_v13 = vor.u32 %v2020_v5, %v1905_v6 }
  0x21   :  { %330 = vmatpush.bf16.msra.mxu1 %v1716_v33  ;;  %359 = vmatpush.bf16.msra.mxu2 %v1720_v34  ;;  %v1913_v14 = vld [vmem:[%s3191_s3 + $0x98] sm:$0xf0]  ;;  %v1887_v15 = vld [vmem:[%s3191_s3 + $0x60] sm:$0xf]  ;;  %v2018_v16 = vld [vmem:[%s3191_s3 + $0x6c] sm:$0xf0]  ;;  %v2597_v20 = vor.u32 %v2023_v12, %v1911_v11 }
  0x22   :  { %388 = vmatpush.bf16.msra.mxu3 %v1724_v36  ;;  %v2016_v17 = vld [vmem:[%s3191_s3 + $0x64] sm:$0xf]  ;;  %v1889_v18 = vld [vmem:[%s3191_s3 + $0x70] sm:$0xf0]  ;;  %v2037_v19 = vld [vmem:[%s3192_s1 + $0x8] sm:$0xff]  ;;  %v2601_v21 = vor.u32 %v2021_v10, %v1913_v14  ;;  %v2603_v22 = vor.u32 %v2018_v16, %v1887_v15 }
  0x23   :  { %302 = vmatmul.bf16.vlgmr.msra.gmra.mxu0 %v2036_v35  ;;  %v2017_v23 = vld [vmem:[%s3191_s3 + $0x6c] sm:$0xf]  ;;  %v1895_v24 = vld [vmem:[%s3191_s3 + $0x68] sm:$0xf]  ;;  %v2019_v25 = vld [vmem:[%s3191_s3 + $0x74] sm:$0xf0]  ;;  %v2615_v26 = vor.u32 %v2016_v17, %v1889_v18 }
  0x24   :  { %614 = vmatpush.bf16.msrb.mxu0 %v2459_v37  ;;  %331 = vmatmul.bf16.vlgmr.msra.gmra.mxu1 %v2036_v35  ;;  %v1897_v27 = vld [vmem:[%s3191_s3 + $0x78] sm:$0xf0]  ;;  %v1871_v28 = vld [vmem:[%s3191_s3 + $0x40] sm:$0xf]  ;;  %v2014_v29 = vld [vmem:[%s3191_s3 + $0x4c] sm:$0xf0]  ;;  %v2633_v32 = vor.u32 %v2019_v25, %v1895_v24 }
  0x25   :  { %627 = vmatpush.bf16.msrb.mxu1 %v2470_v41  ;;  %360 = vmatmul.bf16.vlgmr.msra.gmra.mxu2 %v2036_v35  ;;  %v2012_v30 = vld [vmem:[%s3191_s3 + $0x44] sm:$0xf]  ;;  %v1873_v31 = vld [vmem:[%s3191_s3 + $0x50] sm:$0xf0]  ;;  %v2637_v33 = vor.u32 %v2017_v23, %v1897_v27  ;;  %v2639_v34 = vor.u32 %v2014_v29, %v1871_v28  ;;  %v2013_v36 = vld [vmem:[%s3191_s3 + $0x4c] sm:$0xf] }
  0x26   :  { %389 = vmatmul.bf16.vlgmr.msra.gmra.mxu3 %v2036_v35  ;;  %640 = vmatpush.bf16.msrb.mxu2 %v2487_v47  ;;  %v2642_v35 = vor.u32 %v2012_v30, %v1873_v31  ;;  %v1881_v38 = vld [vmem:[%s3191_s3 + $0x58] sm:$0xf0]  ;;  %v1855_v39 = vld [vmem:[%s3191_s3 + $0x20] sm:$0xf]  ;;  %v2010_v40 = vld [vmem:[%s3191_s3 + $0x2c] sm:$0xf0] }
  0x27   :  { %653 = vmatpush.bf16.msrb.mxu3 %v2490_v48  ;;  %v2008_v42 = vld [vmem:[%s3191_s3 + $0x24] sm:$0xf]  ;;  %v2662_v43 = vor.u32 %v2013_v36, %v1881_v38  ;;  %v2664_v44 = vor.u32 %v2010_v40, %v1855_v39  ;;  %v1857_v45 = vld [vmem:[%s3191_s3 + $0x30] sm:$0xf0]  ;;  %v1879_v46 = vld [vmem:[%s3191_s3 + $0x48] sm:$0xf] }
  0x28   :  { %615 = vmatpush.bf16.msrb.mxu0 %v2492_v49  ;;  %v2015_v50 = vld [vmem:[%s3191_s3 + $0x54] sm:$0xf0]  ;;  %v2676_v51 = vor.u32 %v2008_v42, %v1857_v45  ;;  %v2009_v54 = vld [vmem:[%s3191_s3 + $0x2c] sm:$0xf]  ;;  %v1865_v55 = vld [vmem:[%s3191_s3 + $0x38] sm:$0xf0] }
  0x29   :  { %628 = vmatpush.bf16.msrb.mxu1 %v2504_v53  ;;  %v2678_v52 = vor.u32 %v2015_v50, %v1879_v46  ;;  %v1839_v56 = vld [vmem:[%s3191_s3] sm:$0xf]  ;;  %v2006_v57 = vld [vmem:[%s3191_s3 + $0xc] sm:$0xf0]  ;;  %v2004_v58 = vld [vmem:[%s3191_s3 + $0x4] sm:$0xf]  ;;  %v2707_v2 = vor.u32 %v2009_v54, %v1865_v55 }
  0x2a   :  { %641 = vmatpush.bf16.msrb.mxu2 %v2522_v59  ;;  %v1841_v62 = vld [vmem:[%s3191_s3 + $0x10] sm:$0xf0]  ;;  %v1863_v63 = vld [vmem:[%s3191_s3 + $0x28] sm:$0xf]  ;;  %v2011_v0 = vld [vmem:[%s3191_s3 + $0x34] sm:$0xf0]  ;;  %v2709_v3 = vor.u32 %v2006_v57, %v1839_v56 }
  0x2b   :  { %654 = vmatpush.bf16.msrb.mxu3 %v2526_v60  ;;  %v2711_v4 = vor.u32 %v2011_v0, %v1863_v63  ;;  %v1847_v5 = vld [vmem:[%s3191_s3 + $0x8] sm:$0xf]  ;;  %v2007_v6 = vld [vmem:[%s3191_s3 + $0x14] sm:$0xf0]  ;;  %v2720_v10 = vor.u32 %v2004_v58, %v1841_v62  ;;  %v2005_v11 = vld [vmem:[%s3191_s3 + $0xc] sm:$0xf] }
  0x2c   :  { %616 = vmatpush.bf16.msrb.mxu0 %v2528_v61  ;;  %v1849_v12 = vld [vmem:[%s3191_s3 + $0x18] sm:$0xf0]  ;;  %v2729_v14 = vor.u32 %v2007_v6, %v1847_v5  ;;  %v2038_v16 = vld [vmem:[%s3192_s1 + $0x10] sm:$0xff]  ;;  %v442_v17 = vld [vmem:[%s3193_s0] sm:$0xff]  ;;  %v2215_v18 = vmov 0   ;;  %v2216_v23 = vmov 0.0|0.0  }
  0x2d   :  { %629 = vmatpush.bf16.msrb.mxu1 %v2540_v1  ;;  %v2733_v15 = vor.u32 %v2005_v11, %v1849_v12  ;;  %2086 = vset.pattern.permute.xlu0 %v2215_v18  ;;  %v100_v27 = vld [vmem:[%s3194_s4] sm:$0xf] }
  0x2e   :  { %642 = vmatpush.bf16.msrb.mxu2 %v2558_v7  ;;  %444 = vperm.xlu0 %2086, %v442_v17   ;;  %v102_v28 = vperm.slane %v100_v27, 0  ;;  %v103_v30 = vperm.slane %v100_v27, 1  ;;  %v2822_v42 = vperm.slane %v100_v27, 2  ;;  %v2824_v45 = vperm.slane %v100_v27, 3 }
  0x2f   :  { %655 = vmatpush.bf16.msrb.mxu3 %v2562_v8 }
  0x30   :  { %617 = vmatpush.bf16.msrb.mxu0 %v2564_v9 }
  0x31   :  { %630 = vmatpush.bf16.msrb.mxu1 %v2576_v13 }
  0x32   :  { %643 = vmatpush.bf16.msrb.mxu2 %v2597_v20 }
  0x33   :  { %656 = vmatpush.bf16.msrb.mxu3 %v2601_v21  ;;  %307 = vmatmul.bf16.gmra.mxu0 %v2037_v19 }
  0x34   :  { %618 = vmatpush.bf16.msrb.mxu0 %v2603_v22  ;;  %336 = vmatmul.bf16.gmra.mxu1 %v2037_v19 }
  0x35   :  { %631 = vmatpush.bf16.msrb.mxu1 %v2615_v26  ;;  %365 = vmatmul.bf16.gmra.mxu2 %v2037_v19 }
  0x36   :  { %394 = vmatmul.bf16.gmra.mxu3 %v2037_v19  ;;  %644 = vmatpush.bf16.msrb.mxu2 %v2633_v32  ;;  %v2039_v19 = vld [vmem:[%s3192_s1 + $0x18] sm:$0xff] }
  0x37   :  { %657 = vmatpush.bf16.msrb.mxu3 %v2637_v33 }
  0x38   :  { %619 = vmatpush.bf16.msrb.mxu0 %v2639_v34 }
  0x39   :  { %632 = vmatpush.bf16.msrb.mxu1 %v2642_v35 }
  0x3a   :  { %645 = vmatpush.bf16.msrb.mxu2 %v2678_v52 }
  0x3b   :  { %658 = vmatpush.bf16.msrb.mxu3 %v2662_v43 }
  0x3c   :  { %620 = vmatpush.bf16.msrb.mxu0 %v2664_v44 }
  0x3d   :  { %633 = vmatpush.bf16.msrb.mxu1 %v2676_v51 }
  0x3e   :  { %646 = vmatpush.bf16.msrb.mxu2 %v2711_v4 }
  0x3f   :  { %659 = vmatpush.bf16.msrb.mxu3 %v2707_v2 }
  0x40   :  { %621 = vmatpush.bf16.msrb.mxu0 %v2709_v3 }
  0x41   :  { %634 = vmatpush.bf16.msrb.mxu1 %v2720_v10 }
  0x42   :  { %647 = vmatpush.bf16.msrb.mxu2 %v2729_v14 }
  0x43   :  { %660 = vmatpush.bf16.msrb.mxu3 %v2733_v15  ;;  %312 = vmatmul.bf16.gmra.mxu0 %v2038_v16 }
  0x44   :  { %746 = vmatpush.bf16.msra.mxu0 %v2459_v37  ;;  %341 = vmatmul.bf16.gmra.mxu1 %v2038_v16 }
  0x45   :  { %759 = vmatpush.bf16.msra.mxu1 %v2470_v41  ;;  %370 = vmatmul.bf16.gmra.mxu2 %v2038_v16 }
  0x46   :  { %772 = vmatpush.bf16.msra.mxu2 %v2487_v47  ;;  %399 = vmatmul.bf16.gmra.mxu3 %v2038_v16 }
  0x47   :  { %785 = vmatpush.bf16.msra.mxu3 %v2490_v48 }
  0x48   :  { %747 = vmatpush.bf16.msra.mxu0 %v2492_v49 }
  0x49   :  { %760 = vmatpush.bf16.msra.mxu1 %v2504_v53 }
  0x4a   :  { %773 = vmatpush.bf16.msra.mxu2 %v2522_v59 }
  0x4b   :  { %786 = vmatpush.bf16.msra.mxu3 %v2526_v60 }
  0x4c   :  { %748 = vmatpush.bf16.msra.mxu0 %v2528_v61 }
  0x4d   :  { %761 = vmatpush.bf16.msra.mxu1 %v2540_v1 }
  0x4e   :  { %774 = vmatpush.bf16.msra.mxu2 %v2558_v7 }
  0x4f   :  { %787 = vmatpush.bf16.msra.mxu3 %v2562_v8 }
  0x50   :  { %749 = vmatpush.bf16.msra.mxu0 %v2564_v9 }
  0x51   :  { %762 = vmatpush.bf16.msra.mxu1 %v2576_v13 }
  0x52   :  { %775 = vmatpush.bf16.msra.mxu2 %v2597_v20 }
  0x53   :  { %788 = vmatpush.bf16.msra.mxu3 %v2601_v21  ;;  %317 = vmatmul.bf16.gmra.mxu0 %v2039_v19 }
  0x54   :  { %750 = vmatpush.bf16.msra.mxu0 %v2603_v22  ;;  %346 = vmatmul.bf16.gmra.mxu1 %v2039_v19 }
  0x55   :  { %763 = vmatpush.bf16.msra.mxu1 %v2615_v26  ;;  %375 = vmatmul.bf16.gmra.mxu2 %v2039_v19 }
  0x56   :  { %776 = vmatpush.bf16.msra.mxu2 %v2633_v32  ;;  %404 = vmatmul.bf16.gmra.mxu3 %v2039_v19 }
  0x57   :  { %789 = vmatpush.bf16.msra.mxu3 %v2637_v33 }
  0x58   :  { %751 = vmatpush.bf16.msra.mxu0 %v2639_v34 }
  0x59   :  { %764 = vmatpush.bf16.msra.mxu1 %v2642_v35 }
  0x5a   :  { %777 = vmatpush.bf16.msra.mxu2 %v2678_v52 }
  0x5b   :  { %790 = vmatpush.bf16.msra.mxu3 %v2662_v43 }
  0x5c   :  { %752 = vmatpush.bf16.msra.mxu0 %v2664_v44 }
  0x5d   :  { %765 = vmatpush.bf16.msra.mxu1 %v2676_v51 }
  0x5e   :  { %778 = vmatpush.bf16.msra.mxu2 %v2711_v4 }
  0x5f   :  { %791 = vmatpush.bf16.msra.mxu3 %v2707_v2 }
  0x60   :  { %753 = vmatpush.bf16.msra.mxu0 %v2709_v3 }
  0x61   :  { %766 = vmatpush.bf16.msra.mxu1 %v2720_v10 }
  0x62   :  { %779 = vmatpush.bf16.msra.mxu2 %v2729_v14 }
  0x63   :  { %792 = vmatpush.bf16.msra.mxu3 %v2733_v15  ;;  %622 = vmatmul.bf16.vlgmr.msrb.gmra.mxu0 %v2216_v23 }
  0x64   :  { %635 = vmatmul.bf16.vlgmr.msrb.gmra.mxu1 %v2216_v23  ;;  %880 = vmatpush.bf16.msrb.mxu0 %v2459_v37 }
  0x65   :  { %648 = vmatmul.bf16.vlgmr.msrb.gmra.mxu2 %v2216_v23  ;;  %893 = vmatpush.bf16.msrb.mxu1 %v2470_v41 }
  0x66   :  { %661 = vmatmul.bf16.vlgmr.msrb.gmra.mxu3 %v2216_v23  ;;  %906 = vmatpush.bf16.msrb.mxu2 %v2487_v47 }
  0x67   :  { %919 = vmatpush.bf16.msrb.mxu3 %v2490_v48 }
  0x68   :  { %881 = vmatpush.bf16.msrb.mxu0 %v2492_v49 }
  0x69   :  { %894 = vmatpush.bf16.msrb.mxu1 %v2504_v53 }
  0x6a   :  { %907 = vmatpush.bf16.msrb.mxu2 %v2522_v59 }
  0x6b   :  { %920 = vmatpush.bf16.msrb.mxu3 %v2526_v60 }
  0x6c   :  { %882 = vmatpush.bf16.msrb.mxu0 %v2528_v61 }
  0x6d   :  { %895 = vmatpush.bf16.msrb.mxu1 %v2540_v1 }
  0x6e   :  { %908 = vmatpush.bf16.msrb.mxu2 %v2558_v7 }
  0x6f   :  { %921 = vmatpush.bf16.msrb.mxu3 %v2562_v8 }
  0x70   :  { %883 = vmatpush.bf16.msrb.mxu0 %v2564_v9 }
  0x71   :  { %896 = vmatpush.bf16.msrb.mxu1 %v2576_v13 }
  0x72   :  { %909 = vmatpush.bf16.msrb.mxu2 %v2597_v20 }
  0x73   :  { %922 = vmatpush.bf16.msrb.mxu3 %v2601_v21 }
  0x74   :  { %884 = vmatpush.bf16.msrb.mxu0 %v2603_v22 }
  0x75   :  { %897 = vmatpush.bf16.msrb.mxu1 %v2615_v26 }
  0x76   :  { %910 = vmatpush.bf16.msrb.mxu2 %v2633_v32 }
  0x77   :  { %923 = vmatpush.bf16.msrb.mxu3 %v2637_v33 }
  0x78   :  { %885 = vmatpush.bf16.msrb.mxu0 %v2639_v34 }
  0x79   :  { %898 = vmatpush.bf16.msrb.mxu1 %v2642_v35 }
  0x7a   :  { %911 = vmatpush.bf16.msrb.mxu2 %v2678_v52 }
  0x7b   :  { %924 = vmatpush.bf16.msrb.mxu3 %v2662_v43 }
  0x7c   :  { %886 = vmatpush.bf16.msrb.mxu0 %v2664_v44 }
  0x7d   :  { %899 = vmatpush.bf16.msrb.mxu1 %v2676_v51 }
  0x7e   :  { %912 = vmatpush.bf16.msrb.mxu2 %v2711_v4 }
  0x7f   :  { %925 = vmatpush.bf16.msrb.mxu3 %v2707_v2 }
  0x80   :  { %887 = vmatpush.bf16.msrb.mxu0 %v2709_v3 }
  0x81   :  { %900 = vmatpush.bf16.msrb.mxu1 %v2720_v10 }
  0x82   :  { %913 = vmatpush.bf16.msrb.mxu2 %v2729_v14 }
  0x83   :  { %926 = vmatpush.bf16.msrb.mxu3 %v2733_v15 }
  0xa0   :  { %v303_v24 = vpop.f32.mrf.mxu0 }
  0xa1   :  { %v332_v25 = vpop.f32.mrf.mxu1 }
  0xa8   :  { %v2814_v29 = vpop.f32.mrf.mxu2  ;;  %v305_v36 = vpop.f32.mrf.mxu0 }
  0xa9   :  { %v2816_v31 = vpop.f32.mrf.mxu3  ;;  %v2818_v38 = vadd.f32 %v305_v36, %v102_v28  ;;  %v334_v39 = vpop.f32.mrf.mxu1 }
  0xaa   :  { %v2820_v40 = vadd.f32 %v334_v39, %v103_v30 }
  0xb0   :  { %v363_v46 = vpop.f32.mrf.mxu2  ;;  %v308_v55 = vpop.f32.mrf.mxu0 }
  0xb1   :  { %v2827_v50 = vadd.f32 %v363_v46, %v2822_v42  ;;  %v392_v54 = vpop.f32.mrf.mxu3  ;;  %v2832_v57 = vadd.f32 %v308_v55, %v102_v28  ;;  %v337_v58 = vpop.f32.mrf.mxu1 }
  0xb2   :  { %v2830_v56 = vadd.f32 %v392_v54, %v2824_v45  ;;  %v2834_v62 = vadd.f32 %v337_v58, %v103_v30 }
  0xb8   :  { %v366_v63 = vpop.f32.mrf.mxu2  ;;  %v310_v6 = vpop.f32.mrf.mxu0 }
  0xb9   :  { %v2837_v0 = vadd.f32 %v366_v63, %v2822_v42  ;;  %v395_v5 = vpop.f32.mrf.mxu3  ;;  %v2842_v12 = vadd.f32 %v310_v6, %v102_v28  ;;  %v339_v16 = vpop.f32.mrf.mxu1 }
  0xba   :  { %v2840_v11 = vadd.f32 %v395_v5, %v2824_v45  ;;  %v2844_v17 = vadd.f32 %v339_v16, %v103_v30 }
  0xbb   :  { %3197 = vst [vmem:[#allocation5_spill] sm:$0xff] %v2837_v0 }
  0xbc   :  { %3198 = vst [vmem:[#allocation6_spill] sm:$0xff] %v2842_v12 }
  0xbd   :  { %3199 = vst [vmem:[#allocation7_spill] sm:$0xff] %v2844_v17 }
  0xc0   :  { %v368_v18 = vpop.f32.mrf.mxu2  ;;  %v313_v27 = vpop.f32.mrf.mxu0 }
  0xc1   :  { %v2847_v19 = vadd.f32 %v368_v18, %v2822_v42  ;;  %v397_v23 = vpop.f32.mrf.mxu3  ;;  %v2852_v39 = vadd.f32 %v313_v27, %v102_v28  ;;  %v342_v46 = vpop.f32.mrf.mxu1 }
  0xc2   :  { %v2850_v36 = vadd.f32 %v397_v23, %v2824_v45  ;;  %v2854_v54 = vadd.f32 %v342_v46, %v103_v30 }
  0xc3   :  { %3200 = vst [vmem:[#allocation8_spill] sm:$0xff] %v2847_v19 }
  0xc4   :  { %3201 = vst [vmem:[#allocation9_spill] sm:$0xff] %v2850_v36 }
  0xc5   :  { %3202 = vst [vmem:[#allocation10_spill] sm:$0xff] %v2852_v39 }
  0xc6   :  { %3203 = vst [vmem:[#allocation11_spill] sm:$0xff] %v2854_v54 }
  0xc8   :  { %v371_v55 = vpop.f32.mrf.mxu2  ;;  %v315_v5 = vpop.f32.mrf.mxu0 }
  0xc9   :  { %v2857_v58 = vadd.f32 %v371_v55, %v2822_v42  ;;  %v400_v63 = vpop.f32.mrf.mxu3  ;;  %v2862_v16 = vadd.f32 %v315_v5, %v102_v28  ;;  %v344_v18 = vpop.f32.mrf.mxu1 }
  0xca   :  { %v2860_v6 = vadd.f32 %v400_v63, %v2824_v45  ;;  %v2864_v19 = vadd.f32 %v344_v18, %v103_v30 }
  0xcb   :  { %3204 = vst [vmem:[#allocation12_spill] sm:$0xff] %v2857_v58 }
  0xcc   :  { %3205 = vst [vmem:[#allocation13_spill] sm:$0xff] %v2860_v6 }
  0xcd   :  { %3206 = vst [vmem:[#allocation14_spill] sm:$0xff] %v2862_v16 }
  0xce   :  { %3207 = vst [vmem:[#allocation15_spill] sm:$0xff] %v2864_v19 }
  0xd0   :  { %v373_v23 = vpop.f32.mrf.mxu2  ;;  %v318_v54 = vpop.f32.mrf.mxu0 }
  0xd1   :  { %v2867_v27 = vadd.f32 %v373_v23, %v2822_v42  ;;  %v402_v46 = vpop.f32.mrf.mxu3  ;;  %v2872_v55 = vadd.f32 %v318_v54, %v102_v28  ;;  %v347_v58 = vpop.f32.mrf.mxu1 }
  0xd2   :  { %v2870_v39 = vadd.f32 %v402_v46, %v2824_v45  ;;  %v2874_v36 = vadd.f32 %v347_v58, %v103_v30  ;;  %v304_v46 = vadd.f32 %v303_v24, %v102_v28  ;;  %v391_v24 = vadd.f32 %v2816_v31, %v2824_v45 }
  0xd3   :  { %3208 = vst [vmem:[#allocation16_spill] sm:$0xff] %v2867_v27 }
  0xd4   :  { %3209 = vst [vmem:[#allocation17_spill] sm:$0xff] %v2870_v39 }
  0xd5   :  { %3210 = vst [vmem:[#allocation18_spill] sm:$0xff] %v2872_v55  ;;  %v333_v55 = vadd.f32 %v332_v25, %v103_v30 }
  0xd6   :  { %3211 = vst [vmem:[#allocation19_spill] sm:$0xff] %v2874_v36 }
  0xd8   :  { %v376_v63 = vpop.f32.mrf.mxu2  ;;  %v320_v19 = vpop.f32.mrf.mxu0 }
  0xd9   :  { %v2877_v5 = vadd.f32 %v376_v63, %v2822_v42  ;;  %v405_v18 = vpop.f32.mrf.mxu3  ;;  %v2882_v23 = vadd.f32 %v320_v19, %v102_v28  ;;  %v349_v27 = vpop.f32.mrf.mxu1 }
  0xda   :  { %v2880_v16 = vadd.f32 %v405_v18, %v2824_v45  ;;  %v2884_v6 = vadd.f32 %v349_v27, %v103_v30 }
  0xdb   :  { %3212 = vst [vmem:[#allocation20_spill] sm:$0xff] %v2877_v5 }
  0xdc   :  { %3213 = vst [vmem:[#allocation21_spill] sm:$0xff] %v2880_v16 }
  0xdd   :  { %3214 = vst [vmem:[#allocation22_spill] sm:$0xff] %v2882_v23 }
  0xde   :  { %3215 = vst [vmem:[#allocation23_spill] sm:$0xff] %v2884_v6 }
  0xe0   :  { %v378_v54 = vpop.f32.mrf.mxu2  ;;  %v623_v39 = vpop.f32.mrf.mxu0 }
  0xe1   :  { %v2887_v58 = vadd.f32 %v378_v54, %v2822_v42  ;;  %v407_v36 = vpop.f32.mrf.mxu3  ;;  %v666_v5 = vadd.f32 %v623_v39, %v304_v46  ;;  %v636_v17 = vpop.f32.mrf.mxu1 }
  0xe2   :  { %v2890_v63 = vadd.f32 %v407_v36, %v2824_v45  ;;  %v667_v18 = vadd.f32 %v636_v17, %v333_v55 }
  0xe3   :  { %3216 = vst [vmem:[#allocation24_spill] sm:$0xff] %v2887_v58  ;;  %v1965_v16 = vmul.f32 -1.442695, %v666_v5 }
  0xe4   :  { %3217 = vst [vmem:[#allocation25_spill] sm:$0xff] %v2890_v63  ;;  %v1966_v19 = vmul.f32 -1.442695, %v667_v18 }
  0xe5   :  { %2087 = vpow2.f32 %v1965_v16  ;;  %v362_v16 = vadd.f32 %v2814_v29, %v2822_v42 }
  0xe6   :  { %2089 = vpow2.f32 %v1966_v19 }
  0xe8   :  { %v649_v28 = vpop.f32.mrf.mxu2  ;;  %v625_v30 = vpop.f32.mrf.mxu0 }
  0xe9   :  { %v662_v25 = vpop.f32.mrf.mxu3  ;;  %v638_v54 = vpop.f32.mrf.mxu1  ;;  %v668_v45 = vadd.f32 %v649_v28, %v362_v16 }
  0xea   :  { %v669_v27 = vadd.f32 %v662_v25, %v391_v24 }
  0xeb   :  { %v2088_v58 = vpop.eup %2087 }
  0xec   :  { %v1967_v6 = vmul.f32 -1.442695, %v669_v27  ;;  %v2090_v23 = vpop.eup %2089  ;;  %v673_v36 = vadd.f32 1.0, %v2088_v58 }
  0xed   :  { %v692_v63 = vadd.f32 1.0, %v2090_v23 }
  0xee   :  { %2091 = vpow2.f32 %v1967_v6  ;;  %v685_v58 = vand.u32 2147483648, %v673_v36  ;;  %v683_v30 = vand.u32 2147483647, %v673_v36  ;;  %vm679_vm2 = vweird.f32 %v673_v36 }
  0xef   :  { %2093 = vrcp.f32 %v673_v36  ;;  %v704_v6 = vand.u32 2147483648, %v692_v63  ;;  %v702_v54 = vand.u32 2147483647, %v692_v63  ;;  %vm698_vm3 = vweird.f32 %v692_v63 }
  0xf0   :  { %2095 = vrcp.f32 %v692_v63  ;;  %v651_v17 = vpop.f32.mrf.mxu2  ;;  %v686_v28 = vor.u32 1.1754944e-38, %v685_v58  ;;  %vm684_vm5 = vcmp.eq.f32.partialorder %v683_v30, 8.507059e+37 }
  0xf1   :  { %v664_v39 = vpop.f32.mrf.mxu3  ;;  %vm703_vm7 = vcmp.eq.f32.partialorder %v702_v54, 8.507059e+37 }
  0xf2   :  { %v705_v39 = vor.u32 1.1754944e-38, %v704_v6 }
  0xf4   :  { %v2092_v55 = vpop.eup %2091 }
  0xf5   :  { %v2094_v31 = vpop.eup %2093  ;;  %v712_v5 = vadd.f32 1.0, %v2092_v55 }
  0xf6   :  { %v2096_v46 = vpop.eup %2095  ;;  %v675_v18 = vmul.f32 %v2094_v31, %v673_v36  ;;  %vm680_vm0 = vweird.f32 %v2094_v31 }
  0xf7   :  { %v694_v19 = vmul.f32 %v2096_v46, %v692_v63  ;;  %2097 = vrcp.f32 %v712_v5  ;;  %vm699_vm1 = vweird.f32 %v2096_v46  ;;  %vm681_vm4 = vmor %vm679_vm2, %vm680_vm0  ;;  %vm718_vm10 = vweird.f32 %v712_v5 }
  0xf8   :  { %v676_v24 = vsub.f32 1.0, %v675_v18  ;;  %2099 = vtanh.f32 %v668_v45  ;;  %vm700_vm6 = vmor %vm698_vm3, %vm699_vm1 }
  0xf9   :  { %v695_v25 = vsub.f32 1.0, %v694_v19 }
  0xfa   :  { %v677_v23 = vmul.f32 %v2094_v31, %v676_v24  ;;  %v2896_v24 = vpop.permute.xlu0 %444 }
  0xfb   :  { %v696_v27 = vmul.f32 %v2096_v46, %v695_v25  ;;  %vm1968_vm8 = vcmp.gt.s32.totalorder %v2896_v24, 0 }
  0xfc   :  { %v678_v29 = vadd.f32 %v2094_v31, %v677_v23  ;;  %vm2072_vm13 = vmpackc.low %vm1968_vm8, %vm1968_vm8 }
  0xfd   :  { %v2098_v42 = vpop.eup %2097  ;;  %v697_v17 = vadd.f32 %v2096_v46, %v696_v27 }
  0xfe   :  { %v682_v16 = vsel %vm681_vm4, %v2094_v31, %v678_v29  ;;  %v714_v55 = vmul.f32 %v2098_v42, %v712_v5  ;;  %v2100_v45 = vpop.eup %2099  ;;  %vm719_vm9 = vweird.f32 %v2098_v42  ;;  %v724_v31 = vand.u32 2147483648, %v712_v5 }
  0xff   :  { %v687_v18 = vsel %vm684_vm5, %v686_v28, %v682_v16  ;;  %v701_v19 = vsel %vm700_vm6, %v2096_v46, %v697_v17  ;;  %v722_v46 = vand.u32 2147483647, %v712_v5  ;;  %vm720_vm11 = vmor %vm718_vm10, %vm719_vm9 }
 0x100   :  { %v706_v25 = vsel %vm703_vm7, %v705_v39, %v701_v19  ;;  %v729_v12 = vmul.f32 %v2100_v45, %v687_v18  ;;  %v715_v23 = vsub.f32 1.0, %v714_v55  ;;  %v725_v27 = vor.u32 1.1754944e-38, %v724_v31 }
 0x101   :  { %v728_v36 = vmul.f32 0.0, %v706_v25  ;;  %vm723_vm12 = vcmp.eq.f32.partialorder %v722_v46, 8.507059e+37  ;;  %vm1972_vm7 = vcmp.gt.s32.totalorder %v2896_v24, 1 }
 0x102   :  { %v716_v0 = vmul.f32 %v2098_v42, %v715_v23 }
 0x103   :  { %v730_v63 = vadd.f32 %v729_v12, %v728_v36 }
 0x104   :  { %v717_v58 = vadd.f32 %v2098_v42, %v716_v0 }
 0x105   :  { %2101 = vtanh.f32 %v730_v63  ;;  %v2901_v6 = vsel %vm1968_vm8, %v730_v63, 0.0 }
 0x106   :  { %v721_v30 = vsel %vm720_vm11, %v2098_v42, %v717_v58 }
 0x107   :  { %v726_v29 = vsel %vm723_vm12, %v725_v27, %v721_v30 }
 0x10b   :  { %v2102_v54 = vpop.eup %2101 }
 0x10c   :  { %v732_v28 = vmul.f32 %v2102_v54, %v726_v29 }
 0x10e   :  { %v2908_v0 = vsel %vm1968_vm8, %v732_v28, 0.0  ;;  %v2073_v12 = vpack.c.bf16 %v732_v28, %v732_v28 }
 0x10f   :  { %v738_v17 = vpack.c.bf16 %v2908_v0, %v2908_v0 }
 0x110   :  { %2074 = vmatmul.msk.bf16.vlgmr.msra.gmra.mxu0 %vm2072_vm13, %v2073_v12  ;;  %2077 = vmatmul.msk.bf16.vlgmr.msra.gmra.mxu1 %vm2072_vm13, %v2073_v12 }
 0x111   :  { %739 = vst [vmem:[%s3195_s5] sm:$0xf] %v738_v17  ;;  %2080 = vmatmul.msk.bf16.vlgmr.msra.gmra.mxu2 %vm2072_vm13, %v2073_v12  ;;  %2083 = vmatmul.msk.bf16.vlgmr.msra.gmra.mxu3 %vm2072_vm13, %v2073_v12 }
 0x112   :  { %1014 = vmatpush.bf16.msra.mxu0 %v2459_v37  ;;  %1027 = vmatpush.bf16.msra.mxu1 %v2470_v41 }
 0x113   :  { %1040 = vmatpush.bf16.msra.mxu2 %v2487_v47  ;;  %1053 = vmatpush.bf16.msra.mxu3 %v2490_v48 }
 0x116   :  { %1015 = vmatpush.bf16.msra.mxu0 %v2492_v49  ;;  %1028 = vmatpush.bf16.msra.mxu1 %v2504_v53 }
 0x117   :  { %1041 = vmatpush.bf16.msra.mxu2 %v2522_v59  ;;  %1054 = vmatpush.bf16.msra.mxu3 %v2526_v60 }
 0x11a   :  { %1016 = vmatpush.bf16.msra.mxu0 %v2528_v61  ;;  %1029 = vmatpush.bf16.msra.mxu1 %v2540_v1 }
 0x11b   :  { %1042 = vmatpush.bf16.msra.mxu2 %v2558_v7  ;;  %1055 = vmatpush.bf16.msra.mxu3 %v2562_v8 }
 0x11e   :  { %1017 = vmatpush.bf16.msra.mxu0 %v2564_v9  ;;  %1030 = vmatpush.bf16.msra.mxu1 %v2576_v13 }
 0x11f   :  { %1043 = vmatpush.bf16.msra.mxu2 %v2597_v20  ;;  %1056 = vmatpush.bf16.msra.mxu3 %v2601_v21 }
 0x122   :  { %1018 = vmatpush.bf16.msra.mxu0 %v2603_v22  ;;  %1031 = vmatpush.bf16.msra.mxu1 %v2615_v26 }
 0x123   :  { %1044 = vmatpush.bf16.msra.mxu2 %v2633_v32  ;;  %1057 = vmatpush.bf16.msra.mxu3 %v2637_v33 }
 0x126   :  { %1019 = vmatpush.bf16.msra.mxu0 %v2639_v34  ;;  %1032 = vmatpush.bf16.msra.mxu1 %v2642_v35 }
 0x127   :  { %1045 = vmatpush.bf16.msra.mxu2 %v2678_v52  ;;  %1058 = vmatpush.bf16.msra.mxu3 %v2662_v43 }
 0x12a   :  { %1020 = vmatpush.bf16.msra.mxu0 %v2664_v44  ;;  %1033 = vmatpush.bf16.msra.mxu1 %v2676_v51 }
 0x12b   :  { %1046 = vmatpush.bf16.msra.mxu2 %v2711_v4  ;;  %1059 = vmatpush.bf16.msra.mxu3 %v2707_v2 }
 0x12e   :  { %1021 = vmatpush.bf16.msra.mxu0 %v2709_v3  ;;  %1034 = vmatpush.bf16.msra.mxu1 %v2720_v10 }
 0x12f   :  { %1047 = vmatpush.bf16.msra.mxu2 %v2729_v14  ;;  %1060 = vmatpush.bf16.msra.mxu3 %v2733_v15 }
 0x18d   :  { %v755_v5 = vpop.f32.mrf.mxu0  ;;  %v768_v42 = vpop.f32.mrf.mxu1 }
 0x18e   :  { %v798_v39 = vadd.f32 %v755_v5, %v2818_v38  ;;  %v799_v16 = vadd.f32 %v768_v42, %v2820_v40 }
 0x190   :  { %v1969_v55 = vmul.f32 -1.442695, %v798_v39  ;;  %v1970_v45 = vmul.f32 -1.442695, %v799_v16 }
 0x192   :  { %2103 = vpow2.f32 %v1969_v55 }
 0x193   :  { %2105 = vpow2.f32 %v1970_v45 }
 0x194   :  { %v781_v18 = vpop.f32.mrf.mxu2  ;;  %v794_v19 = vpop.f32.mrf.mxu3 }
 0x195   :  { %v801_v25 = vadd.f32 %v794_v19, %v2830_v56  ;;  %v757_v23 = vpop.f32.mrf.mxu0  ;;  %v770_v36 = vpop.f32.mrf.mxu1  ;;  %v800_v28 = vadd.f32 %v781_v18, %v2827_v50 }
 0x197   :  { %v1971_v63 = vmul.f32 -1.442695, %v801_v25 }
 0x198   :  { %v2104_v58 = vpop.eup %2103 }
 0x199   :  { %v2106_v31 = vpop.eup %2105  ;;  %v805_v46 = vadd.f32 1.0, %v2104_v58  ;;  %2107 = vpow2.f32 %v1971_v63 }
 0x19a   :  { %v824_v30 = vadd.f32 1.0, %v2106_v31 }
 0x19b   :  { %2109 = vrcp.f32 %v805_v46  ;;  %v817_v39 = vand.u32 2147483648, %v805_v46  ;;  %v815_v45 = vand.u32 2147483647, %v805_v46  ;;  %vm811_vm0 = vweird.f32 %v805_v46 }
 0x19c   :  { %2111 = vrcp.f32 %v824_v30  ;;  %v783_v38 = vpop.f32.mrf.mxu2  ;;  %v796_v40 = vpop.f32.mrf.mxu3  ;;  %v836_v16 = vand.u32 2147483648, %v824_v30  ;;  %v834_v25 = vand.u32 2147483647, %v824_v30  ;;  %vm830_vm1 = vweird.f32 %v824_v30 }
 0x19d   :  { %v818_v50 = vor.u32 1.1754944e-38, %v817_v39  ;;  %vm816_vm4 = vcmp.eq.f32.partialorder %v815_v45, 8.507059e+37 }
 0x19e   :  { %v837_v58 = vor.u32 1.1754944e-38, %v836_v16  ;;  %vm835_vm5 = vcmp.eq.f32.partialorder %v834_v25, 8.507059e+37 }
 0x19f   :  { %v2108_v27 = vpop.eup %2107 }
 0x1a0   :  { %v844_v54 = vadd.f32 1.0, %v2108_v27 }
 0x1a1   :  { %v2110_v29 = vpop.eup %2109 }
 0x1a2   :  { %v2112_v12 = vpop.eup %2111  ;;  %v807_v17 = vmul.f32 %v2110_v29, %v805_v46  ;;  %2113 = vrcp.f32 %v844_v54  ;;  %vm812_vm14 = vweird.f32 %v2110_v29  ;;  %v856_v39 = vand.u32 2147483648, %v844_v54 }
 0x1a3   :  { %v826_v56 = vmul.f32 %v2112_v12, %v824_v30  ;;  %2115 = vtanh.f32 %v800_v28  ;;  %vm831_vm15 = vweird.f32 %v2112_v12  ;;  %vm813_vm2 = vmor %vm811_vm0, %vm812_vm14  ;;  %vm850_vm8 = vweird.f32 %v844_v54 }
 0x1a4   :  { %v808_v5 = vsub.f32 1.0, %v807_v17  ;;  %vm832_vm3 = vmor %vm830_vm1, %vm831_vm15  ;;  %v854_v16 = vand.u32 2147483647, %v844_v54 }
 0x1a5   :  { %v827_v42 = vsub.f32 1.0, %v826_v56 }
 0x1a6   :  { %v809_v55 = vmul.f32 %v2110_v29, %v808_v5  ;;  %vm855_vm10 = vcmp.eq.f32.partialorder %v854_v16, 8.507059e+37 }
 0x1a7   :  { %v828_v19 = vmul.f32 %v2112_v12, %v827_v42 }
 0x1a8   :  { %v2114_v23 = vpop.eup %2113  ;;  %v810_v36 = vadd.f32 %v2110_v29, %v809_v55  ;;  %v857_v55 = vor.u32 1.1754944e-38, %v856_v39 }
 0x1a9   :  { %v829_v18 = vadd.f32 %v2112_v12, %v828_v19  ;;  %v846_v63 = vmul.f32 %v2114_v23, %v844_v54  ;;  %v2116_v38 = vpop.eup %2115  ;;  %vm851_vm6 = vweird.f32 %v2114_v23 }
 0x1aa   :  { %v814_v31 = vsel %vm813_vm2, %v2110_v29, %v810_v36  ;;  %vm852_vm9 = vmor %vm850_vm8, %vm851_vm6 }
 0x1ab   :  { %v819_v40 = vsel %vm816_vm4, %v818_v50, %v814_v31  ;;  %v833_v27 = vsel %vm832_vm3, %v2112_v12, %v829_v18  ;;  %v847_v28 = vsub.f32 1.0, %v846_v63  ;;  %vm1977_vm4 = vcmp.gt.s32.totalorder %v2896_v24, 2 }
 0x1ac   :  { %v838_v17 = vsel %vm835_vm5, %v837_v58, %v833_v27  ;;  %v861_v56 = vmul.f32 %v2116_v38, %v819_v40 }
 0x1ad   :  { %v860_v5 = vmul.f32 %v838_v17, %v2901_v6  ;;  %v848_v42 = vmul.f32 %v2114_v23, %v847_v28 }
 0x1af   :  { %v862_v46 = vadd.f32 %v861_v56, %v860_v5  ;;  %v849_v30 = vadd.f32 %v2114_v23, %v848_v42 }
 0x1b1   :  { %2117 = vtanh.f32 %v862_v46  ;;  %v2954_v29 = vsel %vm1972_vm7, %v862_v46, %v2901_v6  ;;  %v853_v12 = vsel %vm852_vm9, %v2114_v23, %v849_v30 }
 0x1b2   :  { %v858_v19 = vsel %vm855_vm10, %v857_v55, %v853_v12  ;;  %v3218_v55 = vld [vmem:[#allocation5_spill] sm:$0xff] }
 0x1b7   :  { %v2118_v45 = vpop.eup %2117 }
 0x1b8   :  { %v864_v25 = vmul.f32 %v2118_v45, %v858_v19 }
 0x1ba   :  { %v2957_v36 = vsel %vm1972_vm7, %v864_v25, %v2908_v0  ;;  %v870_v50 = vsel %vm1972_vm7, %v864_v25, 0.0 }
 0x1bb   :  { %v871_v18 = vpack.c.bf16 %v870_v50, %v870_v50  ;;  %v879_v63 = vpack.c.bf16 %v2957_v36, %v2957_v36 }
 0x1bd   :  { %1973 = vst [vmem:[%s3195_s5 + $0x4] sm:$0xf] %v871_v18  ;;  %888 = vmatmul.bf16.vlgmr.msrb.gmra.mxu0 %v879_v63  ;;  %901 = vmatmul.bf16.vlgmr.msrb.gmra.mxu1 %v879_v63 }
 0x1be   :  { %914 = vmatmul.bf16.vlgmr.msrb.gmra.mxu2 %v879_v63  ;;  %927 = vmatmul.bf16.vlgmr.msrb.gmra.mxu3 %v879_v63 }
 0x1bf   :  { %1148 = vmatpush.bf16.msrb.mxu0 %v2459_v37  ;;  %1161 = vmatpush.bf16.msrb.mxu1 %v2470_v41 }
 0x1c0   :  { %1174 = vmatpush.bf16.msrb.mxu2 %v2487_v47  ;;  %1187 = vmatpush.bf16.msrb.mxu3 %v2490_v48 }
 0x1c3   :  { %1149 = vmatpush.bf16.msrb.mxu0 %v2492_v49  ;;  %1162 = vmatpush.bf16.msrb.mxu1 %v2504_v53 }
 0x1c4   :  { %1175 = vmatpush.bf16.msrb.mxu2 %v2522_v59  ;;  %1188 = vmatpush.bf16.msrb.mxu3 %v2526_v60 }
 0x1c7   :  { %1150 = vmatpush.bf16.msrb.mxu0 %v2528_v61  ;;  %1163 = vmatpush.bf16.msrb.mxu1 %v2540_v1 }
 0x1c8   :  { %1176 = vmatpush.bf16.msrb.mxu2 %v2558_v7  ;;  %1189 = vmatpush.bf16.msrb.mxu3 %v2562_v8 }
 0x1cb   :  { %1151 = vmatpush.bf16.msrb.mxu0 %v2564_v9  ;;  %1164 = vmatpush.bf16.msrb.mxu1 %v2576_v13 }
 0x1cc   :  { %1177 = vmatpush.bf16.msrb.mxu2 %v2597_v20  ;;  %1190 = vmatpush.bf16.msrb.mxu3 %v2601_v21 }
 0x1cf   :  { %1152 = vmatpush.bf16.msrb.mxu0 %v2603_v22  ;;  %1165 = vmatpush.bf16.msrb.mxu1 %v2615_v26 }
 0x1d0   :  { %1178 = vmatpush.bf16.msrb.mxu2 %v2633_v32  ;;  %1191 = vmatpush.bf16.msrb.mxu3 %v2637_v33 }
 0x1d3   :  { %1153 = vmatpush.bf16.msrb.mxu0 %v2639_v34  ;;  %1166 = vmatpush.bf16.msrb.mxu1 %v2642_v35 }
 0x1d4   :  { %1179 = vmatpush.bf16.msrb.mxu2 %v2678_v52  ;;  %1192 = vmatpush.bf16.msrb.mxu3 %v2662_v43 }
 0x1d7   :  { %1154 = vmatpush.bf16.msrb.mxu0 %v2664_v44  ;;  %1167 = vmatpush.bf16.msrb.mxu1 %v2676_v51 }
 0x1d8   :  { %1180 = vmatpush.bf16.msrb.mxu2 %v2711_v4  ;;  %1193 = vmatpush.bf16.msrb.mxu3 %v2707_v2 }
 0x1db   :  { %1155 = vmatpush.bf16.msrb.mxu0 %v2709_v3  ;;  %1168 = vmatpush.bf16.msrb.mxu1 %v2720_v10 }
 0x1dc   :  { %1181 = vmatpush.bf16.msrb.mxu2 %v2729_v14  ;;  %1194 = vmatpush.bf16.msrb.mxu3 %v2733_v15 }
 0x23a   :  { %v889_v6 = vpop.f32.mrf.mxu0  ;;  %v902_v0 = vpop.f32.mrf.mxu1 }
 0x23b   :  { %v932_v54 = vadd.f32 %v889_v6, %v2832_v57  ;;  %v933_v23 = vadd.f32 %v902_v0, %v2834_v62 }
 0x23d   :  { %v1974_v58 = vmul.f32 -1.442695, %v932_v54  ;;  %v1975_v31 = vmul.f32 -1.442695, %v933_v23 }
 0x23f   :  { %2119 = vpow2.f32 %v1974_v58 }
 0x240   :  { %2121 = vpow2.f32 %v1975_v31 }
 0x241   :  { %v915_v38 = vpop.f32.mrf.mxu2  ;;  %v928_v40 = vpop.f32.mrf.mxu3 }
 0x242   :  { %v935_v27 = vadd.f32 %v928_v40, %v2840_v11  ;;  %v891_v28 = vpop.f32.mrf.mxu0  ;;  %v904_v17 = vpop.f32.mrf.mxu1  ;;  %v934_v45 = vadd.f32 %v915_v38, %v3218_v55 }
 0x244   :  { %v1976_v56 = vmul.f32 -1.442695, %v935_v27 }
 0x245   :  { %v2120_v5 = vpop.eup %2119 }
 0x246   :  { %v2122_v42 = vpop.eup %2121  ;;  %v939_v46 = vadd.f32 1.0, %v2120_v5  ;;  %2123 = vpow2.f32 %v1976_v56 }
 0x247   :  { %v958_v30 = vadd.f32 1.0, %v2122_v42 }
 0x248   :  { %2125 = vrcp.f32 %v939_v46  ;;  %v951_v63 = vand.u32 2147483648, %v939_v46  ;;  %v949_v54 = vand.u32 2147483647, %v939_v46  ;;  %vm945_vm13 = vweird.f32 %v939_v46 }
 0x249   :  { %2127 = vrcp.f32 %v958_v30  ;;  %v917_v57 = vpop.f32.mrf.mxu2  ;;  %v930_v62 = vpop.f32.mrf.mxu3  ;;  %v970_v6 = vand.u32 2147483648, %v958_v30  ;;  %v968_v58 = vand.u32 2147483647, %v958_v30  ;;  %vm964_vm14 = vweird.f32 %v958_v30 }
 0x24a   :  { %v952_v38 = vor.u32 1.1754944e-38, %v951_v63  ;;  %vm950_vm1 = vcmp.eq.f32.partialorder %v949_v54, 8.507059e+37 }
 0x24b   :  { %v971_v17 = vor.u32 1.1754944e-38, %v970_v6  ;;  %vm969_vm2 = vcmp.eq.f32.partialorder %v968_v58, 8.507059e+37 }
 0x24c   :  { %v2124_v39 = vpop.eup %2123 }
 0x24d   :  { %v978_v16 = vadd.f32 1.0, %v2124_v39 }
 0x24e   :  { %v2126_v12 = vpop.eup %2125 }
 0x24f   :  { %v2128_v19 = vpop.eup %2127  ;;  %v941_v25 = vmul.f32 %v2126_v12, %v939_v46  ;;  %2129 = vrcp.f32 %v978_v16  ;;  %vm946_vm11 = vweird.f32 %v2126_v12  ;;  %vm984_vm5 = vweird.f32 %v978_v16 }
 0x250   :  { %v960_v11 = vmul.f32 %v2128_v19, %v958_v30  ;;  %2131 = vtanh.f32 %v934_v45  ;;  %vm965_vm12 = vweird.f32 %v2128_v19  ;;  %vm947_vm15 = vmor %vm945_vm13, %vm946_vm11 }
 0x251   :  { %v942_v50 = vsub.f32 1.0, %v941_v25  ;;  %vm966_vm0 = vmor %vm964_vm14, %vm965_vm12 }
 0x252   :  { %v961_v18 = vsub.f32 1.0, %v960_v11  ;;  %v990_v11 = vand.u32 2147483648, %v978_v16 }
 0x253   :  { %v943_v0 = vmul.f32 %v2126_v12, %v942_v50  ;;  %v988_v50 = vand.u32 2147483647, %v978_v16 }
 0x254   :  { %v962_v23 = vmul.f32 %v2128_v19, %v961_v18  ;;  %v991_v18 = vor.u32 1.1754944e-38, %v990_v11 }
 0x255   :  { %v2130_v31 = vpop.eup %2129  ;;  %v944_v40 = vadd.f32 %v2126_v12, %v943_v0  ;;  %vm989_vm7 = vcmp.eq.f32.partialorder %v988_v50, 8.507059e+37 }
 0x256   :  { %v963_v27 = vadd.f32 %v2128_v19, %v962_v23  ;;  %v980_v28 = vmul.f32 %v2130_v31, %v978_v16  ;;  %v2132_v5 = vpop.eup %2131  ;;  %vm985_vm3 = vweird.f32 %v2130_v31  ;;  %v3219_v16 = vld [vmem:[#allocation6_spill] sm:$0xff] }
 0x257   :  { %v948_v56 = vsel %vm947_vm15, %v2126_v12, %v944_v40  ;;  %vm986_vm6 = vmor %vm984_vm5, %vm985_vm3 }
 0x258   :  { %v953_v42 = vsel %vm950_vm1, %v952_v38, %v948_v56  ;;  %v967_v57 = vsel %vm966_vm0, %v2128_v19, %v963_v27  ;;  %v981_v62 = vsub.f32 1.0, %v980_v28  ;;  %v3220_v38 = vld [vmem:[#allocation7_spill] sm:$0xff]  ;;  %vm1982_vm1 = vcmp.gt.s32.totalorder %v2896_v24, 3 }
 0x259   :  { %v972_v39 = vsel %vm969_vm2, %v971_v17, %v967_v57  ;;  %v995_v55 = vmul.f32 %v2132_v5, %v953_v42  ;;  %v3221_v42 = vld [vmem:[#allocation9_spill] sm:$0xff] }
 0x25a   :  { %v994_v45 = vmul.f32 %v972_v39, %v2954_v29  ;;  %v982_v25 = vmul.f32 %v2130_v31, %v981_v62 }
 0x25c   :  { %v996_v46 = vadd.f32 %v995_v55, %v994_v45  ;;  %v983_v30 = vadd.f32 %v2130_v31, %v982_v25 }
 0x25e   :  { %2133 = vtanh.f32 %v996_v46  ;;  %v3003_v12 = vsel %vm1977_vm4, %v996_v46, %v2954_v29  ;;  %v987_v19 = vsel %vm986_vm6, %v2130_v31, %v983_v30 }
 0x25f   :  { %v992_v6 = vsel %vm989_vm7, %v991_v18, %v987_v19 }
 0x264   :  { %v2134_v63 = vpop.eup %2133 }
 0x265   :  { %v998_v0 = vmul.f32 %v2134_v63, %v992_v6  ;;  %v3222_v6 = vld [vmem:[#allocation8_spill] sm:$0xff] }
 0x267   :  { %v3006_v54 = vsel %vm1977_vm4, %v998_v0, %v2957_v36  ;;  %v1004_v23 = vsel %vm1977_vm4, %v998_v0, 0.0 }
 0x268   :  { %v1005_v58 = vpack.c.bf16 %v1004_v23, %v1004_v23  ;;  %v1013_v40 = vpack.c.bf16 %v3006_v54, %v3006_v54 }
 0x26a   :  { %1978 = vst [vmem:[%s3195_s5 + $0x8] sm:$0xf] %v1005_v58  ;;  %1022 = vmatmul.bf16.vlgmr.msra.gmra.mxu0 %v1013_v40  ;;  %1035 = vmatmul.bf16.vlgmr.msra.gmra.mxu1 %v1013_v40 }
 0x26b   :  { %1048 = vmatmul.bf16.vlgmr.msra.gmra.mxu2 %v1013_v40  ;;  %1061 = vmatmul.bf16.vlgmr.msra.gmra.mxu3 %v1013_v40 }
 0x26c   :  { %1282 = vmatpush.bf16.msra.mxu0 %v2459_v37  ;;  %1295 = vmatpush.bf16.msra.mxu1 %v2470_v41 }
 0x26d   :  { %1308 = vmatpush.bf16.msra.mxu2 %v2487_v47  ;;  %1321 = vmatpush.bf16.msra.mxu3 %v2490_v48 }
 0x270   :  { %1283 = vmatpush.bf16.msra.mxu0 %v2492_v49  ;;  %1296 = vmatpush.bf16.msra.mxu1 %v2504_v53 }
 0x271   :  { %1309 = vmatpush.bf16.msra.mxu2 %v2522_v59  ;;  %1322 = vmatpush.bf16.msra.mxu3 %v2526_v60 }
 0x274   :  { %1284 = vmatpush.bf16.msra.mxu0 %v2528_v61  ;;  %1297 = vmatpush.bf16.msra.mxu1 %v2540_v1 }
 0x275   :  { %1310 = vmatpush.bf16.msra.mxu2 %v2558_v7  ;;  %1323 = vmatpush.bf16.msra.mxu3 %v2562_v8 }
 0x278   :  { %1285 = vmatpush.bf16.msra.mxu0 %v2564_v9  ;;  %1298 = vmatpush.bf16.msra.mxu1 %v2576_v13 }
 0x279   :  { %1311 = vmatpush.bf16.msra.mxu2 %v2597_v20  ;;  %1324 = vmatpush.bf16.msra.mxu3 %v2601_v21 }
 0x27c   :  { %1286 = vmatpush.bf16.msra.mxu0 %v2603_v22  ;;  %1299 = vmatpush.bf16.msra.mxu1 %v2615_v26 }
 0x27d   :  { %1312 = vmatpush.bf16.msra.mxu2 %v2633_v32  ;;  %1325 = vmatpush.bf16.msra.mxu3 %v2637_v33 }
 0x280   :  { %1287 = vmatpush.bf16.msra.mxu0 %v2639_v34  ;;  %1300 = vmatpush.bf16.msra.mxu1 %v2642_v35 }
 0x281   :  { %1313 = vmatpush.bf16.msra.mxu2 %v2678_v52  ;;  %1326 = vmatpush.bf16.msra.mxu3 %v2662_v43 }
 0x284   :  { %1288 = vmatpush.bf16.msra.mxu0 %v2664_v44  ;;  %1301 = vmatpush.bf16.msra.mxu1 %v2676_v51 }
 0x285   :  { %1314 = vmatpush.bf16.msra.mxu2 %v2711_v4  ;;  %1327 = vmatpush.bf16.msra.mxu3 %v2707_v2 }
 0x288   :  { %1289 = vmatpush.bf16.msra.mxu0 %v2709_v3  ;;  %1302 = vmatpush.bf16.msra.mxu1 %v2720_v10 }
 0x289   :  { %1315 = vmatpush.bf16.msra.mxu2 %v2729_v14  ;;  %1328 = vmatpush.bf16.msra.mxu3 %v2733_v15 }
 0x2e7   :  { %v1023_v29 = vpop.f32.mrf.mxu0  ;;  %v1036_v36 = vpop.f32.mrf.mxu1 }
 0x2e8   :  { %v1066_v31 = vadd.f32 %v1023_v29, %v3219_v16  ;;  %v1067_v27 = vadd.f32 %v1036_v36, %v3220_v38 }
 0x2ea   :  { %v1979_v28 = vmul.f32 -1.442695, %v1066_v31  ;;  %v1980_v17 = vmul.f32 -1.442695, %v1067_v27 }
 0x2ec   :  { %2135 = vpow2.f32 %v1979_v28 }
 0x2ed   :  { %2137 = vpow2.f32 %v1980_v17 }
 0x2ee   :  { %v1049_v56 = vpop.f32.mrf.mxu2  ;;  %v1062_v5 = vpop.f32.mrf.mxu3 }
 0x2ef   :  { %v1069_v57 = vadd.f32 %v1062_v5, %v3221_v42  ;;  %v1025_v62 = vpop.f32.mrf.mxu0  ;;  %v1038_v39 = vpop.f32.mrf.mxu1  ;;  %v1068_v0 = vadd.f32 %v1049_v56, %v3222_v6 }
 0x2f1   :  { %v1981_v55 = vmul.f32 -1.442695, %v1069_v57 }
 0x2f2   :  { %v2136_v45 = vpop.eup %2135 }
 0x2f3   :  { %v2138_v25 = vpop.eup %2137  ;;  %v1073_v46 = vadd.f32 1.0, %v2136_v45  ;;  %2139 = vpow2.f32 %v1981_v55 }
 0x2f4   :  { %v1092_v30 = vadd.f32 1.0, %v2138_v25 }
 0x2f5   :  { %2141 = vrcp.f32 %v1073_v46  ;;  %v1085_v16 = vand.u32 2147483648, %v1073_v46  ;;  %v1083_v27 = vand.u32 2147483647, %v1073_v46  ;;  %vm1079_vm10 = vweird.f32 %v1073_v46 }
 0x2f6   :  { %2143 = vrcp.f32 %v1092_v30  ;;  %v1051_v11 = vpop.f32.mrf.mxu2  ;;  %v1064_v50 = vpop.f32.mrf.mxu3  ;;  %v1104_v31 = vand.u32 2147483648, %v1092_v30  ;;  %v1102_v17 = vand.u32 2147483647, %v1092_v30  ;;  %vm1098_vm11 = vweird.f32 %v1092_v30 }
 0x2f7   :  { %v1086_v56 = vor.u32 1.1754944e-38, %v1085_v16  ;;  %vm1084_vm14 = vcmp.eq.f32.partialorder %v1083_v27, 8.507059e+37 }
 0x2f8   :  { %v1105_v39 = vor.u32 1.1754944e-38, %v1104_v31  ;;  %vm1103_vm15 = vcmp.eq.f32.partialorder %v1102_v17, 8.507059e+37 }
 0x2f9   :  { %v2140_v19 = vpop.eup %2139 }
 0x2fa   :  { %v1112_v18 = vadd.f32 1.0, %v2140_v19 }
 0x2fb   :  { %v2142_v63 = vpop.eup %2141 }
 0x2fc   :  { %v2144_v23 = vpop.eup %2143  ;;  %v1075_v58 = vmul.f32 %v2142_v63, %v1073_v46  ;;  %2145 = vrcp.f32 %v1112_v18  ;;  %vm1080_vm8 = vweird.f32 %v2142_v63  ;;  %vm1118_vm2 = vweird.f32 %v1112_v18 }
 0x2fd   :  { %v1094_v40 = vmul.f32 %v2144_v23, %v1092_v30  ;;  %2147 = vtanh.f32 %v1068_v0  ;;  %vm1099_vm9 = vweird.f32 %v2144_v23  ;;  %vm1081_vm12 = vmor %vm1079_vm10, %vm1080_vm8 }
 0x2fe   :  { %v1076_v29 = vsub.f32 1.0, %v1075_v58  ;;  %vm1100_vm13 = vmor %vm1098_vm11, %vm1099_vm9 }
 0x2ff   :  { %v1095_v36 = vsub.f32 1.0, %v1094_v40  ;;  %v1124_v40 = vand.u32 2147483648, %v1112_v18 }
 0x300   :  { %v1077_v38 = vmul.f32 %v2142_v63, %v1076_v29  ;;  %v1122_v29 = vand.u32 2147483647, %v1112_v18 }
 0x301   :  { %v1096_v28 = vmul.f32 %v2144_v23, %v1095_v36  ;;  %v1125_v36 = vor.u32 1.1754944e-38, %v1124_v40 }
 0x302   :  { %v2146_v5 = vpop.eup %2145  ;;  %v1078_v42 = vadd.f32 %v2142_v63, %v1077_v38  ;;  %vm1123_vm4 = vcmp.eq.f32.partialorder %v1122_v29, 8.507059e+37 }
 0x303   :  { %v1097_v57 = vadd.f32 %v2144_v23, %v1096_v28  ;;  %v1114_v62 = vmul.f32 %v2146_v5, %v1112_v18  ;;  %v2148_v45 = vpop.eup %2147  ;;  %vm1119_vm0 = vweird.f32 %v2146_v5  ;;  %v3223_v18 = vld [vmem:[#allocation10_spill] sm:$0xff] }
 0x304   :  { %v1082_v55 = vsel %vm1081_vm12, %v2142_v63, %v1078_v42  ;;  %vm1120_vm3 = vmor %vm1118_vm2, %vm1119_vm0 }
 0x305   :  { %v1087_v25 = vsel %vm1084_vm14, %v1086_v56, %v1082_v55  ;;  %v1101_v11 = vsel %vm1100_vm13, %v2144_v23, %v1097_v57  ;;  %v1115_v50 = vsub.f32 1.0, %v1114_v62  ;;  %v3224_v56 = vld [vmem:[#allocation11_spill] sm:$0xff]  ;;  %vm1987_vm14 = vcmp.gt.s32.totalorder %v2896_v24, 4 }
 0x306   :  { %v1106_v19 = vsel %vm1103_vm15, %v1105_v39, %v1101_v11  ;;  %v1129_v6 = vmul.f32 %v2148_v45, %v1087_v25  ;;  %v3225_v25 = vld [vmem:[#allocation13_spill] sm:$0xff] }
 0x307   :  { %v1128_v0 = vmul.f32 %v1106_v19, %v3003_v12  ;;  %v1116_v58 = vmul.f32 %v2146_v5, %v1115_v50 }
 0x309   :  { %v1130_v46 = vadd.f32 %v1129_v6, %v1128_v0  ;;  %v1117_v30 = vadd.f32 %v2146_v5, %v1116_v58 }
 0x30b   :  { %2149 = vtanh.f32 %v1130_v46  ;;  %v3052_v63 = vsel %vm1982_vm1, %v1130_v46, %v3003_v12  ;;  %v1121_v23 = vsel %vm1120_vm3, %v2146_v5, %v1117_v30 }
 0x30c   :  { %v1126_v31 = vsel %vm1123_vm4, %v1125_v36, %v1121_v23 }
 0x311   :  { %v2150_v16 = vpop.eup %2149 }
 0x312   :  { %v1132_v38 = vmul.f32 %v2150_v16, %v1126_v31  ;;  %v3226_v31 = vld [vmem:[#allocation12_spill] sm:$0xff] }
 0x314   :  { %v3055_v27 = vsel %vm1982_vm1, %v1132_v38, %v3006_v54  ;;  %v1138_v28 = vsel %vm1982_vm1, %v1132_v38, 0.0 }
 0x315   :  { %v1139_v17 = vpack.c.bf16 %v1138_v28, %v1138_v28  ;;  %v1147_v42 = vpack.c.bf16 %v3055_v27, %v3055_v27 }
 0x317   :  { %1983 = vst [vmem:[%s3195_s5 + $0xc] sm:$0xf] %v1139_v17  ;;  %1156 = vmatmul.bf16.vlgmr.msrb.gmra.mxu0 %v1147_v42  ;;  %1169 = vmatmul.bf16.vlgmr.msrb.gmra.mxu1 %v1147_v42 }
 0x318   :  { %1182 = vmatmul.bf16.vlgmr.msrb.gmra.mxu2 %v1147_v42  ;;  %1195 = vmatmul.bf16.vlgmr.msrb.gmra.mxu3 %v1147_v42 }
 0x319   :  { %1416 = vmatpush.bf16.msrb.mxu0 %v2459_v37  ;;  %1429 = vmatpush.bf16.msrb.mxu1 %v2470_v41 }
 0x31a   :  { %1442 = vmatpush.bf16.msrb.mxu2 %v2487_v47  ;;  %1455 = vmatpush.bf16.msrb.mxu3 %v2490_v48 }
 0x31d   :  { %1417 = vmatpush.bf16.msrb.mxu0 %v2492_v49  ;;  %1430 = vmatpush.bf16.msrb.mxu1 %v2504_v53 }
 0x31e   :  { %1443 = vmatpush.bf16.msrb.mxu2 %v2522_v59  ;;  %1456 = vmatpush.bf16.msrb.mxu3 %v2526_v60 }
 0x321   :  { %1418 = vmatpush.bf16.msrb.mxu0 %v2528_v61  ;;  %1431 = vmatpush.bf16.msrb.mxu1 %v2540_v1 }
 0x322   :  { %1444 = vmatpush.bf16.msrb.mxu2 %v2558_v7  ;;  %1457 = vmatpush.bf16.msrb.mxu3 %v2562_v8 }
 0x325   :  { %1419 = vmatpush.bf16.msrb.mxu0 %v2564_v9  ;;  %1432 = vmatpush.bf16.msrb.mxu1 %v2576_v13 }
 0x326   :  { %1445 = vmatpush.bf16.msrb.mxu2 %v2597_v20  ;;  %1458 = vmatpush.bf16.msrb.mxu3 %v2601_v21 }
 0x329   :  { %1420 = vmatpush.bf16.msrb.mxu0 %v2603_v22  ;;  %1433 = vmatpush.bf16.msrb.mxu1 %v2615_v26 }
 0x32a   :  { %1446 = vmatpush.bf16.msrb.mxu2 %v2633_v32  ;;  %1459 = vmatpush.bf16.msrb.mxu3 %v2637_v33 }
 0x32d   :  { %1421 = vmatpush.bf16.msrb.mxu0 %v2639_v34  ;;  %1434 = vmatpush.bf16.msrb.mxu1 %v2642_v35 }
 0x32e   :  { %1447 = vmatpush.bf16.msrb.mxu2 %v2678_v52  ;;  %1460 = vmatpush.bf16.msrb.mxu3 %v2662_v43 }
 0x331   :  { %1422 = vmatpush.bf16.msrb.mxu0 %v2664_v44  ;;  %1435 = vmatpush.bf16.msrb.mxu1 %v2676_v51 }
 0x332   :  { %1448 = vmatpush.bf16.msrb.mxu2 %v2711_v4  ;;  %1461 = vmatpush.bf16.msrb.mxu3 %v2707_v2 }
 0x335   :  { %1423 = vmatpush.bf16.msrb.mxu0 %v2709_v3  ;;  %1436 = vmatpush.bf16.msrb.mxu1 %v2720_v10 }
 0x336   :  { %1449 = vmatpush.bf16.msrb.mxu2 %v2729_v14  ;;  %1462 = vmatpush.bf16.msrb.mxu3 %v2733_v15 }
 0x394   :  { %v1157_v12 = vpop.f32.mrf.mxu0  ;;  %v1170_v54 = vpop.f32.mrf.mxu1 }
 0x395   :  { %v1200_v5 = vadd.f32 %v1157_v12, %v3223_v18  ;;  %v1201_v57 = vadd.f32 %v1170_v54, %v3224_v56 }
 0x397   :  { %v1984_v62 = vmul.f32 -1.442695, %v1200_v5  ;;  %v1985_v39 = vmul.f32 -1.442695, %v1201_v57 }
 0x399   :  { %2151 = vpow2.f32 %v1984_v62 }
 0x39a   :  { %2153 = vpow2.f32 %v1985_v39 }
 0x39b   :  { %v1183_v55 = vpop.f32.mrf.mxu2  ;;  %v1196_v45 = vpop.f32.mrf.mxu3 }
 0x39c   :  { %v1203_v11 = vadd.f32 %v1196_v45, %v3225_v25  ;;  %v1159_v50 = vpop.f32.mrf.mxu0  ;;  %v1172_v19 = vpop.f32.mrf.mxu1  ;;  %v1202_v38 = vadd.f32 %v1183_v55, %v3226_v31 }
 0x39e   :  { %v1986_v6 = vmul.f32 -1.442695, %v1203_v11 }
 0x39f   :  { %v2152_v0 = vpop.eup %2151 }
 0x3a0   :  { %v2154_v58 = vpop.eup %2153  ;;  %v1207_v46 = vadd.f32 1.0, %v2152_v0  ;;  %2155 = vpow2.f32 %v1986_v6 }
 0x3a1   :  { %v1226_v30 = vadd.f32 1.0, %v2154_v58 }
 0x3a2   :  { %2157 = vrcp.f32 %v1207_v46  ;;  %v1219_v18 = vand.u32 2147483648, %v1207_v46  ;;  %v1217_v57 = vand.u32 2147483647, %v1207_v46  ;;  %vm1213_vm7 = vweird.f32 %v1207_v46 }
 0x3a3   :  { %2159 = vrcp.f32 %v1226_v30  ;;  %v1185_v40 = vpop.f32.mrf.mxu2  ;;  %v1198_v29 = vpop.f32.mrf.mxu3  ;;  %v1238_v5 = vand.u32 2147483648, %v1226_v30  ;;  %v1236_v39 = vand.u32 2147483647, %v1226_v30  ;;  %vm1232_vm8 = vweird.f32 %v1226_v30 }
 0x3a4   :  { %v1220_v55 = vor.u32 1.1754944e-38, %v1219_v18  ;;  %vm1218_vm11 = vcmp.eq.f32.partialorder %v1217_v57, 8.507059e+37 }
 0x3a5   :  { %v1239_v19 = vor.u32 1.1754944e-38, %v1238_v5  ;;  %vm1237_vm12 = vcmp.eq.f32.partialorder %v1236_v39, 8.507059e+37 }
 0x3a6   :  { %v2156_v23 = vpop.eup %2155 }
 0x3a7   :  { %v1246_v36 = vadd.f32 1.0, %v2156_v23 }
 0x3a8   :  { %v2158_v16 = vpop.eup %2157 }
 0x3a9   :  { %v2160_v28 = vpop.eup %2159  ;;  %v1209_v17 = vmul.f32 %v2158_v16, %v1207_v46  ;;  %2161 = vrcp.f32 %v1246_v36  ;;  %vm1214_vm5 = vweird.f32 %v2158_v16  ;;  %vm1252_vm15 = vweird.f32 %v1246_v36 }
 0x3aa   :  { %v1228_v42 = vmul.f32 %v2160_v28, %v1226_v30  ;;  %2163 = vtanh.f32 %v1202_v38  ;;  %vm1233_vm6 = vweird.f32 %v2160_v28  ;;  %vm1215_vm9 = vmor %vm1213_vm7, %vm1214_vm5 }
 0x3ab   :  { %v1210_v12 = vsub.f32 1.0, %v1209_v17  ;;  %vm1234_vm10 = vmor %vm1232_vm8, %vm1233_vm6 }
 0x3ac   :  { %v1229_v54 = vsub.f32 1.0, %v1228_v42  ;;  %v1258_v42 = vand.u32 2147483648, %v1246_v36 }
 0x3ad   :  { %v1211_v56 = vmul.f32 %v2158_v16, %v1210_v12  ;;  %v1256_v12 = vand.u32 2147483647, %v1246_v36 }
 0x3ae   :  { %v1230_v62 = vmul.f32 %v2160_v28, %v1229_v54  ;;  %v1259_v54 = vor.u32 1.1754944e-38, %v1258_v42 }
 0x3af   :  { %v2162_v45 = vpop.eup %2161  ;;  %v1212_v25 = vadd.f32 %v2158_v16, %v1211_v56  ;;  %vm1257_vm1 = vcmp.eq.f32.partialorder %v1256_v12, 8.507059e+37 }
 0x3b0   :  { %v1231_v11 = vadd.f32 %v2160_v28, %v1230_v62  ;;  %v1248_v50 = vmul.f32 %v2162_v45, %v1246_v36  ;;  %v2164_v0 = vpop.eup %2163  ;;  %vm1253_vm13 = vweird.f32 %v2162_v45 }
 0x3b1   :  { %v1216_v6 = vsel %vm1215_vm9, %v2158_v16, %v1212_v25  ;;  %vm1254_vm0 = vmor %vm1252_vm15, %vm1253_vm13 }
 0x3b2   :  { %v1221_v58 = vsel %vm1218_vm11, %v1220_v55, %v1216_v6  ;;  %v1235_v40 = vsel %vm1234_vm10, %v2160_v28, %v1231_v11  ;;  %v1249_v29 = vsub.f32 1.0, %v1248_v50  ;;  %vm1992_vm11 = vcmp.gt.s32.totalorder %v2896_v24, 5 }
 0x3b3   :  { %v1240_v23 = vsel %vm1237_vm12, %v1239_v19, %v1235_v40  ;;  %v1263_v31 = vmul.f32 %v2164_v0, %v1221_v58 }
 0x3b4   :  { %v1262_v38 = vmul.f32 %v1240_v23, %v3052_v63  ;;  %v1250_v17 = vmul.f32 %v2162_v45, %v1249_v29 }
 0x3b6   :  { %v1264_v46 = vadd.f32 %v1263_v31, %v1262_v38  ;;  %v1251_v30 = vadd.f32 %v2162_v45, %v1250_v17 }
 0x3b8   :  { %2165 = vtanh.f32 %v1264_v46  ;;  %v3101_v16 = vsel %vm1987_vm14, %v1264_v46, %v3052_v63  ;;  %v1255_v28 = vsel %vm1254_vm0, %v2162_v45, %v1251_v30 }
 0x3b9   :  { %v1260_v5 = vsel %vm1257_vm1, %v1259_v54, %v1255_v28 }
 0x3be   :  { %v2166_v18 = vpop.eup %2165 }
 0x3bf   :  { %v1266_v56 = vmul.f32 %v2166_v18, %v1260_v5 }
 0x3c1   :  { %v3104_v57 = vsel %vm1987_vm14, %v1266_v56, %v3055_v27  ;;  %v1272_v62 = vsel %vm1987_vm14, %v1266_v56, 0.0 }
 0x3c2   :  { %v1273_v39 = vpack.c.bf16 %v1272_v62, %v1272_v62  ;;  %v1281_v25 = vpack.c.bf16 %v3104_v57, %v3104_v57 }
 0x3c4   :  { %1988 = vst [vmem:[%s3195_s5 + $0x10] sm:$0xf] %v1273_v39  ;;  %1290 = vmatmul.bf16.vlgmr.msra.gmra.mxu0 %v1281_v25  ;;  %1303 = vmatmul.bf16.vlgmr.msra.gmra.mxu1 %v1281_v25 }
 0x3c5   :  { %1316 = vmatmul.bf16.vlgmr.msra.gmra.mxu2 %v1281_v25  ;;  %1329 = vmatmul.bf16.vlgmr.msra.gmra.mxu3 %v1281_v25 }
 0x3c6   :  { %1550 = vmatpush.bf16.msra.mxu0 %v2459_v37  ;;  %1563 = vmatpush.bf16.msra.mxu1 %v2470_v41 }
 0x3c7   :  { %1576 = vmatpush.bf16.msra.mxu2 %v2487_v47  ;;  %1589 = vmatpush.bf16.msra.mxu3 %v2490_v48  ;;  %v3227_v47 = vld [vmem:[#allocation14_spill] sm:$0xff] }
 0x3ca   :  { %1551 = vmatpush.bf16.msra.mxu0 %v2492_v49  ;;  %1564 = vmatpush.bf16.msra.mxu1 %v2504_v53  ;;  %v3228_v49 = vld [vmem:[#allocation15_spill] sm:$0xff] }
 0x3cb   :  { %1577 = vmatpush.bf16.msra.mxu2 %v2522_v59  ;;  %1590 = vmatpush.bf16.msra.mxu3 %v2526_v60 }
 0x3ce   :  { %1552 = vmatpush.bf16.msra.mxu0 %v2528_v61  ;;  %1565 = vmatpush.bf16.msra.mxu1 %v2540_v1 }
 0x3cf   :  { %1578 = vmatpush.bf16.msra.mxu2 %v2558_v7  ;;  %1591 = vmatpush.bf16.msra.mxu3 %v2562_v8  ;;  %v3229_v7 = vld [vmem:[#allocation17_spill] sm:$0xff] }
 0x3d2   :  { %1553 = vmatpush.bf16.msra.mxu0 %v2564_v9  ;;  %1566 = vmatpush.bf16.msra.mxu1 %v2576_v13 }
 0x3d3   :  { %1579 = vmatpush.bf16.msra.mxu2 %v2597_v20  ;;  %1592 = vmatpush.bf16.msra.mxu3 %v2601_v21 }
 0x3d6   :  { %1554 = vmatpush.bf16.msra.mxu0 %v2603_v22  ;;  %1567 = vmatpush.bf16.msra.mxu1 %v2615_v26 }
 0x3d7   :  { %1580 = vmatpush.bf16.msra.mxu2 %v2633_v32  ;;  %1593 = vmatpush.bf16.msra.mxu3 %v2637_v33 }
 0x3da   :  { %1555 = vmatpush.bf16.msra.mxu0 %v2639_v34  ;;  %1568 = vmatpush.bf16.msra.mxu1 %v2642_v35 }
 0x3db   :  { %1581 = vmatpush.bf16.msra.mxu2 %v2678_v52  ;;  %1594 = vmatpush.bf16.msra.mxu3 %v2662_v43 }
 0x3de   :  { %1556 = vmatpush.bf16.msra.mxu0 %v2664_v44  ;;  %1569 = vmatpush.bf16.msra.mxu1 %v2676_v51  ;;  %v3230_v51 = vld [vmem:[#allocation16_spill] sm:$0xff] }
 0x3df   :  { %1582 = vmatpush.bf16.msra.mxu2 %v2711_v4  ;;  %1595 = vmatpush.bf16.msra.mxu3 %v2707_v2 }
 0x3e2   :  { %1557 = vmatpush.bf16.msra.mxu0 %v2709_v3  ;;  %1570 = vmatpush.bf16.msra.mxu1 %v2720_v10 }
 0x3e3   :  { %1583 = vmatpush.bf16.msra.mxu2 %v2729_v14  ;;  %1596 = vmatpush.bf16.msra.mxu3 %v2733_v15 }
 0x441   :  { %v1291_v37 = vpop.f32.mrf.mxu0  ;;  %v1304_v41 = vpop.f32.mrf.mxu1 }
 0x442   :  { %v1334_v48 = vadd.f32 %v1291_v37, %v3227_v47  ;;  %v1335_v53 = vadd.f32 %v1304_v41, %v3228_v49 }
 0x444   :  { %v1989_v59 = vmul.f32 -1.442695, %v1334_v48  ;;  %v1990_v60 = vmul.f32 -1.442695, %v1335_v53 }
 0x446   :  { %2167 = vpow2.f32 %v1989_v59  ;;  %v3231_v59 = vld [vmem:[#allocation18_spill] sm:$0xff] }
 0x447   :  { %2169 = vpow2.f32 %v1990_v60 }
 0x448   :  { %v1317_v61 = vpop.f32.mrf.mxu2  ;;  %v1330_v1 = vpop.f32.mrf.mxu3 }
 0x449   :  { %v1337_v8 = vadd.f32 %v1330_v1, %v3229_v7  ;;  %v1293_v9 = vpop.f32.mrf.mxu0  ;;  %v1306_v13 = vpop.f32.mrf.mxu1  ;;  %v1336_v52 = vadd.f32 %v1317_v61, %v3230_v51  ;;  %v3232_v61 = vld [vmem:[#allocation19_spill] sm:$0xff] }
 0x44a   :  { %v3233_v13 = vld [vmem:[#allocation21_spill] sm:$0xff] }
 0x44b   :  { %v1991_v20 = vmul.f32 -1.442695, %v1337_v8 }
 0x44c   :  { %v2168_v21 = vpop.eup %2167 }
 0x44d   :  { %v2170_v22 = vpop.eup %2169  ;;  %v1341_v26 = vadd.f32 1.0, %v2168_v21  ;;  %2171 = vpow2.f32 %v1991_v20 }
 0x44e   :  { %v1360_v32 = vadd.f32 1.0, %v2170_v22 }
 0x44f   :  { %2173 = vrcp.f32 %v1341_v26  ;;  %v1353_v15 = vand.u32 2147483648, %v1341_v26  ;;  %v1351_v36 = vand.u32 2147483647, %v1341_v26  ;;  %vm1347_vm4 = vweird.f32 %v1341_v26 }
 0x450   :  { %2175 = vrcp.f32 %v1360_v32  ;;  %v1319_v33 = vpop.f32.mrf.mxu2  ;;  %v1332_v34 = vpop.f32.mrf.mxu3  ;;  %v1372_v63 = vand.u32 2147483648, %v1360_v32  ;;  %v1370_v55 = vand.u32 2147483647, %v1360_v32  ;;  %vm1366_vm5 = vweird.f32 %v1360_v32 }
 0x451   :  { %v1354_v19 = vor.u32 1.1754944e-38, %v1353_v15  ;;  %vm1352_vm8 = vcmp.eq.f32.partialorder %v1351_v36, 8.507059e+37 }
 0x452   :  { %v1373_v58 = vor.u32 1.1754944e-38, %v1372_v63  ;;  %vm1371_vm9 = vcmp.eq.f32.partialorder %v1370_v55, 8.507059e+37 }
 0x453   :  { %v2172_v35 = vpop.eup %2171 }
 0x454   :  { %v1380_v43 = vadd.f32 1.0, %v2172_v35 }
 0x455   :  { %v2174_v44 = vpop.eup %2173 }
 0x456   :  { %v2176_v2 = vpop.eup %2175  ;;  %v1343_v3 = vmul.f32 %v2174_v44, %v1341_v26  ;;  %2177 = vrcp.f32 %v1380_v43  ;;  %vm1348_vm2 = vweird.f32 %v2174_v44  ;;  %v1392_v54 = vand.u32 2147483648, %v1380_v43 }
 0x457   :  { %v1362_v4 = vmul.f32 %v2176_v2, %v1360_v32  ;;  %2179 = vtanh.f32 %v1336_v52  ;;  %vm1367_vm3 = vweird.f32 %v2176_v2  ;;  %vm1349_vm6 = vmor %vm1347_vm4, %vm1348_vm2  ;;  %vm1386_vm12 = vweird.f32 %v1380_v43 }
 0x458   :  { %v1344_v10 = vsub.f32 1.0, %v1343_v3  ;;  %vm1368_vm7 = vmor %vm1366_vm5, %vm1367_vm3  ;;  %v1390_v5 = vand.u32 2147483647, %v1380_v43  ;;  %v1393_v62 = vor.u32 1.1754944e-38, %v1392_v54  ;;  %v3234_v3 = vld [vmem:[#allocation20_spill] sm:$0xff] }
 0x459   :  { %v1363_v14 = vsub.f32 1.0, %v1362_v4 }
 0x45a   :  { %v1345_v27 = vmul.f32 %v2174_v44, %v1344_v10  ;;  %vm1391_vm14 = vcmp.eq.f32.partialorder %v1390_v5, 8.507059e+37 }
 0x45b   :  { %v1364_v45 = vmul.f32 %v2176_v2, %v1363_v14 }
 0x45c   :  { %v2178_v11 = vpop.eup %2177  ;;  %v1346_v50 = vadd.f32 %v2174_v44, %v1345_v27 }
 0x45d   :  { %v1365_v6 = vadd.f32 %v2176_v2, %v1364_v45  ;;  %v1382_v0 = vmul.f32 %v2178_v11, %v1380_v43  ;;  %v2180_v29 = vpop.eup %2179  ;;  %vm1387_vm10 = vweird.f32 %v2178_v11 }
 0x45e   :  { %v1350_v40 = vsel %vm1349_vm6, %v2174_v44, %v1346_v50  ;;  %vm1388_vm13 = vmor %vm1386_vm12, %vm1387_vm10 }
 0x45f   :  { %v1355_v23 = vsel %vm1352_vm8, %v1354_v19, %v1350_v40  ;;  %v1369_v31 = vsel %vm1368_vm7, %v2176_v2, %v1365_v6  ;;  %v1383_v38 = vsub.f32 1.0, %v1382_v0  ;;  %vm1997_vm8 = vcmp.gt.s32.totalorder %v2896_v24, 6 }
 0x460   :  { %v1374_v17 = vsel %vm1371_vm9, %v1373_v58, %v1369_v31  ;;  %v1397_v46 = vmul.f32 %v2180_v29, %v1355_v23 }
 0x461   :  { %v1396_v30 = vmul.f32 %v1374_v17, %v3101_v16  ;;  %v1384_v42 = vmul.f32 %v2178_v11, %v1383_v38 }
 0x463   :  { %v1398_v12 = vadd.f32 %v1397_v46, %v1396_v30  ;;  %v1385_v28 = vadd.f32 %v2178_v11, %v1384_v42 }
 0x465   :  { %2181 = vtanh.f32 %v1398_v12  ;;  %v3150_v18 = vsel %vm1992_vm11, %v1398_v12, %v3101_v16  ;;  %v1389_v56 = vsel %vm1388_vm13, %v2178_v11, %v1385_v28 }
 0x466   :  { %v1394_v25 = vsel %vm1391_vm14, %v1393_v62, %v1389_v56 }
 0x46b   :  { %v2182_v39 = vpop.eup %2181 }
 0x46c   :  { %v1400_v37 = vmul.f32 %v2182_v39, %v1394_v25 }
 0x46e   :  { %v3153_v41 = vsel %vm1992_vm11, %v1400_v37, %v3104_v57  ;;  %v1406_v47 = vsel %vm1992_vm11, %v1400_v37, 0.0 }
 0x46f   :  { %v1407_v48 = vpack.c.bf16 %v1406_v47, %v1406_v47  ;;  %v1415_v49 = vpack.c.bf16 %v3153_v41, %v3153_v41 }
 0x471   :  { %1993 = vst [vmem:[%s3195_s5 + $0x14] sm:$0xf] %v1407_v48  ;;  %1424 = vmatmul.bf16.vlgmr.msrb.gmra.mxu0 %v1415_v49  ;;  %1437 = vmatmul.bf16.vlgmr.msrb.gmra.mxu1 %v1415_v49 }
 0x472   :  { %1450 = vmatmul.bf16.vlgmr.msrb.gmra.mxu2 %v1415_v49  ;;  %1463 = vmatmul.bf16.vlgmr.msrb.gmra.mxu3 %v1415_v49 }
 0x4ee   :  { %v1425_v16 = vpop.f32.mrf.mxu0  ;;  %v1438_v53 = vpop.f32.mrf.mxu1 }
 0x4ef   :  { %v1468_v60 = vadd.f32 %v1425_v16, %v3231_v59  ;;  %v1469_v57 = vadd.f32 %v1438_v53, %v3232_v61 }
 0x4f1   :  { %v1994_v1 = vmul.f32 -1.442695, %v1468_v60  ;;  %v1995_v7 = vmul.f32 -1.442695, %v1469_v57 }
 0x4f3   :  { %2183 = vpow2.f32 %v1994_v1  ;;  %v3235_v1 = vld [vmem:[#allocation22_spill] sm:$0xff] }
 0x4f4   :  { %2185 = vpow2.f32 %v1995_v7 }
 0x4f5   :  { %v1451_v8 = vpop.f32.mrf.mxu2  ;;  %v1464_v9 = vpop.f32.mrf.mxu3 }
 0x4f6   :  { %v1471_v20 = vadd.f32 %v1464_v9, %v3233_v13  ;;  %v1427_v21 = vpop.f32.mrf.mxu0  ;;  %v1440_v22 = vpop.f32.mrf.mxu1  ;;  %v1470_v4 = vadd.f32 %v1451_v8, %v3234_v3  ;;  %v3236_v8 = vld [vmem:[#allocation23_spill] sm:$0xff] }
 0x4f7   :  { %v3237_v22 = vld [vmem:[#allocation25_spill] sm:$0xff] }
 0x4f8   :  { %v1996_v26 = vmul.f32 -1.442695, %v1471_v20 }
 0x4f9   :  { %v2184_v32 = vpop.eup %2183 }
 0x4fa   :  { %v2186_v33 = vpop.eup %2185  ;;  %v1475_v34 = vadd.f32 1.0, %v2184_v32  ;;  %2187 = vpow2.f32 %v1996_v26 }
 0x4fb   :  { %v1494_v35 = vadd.f32 1.0, %v2186_v33 }
 0x4fc   :  { %2189 = vrcp.f32 %v1475_v34  ;;  %v1487_v36 = vand.u32 2147483648, %v1475_v34  ;;  %v1485_v11 = vand.u32 2147483647, %v1475_v34  ;;  %vm1481_vm1 = vweird.f32 %v1475_v34 }
 0x4fd   :  { %2191 = vrcp.f32 %v1494_v35  ;;  %v1453_v43 = vpop.f32.mrf.mxu2  ;;  %v1466_v44 = vpop.f32.mrf.mxu3  ;;  %v1506_v45 = vand.u32 2147483648, %v1494_v35  ;;  %v1504_v19 = vand.u32 2147483647, %v1494_v35  ;;  %vm1500_vm2 = vweird.f32 %v1494_v35 }
 0x4fe   :  { %v1488_v58 = vor.u32 1.1754944e-38, %v1487_v36  ;;  %vm1486_vm5 = vcmp.eq.f32.partialorder %v1485_v11, 8.507059e+37 }
 0x4ff   :  { %v1507_v23 = vor.u32 1.1754944e-38, %v1506_v45  ;;  %vm1505_vm6 = vcmp.eq.f32.partialorder %v1504_v19, 8.507059e+37 }
 0x500   :  { %v2188_v51 = vpop.eup %2187 }
 0x501   :  { %v1514_v52 = vadd.f32 1.0, %v2188_v51 }
 0x502   :  { %v2190_v2 = vpop.eup %2189 }
 0x503   :  { %v2192_v10 = vpop.eup %2191  ;;  %v1477_v14 = vmul.f32 %v2190_v2, %v1475_v34  ;;  %2193 = vrcp.f32 %v1514_v52  ;;  %vm1482_vm15 = vweird.f32 %v2190_v2  ;;  %v1526_v62 = vand.u32 2147483648, %v1514_v52 }
 0x504   :  { %v1496_v15 = vmul.f32 %v2192_v10, %v1494_v35  ;;  %2195 = vtanh.f32 %v1470_v4  ;;  %vm1501_vm0 = vweird.f32 %v2192_v10  ;;  %vm1483_vm3 = vmor %vm1481_vm1, %vm1482_vm15  ;;  %vm1520_vm9 = vweird.f32 %v1514_v52 }
 0x505   :  { %v1478_v63 = vsub.f32 1.0, %v1477_v14  ;;  %vm1502_vm4 = vmor %vm1500_vm2, %vm1501_vm0  ;;  %v1524_v25 = vand.u32 2147483647, %v1514_v52  ;;  %v1527_v47 = vor.u32 1.1754944e-38, %v1526_v62  ;;  %v3238_v14 = vld [vmem:[#allocation24_spill] sm:$0xff] }
 0x506   :  { %v1497_v27 = vsub.f32 1.0, %v1496_v15 }
 0x507   :  { %v1479_v55 = vmul.f32 %v2190_v2, %v1478_v63  ;;  %vm1525_vm11 = vcmp.eq.f32.partialorder %v1524_v25, 8.507059e+37 }
 0x508   :  { %v1498_v50 = vmul.f32 %v2192_v10, %v1497_v27 }
 0x509   :  { %v2194_v6 = vpop.eup %2193  ;;  %v1480_v0 = vadd.f32 %v2190_v2, %v1479_v55 }
 0x50a   :  { %v1499_v40 = vadd.f32 %v2192_v10, %v1498_v50  ;;  %v1516_v29 = vmul.f32 %v2194_v6, %v1514_v52  ;;  %v2196_v38 = vpop.eup %2195  ;;  %vm1521_vm7 = vweird.f32 %v2194_v6 }
 0x50b   :  { %v1484_v31 = vsel %vm1483_vm3, %v2190_v2, %v1480_v0  ;;  %vm1522_vm10 = vmor %vm1520_vm9, %vm1521_vm7 }
 0x50c   :  { %v1489_v17 = vsel %vm1486_vm5, %v1488_v58, %v1484_v31  ;;  %v1503_v46 = vsel %vm1502_vm4, %v2192_v10, %v1499_v40  ;;  %v1517_v30 = vsub.f32 1.0, %v1516_v29 }
 0x50d   :  { %v1508_v42 = vsel %vm1505_vm6, %v1507_v23, %v1503_v46  ;;  %v1531_v12 = vmul.f32 %v2196_v38, %v1489_v17 }
 0x50e   :  { %v1530_v28 = vmul.f32 %v1508_v42, %v3150_v18  ;;  %v1518_v54 = vmul.f32 %v2194_v6, %v1517_v30 }
 0x510   :  { %v1532_v5 = vadd.f32 %v1531_v12, %v1530_v28  ;;  %v1519_v56 = vadd.f32 %v2194_v6, %v1518_v54 }
 0x512   :  { %2197 = vtanh.f32 %v1532_v5  ;;  %v3167_v39 = vsel %vm1997_vm8, %v1532_v5, %v3150_v18  ;;  %v1523_v37 = vsel %vm1522_vm10, %v2194_v6, %v1519_v56 }
 0x513   :  { %v1528_v49 = vsel %vm1525_vm11, %v1527_v47, %v1523_v37 }
 0x518   :  { %v2198_v48 = vpop.eup %2197 }
 0x519   :  { %v1534_v16 = vmul.f32 %v2198_v48, %v1528_v49 }
 0x51b   :  { %v3170_v53 = vsel %vm1997_vm8, %v1534_v16, %v3153_v41  ;;  %v1540_v59 = vsel %vm1997_vm8, %v1534_v16, 0.0  ;;  %vm2002_vm8 = vcmp.gt.s32.totalorder %v2896_v24, 7 }
 0x51c   :  { %v1541_v60 = vpack.c.bf16 %v1540_v59, %v1540_v59  ;;  %v1549_v61 = vpack.c.bf16 %v3170_v53, %v3170_v53 }
 0x51e   :  { %1998 = vst [vmem:[%s3195_s5 + $0x18] sm:$0xf] %v1541_v60  ;;  %1558 = vmatmul.bf16.vlgmr.msra.gmra.mxu0 %v1549_v61  ;;  %1571 = vmatmul.bf16.vlgmr.msra.gmra.mxu1 %v1549_v61 }
 0x51f   :  { %1584 = vmatmul.bf16.vlgmr.msra.gmra.mxu2 %v1549_v61  ;;  %1597 = vmatmul.bf16.vlgmr.msra.gmra.mxu3 %v1549_v61 }
 0x59b   :  { %v1559_v18 = vpop.f32.mrf.mxu0  ;;  %v1572_v57 = vpop.f32.mrf.mxu1 }
 0x59c   :  { %v1602_v7 = vadd.f32 %v1559_v18, %v3235_v1  ;;  %v1603_v41 = vadd.f32 %v1572_v57, %v3236_v8 }
 0x59e   :  { %v1999_v9 = vmul.f32 -1.442695, %v1602_v7  ;;  %v2000_v13 = vmul.f32 -1.442695, %v1603_v41 }
 0x5a0   :  { %2199 = vpow2.f32 %v1999_v9 }
 0x5a1   :  { %2201 = vpow2.f32 %v2000_v13 }
 0x5a2   :  { %v1585_v20 = vpop.f32.mrf.mxu2  ;;  %v1598_v21 = vpop.f32.mrf.mxu3 }
 0x5a3   :  { %v1605_v26 = vadd.f32 %v1598_v21, %v3237_v22  ;;  %v1561_v32 = vpop.f32.mrf.mxu0  ;;  %v1574_v33 = vpop.f32.mrf.mxu1  ;;  %v1604_v15 = vadd.f32 %v1585_v20, %v3238_v14 }
 0x5a5   :  { %v2001_v34 = vmul.f32 -1.442695, %v1605_v26 }
 0x5a6   :  { %v2200_v35 = vpop.eup %2199 }
 0x5a7   :  { %v2202_v43 = vpop.eup %2201  ;;  %v1609_v44 = vadd.f32 1.0, %v2200_v35  ;;  %2203 = vpow2.f32 %v2001_v34 }
 0x5a8   :  { %v1628_v51 = vadd.f32 1.0, %v2202_v43 }
 0x5a9   :  { %2205 = vrcp.f32 %v1609_v44  ;;  %v1621_v11 = vand.u32 2147483648, %v1609_v44  ;;  %v1619_v6 = vand.u32 2147483647, %v1609_v44  ;;  %vm1615_vm14 = vweird.f32 %v1609_v44 }
 0x5aa   :  { %2207 = vrcp.f32 %v1628_v51  ;;  %v1587_v52 = vpop.f32.mrf.mxu2  ;;  %v1600_v2 = vpop.f32.mrf.mxu3  ;;  %v1640_v50 = vand.u32 2147483648, %v1628_v51  ;;  %v1638_v58 = vand.u32 2147483647, %v1628_v51  ;;  %vm1634_vm15 = vweird.f32 %v1628_v51 }
 0x5ab   :  { %v1622_v23 = vor.u32 1.1754944e-38, %v1621_v11  ;;  %vm1620_vm2 = vcmp.eq.f32.partialorder %v1619_v6, 8.507059e+37 }
 0x5ac   :  { %v1641_v17 = vor.u32 1.1754944e-38, %v1640_v50  ;;  %vm1639_vm3 = vcmp.eq.f32.partialorder %v1638_v58, 8.507059e+37 }
 0x5ad   :  { %v2204_v3 = vpop.eup %2203 }
 0x5ae   :  { %v1648_v4 = vadd.f32 1.0, %v2204_v3 }
 0x5af   :  { %v2206_v10 = vpop.eup %2205 }
 0x5b0   :  { %v2208_v63 = vpop.eup %2207  ;;  %v1611_v27 = vmul.f32 %v2206_v10, %v1609_v44  ;;  %2209 = vrcp.f32 %v1648_v4  ;;  %vm1616_vm12 = vweird.f32 %v2206_v10  ;;  %v1660_v47 = vand.u32 2147483648, %v1648_v4 }
 0x5b1   :  { %v1630_v36 = vmul.f32 %v2208_v63, %v1628_v51  ;;  %2211 = vtanh.f32 %v1604_v15  ;;  %vm1635_vm13 = vweird.f32 %v2208_v63  ;;  %vm1617_vm0 = vmor %vm1615_vm14, %vm1616_vm12  ;;  %vm1654_vm5 = vweird.f32 %v1648_v4 }
 0x5b2   :  { %v1612_v45 = vsub.f32 1.0, %v1611_v27  ;;  %vm1636_vm1 = vmor %vm1634_vm15, %vm1635_vm13  ;;  %v1658_v48 = vand.u32 2147483647, %v1648_v4  ;;  %v1661_v16 = vor.u32 1.1754944e-38, %v1660_v47 }
 0x5b3   :  { %v1631_v55 = vsub.f32 1.0, %v1630_v36 }
 0x5b4   :  { %v1613_v19 = vmul.f32 %v2206_v10, %v1612_v45  ;;  %vm1659_vm7 = vcmp.eq.f32.partialorder %v1658_v48, 8.507059e+37 }
 0x5b5   :  { %v1632_v0 = vmul.f32 %v2208_v63, %v1631_v55 }
 0x5b6   :  { %v2210_v40 = vpop.eup %2209  ;;  %v1614_v29 = vadd.f32 %v2206_v10, %v1613_v19 }
 0x5b7   :  { %v1633_v31 = vadd.f32 %v2208_v63, %v1632_v0  ;;  %v1650_v38 = vmul.f32 %v2210_v40, %v1648_v4  ;;  %v2212_v30 = vpop.eup %2211  ;;  %vm1655_vm4 = vweird.f32 %v2210_v40 }
 0x5b8   :  { %v1618_v46 = vsel %vm1617_vm0, %v2206_v10, %v1614_v29  ;;  %vm1656_vm6 = vmor %vm1654_vm5, %vm1655_vm4 }
 0x5b9   :  { %v1623_v42 = vsel %vm1620_vm2, %v1622_v23, %v1618_v46  ;;  %v1637_v12 = vsel %vm1636_vm1, %v2208_v63, %v1633_v31  ;;  %v1651_v28 = vsub.f32 1.0, %v1650_v38 }
 0x5ba   :  { %v1642_v54 = vsel %vm1639_vm3, %v1641_v17, %v1637_v12  ;;  %v1665_v5 = vmul.f32 %v2212_v30, %v1623_v42 }
 0x5bb   :  { %v1664_v56 = vmul.f32 %v1642_v54, %v3167_v39  ;;  %v1652_v62 = vmul.f32 %v2210_v40, %v1651_v28 }
 0x5bd   :  { %v1666_v25 = vadd.f32 %v1665_v5, %v1664_v56  ;;  %v1653_v37 = vadd.f32 %v2210_v40, %v1652_v62 }
 0x5bf   :  { %2213 = vtanh.f32 %v1666_v25  ;;  %v1657_v49 = vsel %vm1656_vm6, %v2210_v40, %v1653_v37 }
 0x5c0   :  { %v1662_v60 = vsel %vm1659_vm7, %v1661_v16, %v1657_v49 }
 0x5c5   :  { %v2214_v59 = vpop.eup %2213 }
 0x5c6   :  { %v1668_v61 = vmul.f32 %v2214_v59, %v1662_v60 }
 0x5c8   :  { %v1672_v18 = vsel %vm2002_vm8, %v1668_v61, %v3170_v53  ;;  %v1674_v39 = vsel %vm2002_vm8, %v1668_v61, 0.0 }
 0x5c9   :  { %v1675_v57 = vpack.c.bf16 %v1674_v39, %v1674_v39  ;;  %v1683_v1 = vpack.c.bf16 %v1672_v18, %v1672_v18 }
 0x5cb   :  { %2003 = vst [vmem:[%s3195_s5 + $0x1c] sm:$0xf] %v1675_v57 }
 0x5cc   :  { %1684 = vst [vmem:[%s3196_s6] sm:$0xf] %v1683_v1 }

// kernel: neg.2
= control target key start
LH: loop header
LB: loop body
LE: loop exit
PB: predicated region body
PF: predicated region fallthrough
CT: control target
= control target key end

     0   :  { %s24_s0 = inlined_call_operand.vmem [shape: s32[4], index: 0, kind: input, shape index: {}]   ;;  %s25_s1 = inlined_call_operand.vmem [shape: s32[4], index: 1, kind: output, shape index: {}]  }
   0x1   :  { %v2_v0 = vld [vmem:[%s24_s0] sm:$0x1] }
   0x2   :  { %v5_v1 = vsub.s32 0, %v2_v0 }
   0x4   :  { %7 = vst [vmem:[%s25_s1] sm:$0x1] %v5_v1 }

// kernel: _rnn_encoder_forward_impl.1
= control target key start
LH: loop header
LB: loop body
LE: loop exit
PB: predicated region body
PF: predicated region fallthrough
CT: control target
= control target key end

     0   :  { %s3190_s2 = inlined_call_operand.vmem [shape: bf16[128,512], index: 2, kind: input, shape index: {}]   ;;  %s3191_s3 = inlined_call_operand.vmem [shape: bf16[128,512], index: 3, kind: input, shape index: {}]   ;;  %s3192_s1 = inlined_call_operand.vmem [shape: bf16[8,8,128], index: 1, kind: input, shape index: {}]   ;;  %s3193_s0 = inlined_call_operand.vmem [shape: s32[8,1], index: 0, kind: input, shape index: {}]   ;;  %s3194_s4 = inlined_call_operand.vmem [shape: f32[1,512], index: 4, kind: input, shape index: {}]   ;;  %s3195_s5 = inlined_call_operand.vmem [shape: bf16[8,8,128], index: 5, kind: output, shape index: {0}]   ;;  %s3196_s6 = inlined_call_operand.vmem [shape: bf16[1,8,128], index: 6, kind: output, shape index: {1}]  }
   0x1   :  { %v1823_v0 = vld [vmem:[%s3190_s2 + $0xe0] sm:$0xf]  ;;  %v2070_v1 = vld [vmem:[%s3190_s2 + $0xec] sm:$0xf0]  ;;  %v2068_v2 = vld [vmem:[%s3190_s2 + $0xe4] sm:$0xf] }
   0x2   :  { %v1824_v3 = vor.u32 %v2070_v1, %v1823_v0  ;;  %v1825_v4 = vld [vmem:[%s3190_s2 + $0xf0] sm:$0xf0]  ;;  %v1831_v5 = vld [vmem:[%s3190_s2 + $0xe8] sm:$0xf]  ;;  %v2071_v6 = vld [vmem:[%s3190_s2 + $0xf4] sm:$0xf0] }
   0x3   :  { %v1828_v7 = vor.u32 %v2068_v2, %v1825_v4  ;;  %v1832_v8 = vor.u32 %v2071_v6, %v1831_v5  ;;  %v2069_v9 = vld [vmem:[%s3190_s2 + $0xec] sm:$0xf]  ;;  %v1833_v10 = vld [vmem:[%s3190_s2 + $0xf8] sm:$0xf0]  ;;  %v1807_v11 = vld [vmem:[%s3190_s2 + $0xc0] sm:$0xf] }
   0x4   :  { %294 = vmatpush.bf16.msra.mxu0 %v1824_v3  ;;  %v1836_v12 = vor.u32 %v2069_v9, %v1833_v10  ;;  %v2066_v13 = vld [vmem:[%s3190_s2 + $0xcc] sm:$0xf0]  ;;  %v2064_v14 = vld [vmem:[%s3190_s2 + $0xc4] sm:$0xf]  ;;  %v1809_v15 = vld [vmem:[%s3190_s2 + $0xd0] sm:$0xf0] }
   0x5   :  { %323 = vmatpush.bf16.msra.mxu1 %v1828_v7  ;;  %352 = vmatpush.bf16.msra.mxu2 %v1832_v8  ;;  %v1808_v16 = vor.u32 %v2066_v13, %v1807_v11  ;;  %v1812_v17 = vor.u32 %v2064_v14, %v1809_v15  ;;  %v1815_v18 = vld [vmem:[%s3190_s2 + $0xc8] sm:$0xf]  ;;  %v2067_v19 = vld [vmem:[%s3190_s2 + $0xd4] sm:$0xf0]  ;;  %v2065_v20 = vld [vmem:[%s3190_s2 + $0xcc] sm:$0xf] }
   0x6   :  { %381 = vmatpush.bf16.msra.mxu3 %v1836_v12  ;;  %v1816_v21 = vor.u32 %v2067_v19, %v1815_v18  ;;  %v1817_v22 = vld [vmem:[%s3190_s2 + $0xd8] sm:$0xf0]  ;;  %v1791_v23 = vld [vmem:[%s3190_s2 + $0xa0] sm:$0xf]  ;;  %v2062_v24 = vld [vmem:[%s3190_s2 + $0xac] sm:$0xf0] }
   0x7   :  { %v1820_v25 = vor.u32 %v2065_v20, %v1817_v22  ;;  %v2060_v26 = vld [vmem:[%s3190_s2 + $0xa4] sm:$0xf]  ;;  %v1793_v27 = vld [vmem:[%s3190_s2 + $0xb0] sm:$0xf0]  ;;  %v1799_v28 = vld [vmem:[%s3190_s2 + $0xa8] sm:$0xf]  ;;  %v1792_v29 = vor.u32 %v2062_v24, %v1791_v23 }
   0x8   :  { %295 = vmatpush.bf16.msra.mxu0 %v1808_v16  ;;  %v2063_v30 = vld [vmem:[%s3190_s2 + $0xb4] sm:$0xf0]  ;;  %v2061_v31 = vld [vmem:[%s3190_s2 + $0xac] sm:$0xf]  ;;  %v1801_v32 = vld [vmem:[%s3190_s2 + $0xb8] sm:$0xf0]  ;;  %v1796_v33 = vor.u32 %v2060_v26, %v1793_v27 }
   0x9   :  { %324 = vmatpush.bf16.msra.mxu1 %v1812_v17  ;;  %353 = vmatpush.bf16.msra.mxu2 %v1816_v21  ;;  %v1800_v34 = vor.u32 %v2063_v30, %v1799_v28  ;;  %v1775_v35 = vld [vmem:[%s3190_s2 + $0x80] sm:$0xf]  ;;  %v2058_v36 = vld [vmem:[%s3190_s2 + $0x8c] sm:$0xf0]  ;;  %v2056_v37 = vld [vmem:[%s3190_s2 + $0x84] sm:$0xf]  ;;  %v1804_v38 = vor.u32 %v2061_v31, %v1801_v32 }
   0xa   :  { %382 = vmatpush.bf16.msra.mxu3 %v1820_v25  ;;  %v1777_v39 = vld [vmem:[%s3190_s2 + $0x90] sm:$0xf0]  ;;  %v1783_v40 = vld [vmem:[%s3190_s2 + $0x88] sm:$0xf]  ;;  %v2059_v41 = vld [vmem:[%s3190_s2 + $0x94] sm:$0xf0]  ;;  %v1776_v44 = vor.u32 %v2058_v36, %v1775_v35 }
   0xb   :  { %v2057_v42 = vld [vmem:[%s3190_s2 + $0x8c] sm:$0xf]  ;;  %v1785_v43 = vld [vmem:[%s3190_s2 + $0x98] sm:$0xf0]  ;;  %v1780_v45 = vor.u32 %v2056_v37, %v1777_v39  ;;  %v1784_v46 = vor.u32 %v2059_v41, %v1783_v40  ;;  %v1759_v47 = vld [vmem:[%s3190_s2 + $0x60] sm:$0xf] }
   0xc   :  { %296 = vmatpush.bf16.msra.mxu0 %v1792_v29  ;;  %v2054_v48 = vld [vmem:[%s3190_s2 + $0x6c] sm:$0xf0]  ;;  %v2052_v49 = vld [vmem:[%s3190_s2 + $0x64] sm:$0xf]  ;;  %v1788_v50 = vor.u32 %v2057_v42, %v1785_v43  ;;  %v1761_v51 = vld [vmem:[%s3190_s2 + $0x70] sm:$0xf0] }
   0xd   :  { %325 = vmatpush.bf16.msra.mxu1 %v1796_v33  ;;  %354 = vmatpush.bf16.msra.mxu2 %v1800_v34  ;;  %v1767_v52 = vld [vmem:[%s3190_s2 + $0x68] sm:$0xf]  ;;  %v2055_v53 = vld [vmem:[%s3190_s2 + $0x74] sm:$0xf0]  ;;  %v2053_v54 = vld [vmem:[%s3190_s2 + $0x6c] sm:$0xf]  ;;  %v1760_v56 = vor.u32 %v2054_v48, %v1759_v47  ;;  %v1764_v57 = vor.u32 %v2052_v49, %v1761_v51 }
   0xe   :  { %383 = vmatpush.bf16.msra.mxu3 %v1804_v38  ;;  %v1769_v55 = vld [vmem:[%s3190_s2 + $0x78] sm:$0xf0]  ;;  %v1768_v58 = vor.u32 %v2055_v53, %v1767_v52  ;;  %v1743_v59 = vld [vmem:[%s3190_s2 + $0x40] sm:$0xf]  ;;  %v2050_v60 = vld [vmem:[%s3190_s2 + $0x4c] sm:$0xf0] }
   0xf   :  { %v2048_v61 = vld [vmem:[%s3190_s2 + $0x44] sm:$0xf]  ;;  %v1772_v62 = vor.u32 %v2053_v54, %v1769_v55  ;;  %v1745_v63 = vld [vmem:[%s3190_s2 + $0x50] sm:$0xf0]  ;;  %v1751_v0 = vld [vmem:[%s3190_s2 + $0x48] sm:$0xf]  ;;  %v1744_v4 = vor.u32 %v2050_v60, %v1743_v59 }
  0x10   :  { %297 = vmatpush.bf16.msra.mxu0 %v1776_v44  ;;  %v2051_v1 = vld [vmem:[%s3190_s2 + $0x54] sm:$0xf0]  ;;  %v2049_v2 = vld [vmem:[%s3190_s2 + $0x4c] sm:$0xf]  ;;  %v1753_v3 = vld [vmem:[%s3190_s2 + $0x58] sm:$0xf0]  ;;  %v1748_v5 = vor.u32 %v2048_v61, %v1745_v63 }
  0x11   :  { %326 = vmatpush.bf16.msra.mxu1 %v1780_v45  ;;  %355 = vmatpush.bf16.msra.mxu2 %v1784_v46  ;;  %v1752_v6 = vor.u32 %v2051_v1, %v1751_v0  ;;  %v1727_v7 = vld [vmem:[%s3190_s2 + $0x20] sm:$0xf]  ;;  %v2046_v8 = vld [vmem:[%s3190_s2 + $0x2c] sm:$0xf0]  ;;  %v2044_v9 = vld [vmem:[%s3190_s2 + $0x24] sm:$0xf]  ;;  %v1756_v10 = vor.u32 %v2049_v2, %v1753_v3 }
  0x12   :  { %384 = vmatpush.bf16.msra.mxu3 %v1788_v50  ;;  %v1729_v11 = vld [vmem:[%s3190_s2 + $0x30] sm:$0xf0]  ;;  %v1735_v12 = vld [vmem:[%s3190_s2 + $0x28] sm:$0xf]  ;;  %v2047_v13 = vld [vmem:[%s3190_s2 + $0x34] sm:$0xf0]  ;;  %v1728_v16 = vor.u32 %v2046_v8, %v1727_v7 }
  0x13   :  { %v2045_v14 = vld [vmem:[%s3190_s2 + $0x2c] sm:$0xf]  ;;  %v1737_v15 = vld [vmem:[%s3190_s2 + $0x38] sm:$0xf0]  ;;  %v1711_v17 = vld [vmem:[%s3190_s2] sm:$0xf]  ;;  %v1732_v18 = vor.u32 %v2044_v9, %v1729_v11  ;;  %v1736_v19 = vor.u32 %v2047_v13, %v1735_v12 }
  0x14   :  { %298 = vmatpush.bf16.msra.mxu0 %v1760_v56  ;;  %v2042_v20 = vld [vmem:[%s3190_s2 + $0xc] sm:$0xf0]  ;;  %v2040_v21 = vld [vmem:[%s3190_s2 + $0x4] sm:$0xf]  ;;  %v1713_v22 = vld [vmem:[%s3190_s2 + $0x10] sm:$0xf0]  ;;  %v1740_v23 = vor.u32 %v2045_v14, %v1737_v15 }
  0x15   :  { %327 = vmatpush.bf16.msra.mxu1 %v1764_v57  ;;  %356 = vmatpush.bf16.msra.mxu2 %v1768_v58  ;;  %v1719_v24 = vld [vmem:[%s3190_s2 + $0x8] sm:$0xf]  ;;  %v2043_v25 = vld [vmem:[%s3190_s2 + $0x14] sm:$0xf0]  ;;  %v2041_v26 = vld [vmem:[%s3190_s2 + $0xc] sm:$0xf]  ;;  %v1712_v30 = vor.u32 %v2042_v20, %v1711_v17  ;;  %v1716_v33 = vor.u32 %v2040_v21, %v1713_v22 }
  0x16   :  { %385 = vmatpush.bf16.msra.mxu3 %v1772_v62  ;;  %v1721_v27 = vld [vmem:[%s3190_s2 + $0x18] sm:$0xf0]  ;;  %v1951_v28 = vld [vmem:[%s3191_s3 + $0xe0] sm:$0xf]  ;;  %v2034_v29 = vld [vmem:[%s3191_s3 + $0xec] sm:$0xf0]  ;;  %v1720_v34 = vor.u32 %v2043_v25, %v1719_v24 }
  0x17   :  { %v2032_v31 = vld [vmem:[%s3191_s3 + $0xe4] sm:$0xf]  ;;  %v1953_v32 = vld [vmem:[%s3191_s3 + $0xf0] sm:$0xf0]  ;;  %v1724_v36 = vor.u32 %v2041_v26, %v1721_v27  ;;  %v2459_v37 = vor.u32 %v2034_v29, %v1951_v28  ;;  %v2033_v38 = vld [vmem:[%s3191_s3 + $0xec] sm:$0xf] }
  0x18   :  { %299 = vmatpush.bf16.msra.mxu0 %v1744_v4  ;;  %v2036_v35 = vld [vmem:[%s3192_s1] sm:$0xff]  ;;  %v1959_v39 = vld [vmem:[%s3191_s3 + $0xe8] sm:$0xf]  ;;  %v2035_v40 = vld [vmem:[%s3191_s3 + $0xf4] sm:$0xf0]  ;;  %v2470_v41 = vor.u32 %v2032_v31, %v1953_v32 }
  0x19   :  { %328 = vmatpush.bf16.msra.mxu1 %v1748_v5  ;;  %357 = vmatpush.bf16.msra.mxu2 %v1752_v6  ;;  %v1961_v42 = vld [vmem:[%s3191_s3 + $0xf8] sm:$0xf0]  ;;  %v1935_v43 = vld [vmem:[%s3191_s3 + $0xc0] sm:$0xf]  ;;  %v2030_v44 = vld [vmem:[%s3191_s3 + $0xcc] sm:$0xf0]  ;;  %v2487_v47 = vor.u32 %v2035_v40, %v1959_v39 }
  0x1a   :  { %386 = vmatpush.bf16.msra.mxu3 %v1756_v10  ;;  %v2028_v45 = vld [vmem:[%s3191_s3 + $0xc4] sm:$0xf]  ;;  %v1937_v46 = vld [vmem:[%s3191_s3 + $0xd0] sm:$0xf0]  ;;  %v2490_v48 = vor.u32 %v2033_v38, %v1961_v42  ;;  %v2492_v49 = vor.u32 %v2030_v44, %v1935_v43  ;;  %v2029_v50 = vld [vmem:[%s3191_s3 + $0xcc] sm:$0xf] }
  0x1b   :  { %v1943_v51 = vld [vmem:[%s3191_s3 + $0xc8] sm:$0xf]  ;;  %v2031_v52 = vld [vmem:[%s3191_s3 + $0xd4] sm:$0xf0]  ;;  %v2504_v53 = vor.u32 %v2028_v45, %v1937_v46  ;;  %v1945_v54 = vld [vmem:[%s3191_s3 + $0xd8] sm:$0xf0] }
  0x1c   :  { %300 = vmatpush.bf16.msra.mxu0 %v1728_v16  ;;  %v1919_v55 = vld [vmem:[%s3191_s3 + $0xa0] sm:$0xf]  ;;  %v2026_v56 = vld [vmem:[%s3191_s3 + $0xac] sm:$0xf0]  ;;  %v2024_v57 = vld [vmem:[%s3191_s3 + $0xa4] sm:$0xf]  ;;  %v2522_v59 = vor.u32 %v2031_v52, %v1943_v51  ;;  %v2526_v60 = vor.u32 %v2029_v50, %v1945_v54 }
  0x1d   :  { %329 = vmatpush.bf16.msra.mxu1 %v1732_v18  ;;  %358 = vmatpush.bf16.msra.mxu2 %v1736_v19  ;;  %v1921_v58 = vld [vmem:[%s3191_s3 + $0xb0] sm:$0xf0]  ;;  %v2528_v61 = vor.u32 %v2026_v56, %v1919_v55  ;;  %v2025_v62 = vld [vmem:[%s3191_s3 + $0xac] sm:$0xf]  ;;  %v1927_v63 = vld [vmem:[%s3191_s3 + $0xa8] sm:$0xf] }
  0x1e   :  { %387 = vmatpush.bf16.msra.mxu3 %v1740_v23  ;;  %v2027_v0 = vld [vmem:[%s3191_s3 + $0xb4] sm:$0xf0]  ;;  %v2540_v1 = vor.u32 %v2024_v57, %v1921_v58  ;;  %v1929_v2 = vld [vmem:[%s3191_s3 + $0xb8] sm:$0xf0]  ;;  %v1903_v3 = vld [vmem:[%s3191_s3 + $0x80] sm:$0xf] }
  0x1f   :  { %v2022_v4 = vld [vmem:[%s3191_s3 + $0x8c] sm:$0xf0]  ;;  %v2020_v5 = vld [vmem:[%s3191_s3 + $0x84] sm:$0xf]  ;;  %v1905_v6 = vld [vmem:[%s3191_s3 + $0x90] sm:$0xf0]  ;;  %v2558_v7 = vor.u32 %v2027_v0, %v1927_v63  ;;  %v2562_v8 = vor.u32 %v2025_v62, %v1929_v2 }
  0x20   :  { %301 = vmatpush.bf16.msra.mxu0 %v1712_v30  ;;  %v2564_v9 = vor.u32 %v2022_v4, %v1903_v3  ;;  %v2021_v10 = vld [vmem:[%s3191_s3 + $0x8c] sm:$0xf]  ;;  %v1911_v11 = vld [vmem:[%s3191_s3 + $0x88] sm:$0xf]  ;;  %v2023_v12 = vld [vmem:[%s3191_s3 + $0x94] sm:$0xf0]  ;;  %v2576_v13 = vor.u32 %v2020_v5, %v1905_v6 }
  0x21   :  { %330 = vmatpush.bf16.msra.mxu1 %v1716_v33  ;;  %359 = vmatpush.bf16.msra.mxu2 %v1720_v34  ;;  %v1913_v14 = vld [vmem:[%s3191_s3 + $0x98] sm:$0xf0]  ;;  %v1887_v15 = vld [vmem:[%s3191_s3 + $0x60] sm:$0xf]  ;;  %v2018_v16 = vld [vmem:[%s3191_s3 + $0x6c] sm:$0xf0]  ;;  %v2597_v20 = vor.u32 %v2023_v12, %v1911_v11 }
  0x22   :  { %388 = vmatpush.bf16.msra.mxu3 %v1724_v36  ;;  %v2016_v17 = vld [vmem:[%s3191_s3 + $0x64] sm:$0xf]  ;;  %v1889_v18 = vld [vmem:[%s3191_s3 + $0x70] sm:$0xf0]  ;;  %v2037_v19 = vld [vmem:[%s3192_s1 + $0x8] sm:$0xff]  ;;  %v2601_v21 = vor.u32 %v2021_v10, %v1913_v14  ;;  %v2603_v22 = vor.u32 %v2018_v16, %v1887_v15 }
  0x23   :  { %302 = vmatmul.bf16.vlgmr.msra.gmra.mxu0 %v2036_v35  ;;  %v2017_v23 = vld [vmem:[%s3191_s3 + $0x6c] sm:$0xf]  ;;  %v1895_v24 = vld [vmem:[%s3191_s3 + $0x68] sm:$0xf]  ;;  %v2019_v25 = vld [vmem:[%s3191_s3 + $0x74] sm:$0xf0]  ;;  %v2615_v26 = vor.u32 %v2016_v17, %v1889_v18 }
  0x24   :  { %614 = vmatpush.bf16.msrb.mxu0 %v2459_v37  ;;  %331 = vmatmul.bf16.vlgmr.msra.gmra.mxu1 %v2036_v35  ;;  %v1897_v27 = vld [vmem:[%s3191_s3 + $0x78] sm:$0xf0]  ;;  %v1871_v28 = vld [vmem:[%s3191_s3 + $0x40] sm:$0xf]  ;;  %v2014_v29 = vld [vmem:[%s3191_s3 + $0x4c] sm:$0xf0]  ;;  %v2633_v32 = vor.u32 %v2019_v25, %v1895_v24 }
  0x25   :  { %627 = vmatpush.bf16.msrb.mxu1 %v2470_v41  ;;  %360 = vmatmul.bf16.vlgmr.msra.gmra.mxu2 %v2036_v35  ;;  %v2012_v30 = vld [vmem:[%s3191_s3 + $0x44] sm:$0xf]  ;;  %v1873_v31 = vld [vmem:[%s3191_s3 + $0x50] sm:$0xf0]  ;;  %v2637_v33 = vor.u32 %v2017_v23, %v1897_v27  ;;  %v2639_v34 = vor.u32 %v2014_v29, %v1871_v28  ;;  %v2013_v36 = vld [vmem:[%s3191_s3 + $0x4c] sm:$0xf] }
  0x26   :  { %389 = vmatmul.bf16.vlgmr.msra.gmra.mxu3 %v2036_v35  ;;  %640 = vmatpush.bf16.msrb.mxu2 %v2487_v47  ;;  %v2642_v35 = vor.u32 %v2012_v30, %v1873_v31  ;;  %v1881_v38 = vld [vmem:[%s3191_s3 + $0x58] sm:$0xf0]  ;;  %v1855_v39 = vld [vmem:[%s3191_s3 + $0x20] sm:$0xf]  ;;  %v2010_v40 = vld [vmem:[%s3191_s3 + $0x2c] sm:$0xf0] }
  0x27   :  { %653 = vmatpush.bf16.msrb.mxu3 %v2490_v48  ;;  %v2008_v42 = vld [vmem:[%s3191_s3 + $0x24] sm:$0xf]  ;;  %v2662_v43 = vor.u32 %v2013_v36, %v1881_v38  ;;  %v2664_v44 = vor.u32 %v2010_v40, %v1855_v39  ;;  %v1857_v45 = vld [vmem:[%s3191_s3 + $0x30] sm:$0xf0]  ;;  %v1879_v46 = vld [vmem:[%s3191_s3 + $0x48] sm:$0xf] }
  0x28   :  { %615 = vmatpush.bf16.msrb.mxu0 %v2492_v49  ;;  %v2015_v50 = vld [vmem:[%s3191_s3 + $0x54] sm:$0xf0]  ;;  %v2676_v51 = vor.u32 %v2008_v42, %v1857_v45  ;;  %v2009_v54 = vld [vmem:[%s3191_s3 + $0x2c] sm:$0xf]  ;;  %v1865_v55 = vld [vmem:[%s3191_s3 + $0x38] sm:$0xf0] }
  0x29   :  { %628 = vmatpush.bf16.msrb.mxu1 %v2504_v53  ;;  %v2678_v52 = vor.u32 %v2015_v50, %v1879_v46  ;;  %v1839_v56 = vld [vmem:[%s3191_s3] sm:$0xf]  ;;  %v2006_v57 = vld [vmem:[%s3191_s3 + $0xc] sm:$0xf0]  ;;  %v2004_v58 = vld [vmem:[%s3191_s3 + $0x4] sm:$0xf]  ;;  %v2707_v2 = vor.u32 %v2009_v54, %v1865_v55 }
  0x2a   :  { %641 = vmatpush.bf16.msrb.mxu2 %v2522_v59  ;;  %v1841_v62 = vld [vmem:[%s3191_s3 + $0x10] sm:$0xf0]  ;;  %v1863_v63 = vld [vmem:[%s3191_s3 + $0x28] sm:$0xf]  ;;  %v2011_v0 = vld [vmem:[%s3191_s3 + $0x34] sm:$0xf0]  ;;  %v2709_v3 = vor.u32 %v2006_v57, %v1839_v56 }
  0x2b   :  { %654 = vmatpush.bf16.msrb.mxu3 %v2526_v60  ;;  %v2711_v4 = vor.u32 %v2011_v0, %v1863_v63  ;;  %v1847_v5 = vld [vmem:[%s3191_s3 + $0x8] sm:$0xf]  ;;  %v2007_v6 = vld [vmem:[%s3191_s3 + $0x14] sm:$0xf0]  ;;  %v2720_v10 = vor.u32 %v2004_v58, %v1841_v62  ;;  %v2005_v11 = vld [vmem:[%s3191_s3 + $0xc] sm:$0xf] }
  0x2c   :  { %616 = vmatpush.bf16.msrb.mxu0 %v2528_v61  ;;  %v1849_v12 = vld [vmem:[%s3191_s3 + $0x18] sm:$0xf0]  ;;  %v2729_v14 = vor.u32 %v2007_v6, %v1847_v5  ;;  %v2038_v16 = vld [vmem:[%s3192_s1 + $0x10] sm:$0xff]  ;;  %v442_v17 = vld [vmem:[%s3193_s0] sm:$0xff]  ;;  %v2215_v18 = vmov 0   ;;  %v2216_v23 = vmov 0.0|0.0  }
  0x2d   :  { %629 = vmatpush.bf16.msrb.mxu1 %v2540_v1  ;;  %v2733_v15 = vor.u32 %v2005_v11, %v1849_v12  ;;  %2086 = vset.pattern.permute.xlu0 %v2215_v18  ;;  %v100_v27 = vld [vmem:[%s3194_s4] sm:$0xf] }
  0x2e   :  { %642 = vmatpush.bf16.msrb.mxu2 %v2558_v7  ;;  %444 = vperm.xlu0 %2086, %v442_v17   ;;  %v102_v28 = vperm.slane %v100_v27, 0  ;;  %v103_v30 = vperm.slane %v100_v27, 1  ;;  %v2822_v42 = vperm.slane %v100_v27, 2  ;;  %v2824_v45 = vperm.slane %v100_v27, 3 }
  0x2f   :  { %655 = vmatpush.bf16.msrb.mxu3 %v2562_v8 }
  0x30   :  { %617 = vmatpush.bf16.msrb.mxu0 %v2564_v9 }
  0x31   :  { %630 = vmatpush.bf16.msrb.mxu1 %v2576_v13 }
  0x32   :  { %643 = vmatpush.bf16.msrb.mxu2 %v2597_v20 }
  0x33   :  { %656 = vmatpush.bf16.msrb.mxu3 %v2601_v21  ;;  %307 = vmatmul.bf16.gmra.mxu0 %v2037_v19 }
  0x34   :  { %618 = vmatpush.bf16.msrb.mxu0 %v2603_v22  ;;  %336 = vmatmul.bf16.gmra.mxu1 %v2037_v19 }
  0x35   :  { %631 = vmatpush.bf16.msrb.mxu1 %v2615_v26  ;;  %365 = vmatmul.bf16.gmra.mxu2 %v2037_v19 }
  0x36   :  { %394 = vmatmul.bf16.gmra.mxu3 %v2037_v19  ;;  %644 = vmatpush.bf16.msrb.mxu2 %v2633_v32  ;;  %v2039_v19 = vld [vmem:[%s3192_s1 + $0x18] sm:$0xff] }
  0x37   :  { %657 = vmatpush.bf16.msrb.mxu3 %v2637_v33 }
  0x38   :  { %619 = vmatpush.bf16.msrb.mxu0 %v2639_v34 }
  0x39   :  { %632 = vmatpush.bf16.msrb.mxu1 %v2642_v35 }
  0x3a   :  { %645 = vmatpush.bf16.msrb.mxu2 %v2678_v52 }
  0x3b   :  { %658 = vmatpush.bf16.msrb.mxu3 %v2662_v43 }
  0x3c   :  { %620 = vmatpush.bf16.msrb.mxu0 %v2664_v44 }
  0x3d   :  { %633 = vmatpush.bf16.msrb.mxu1 %v2676_v51 }
  0x3e   :  { %646 = vmatpush.bf16.msrb.mxu2 %v2711_v4 }
  0x3f   :  { %659 = vmatpush.bf16.msrb.mxu3 %v2707_v2 }
  0x40   :  { %621 = vmatpush.bf16.msrb.mxu0 %v2709_v3 }
  0x41   :  { %634 = vmatpush.bf16.msrb.mxu1 %v2720_v10 }
  0x42   :  { %647 = vmatpush.bf16.msrb.mxu2 %v2729_v14 }
  0x43   :  { %660 = vmatpush.bf16.msrb.mxu3 %v2733_v15  ;;  %312 = vmatmul.bf16.gmra.mxu0 %v2038_v16 }
  0x44   :  { %746 = vmatpush.bf16.msra.mxu0 %v2459_v37  ;;  %341 = vmatmul.bf16.gmra.mxu1 %v2038_v16 }
  0x45   :  { %759 = vmatpush.bf16.msra.mxu1 %v2470_v41  ;;  %370 = vmatmul.bf16.gmra.mxu2 %v2038_v16 }
  0x46   :  { %772 = vmatpush.bf16.msra.mxu2 %v2487_v47  ;;  %399 = vmatmul.bf16.gmra.mxu3 %v2038_v16 }
  0x47   :  { %785 = vmatpush.bf16.msra.mxu3 %v2490_v48 }
  0x48   :  { %747 = vmatpush.bf16.msra.mxu0 %v2492_v49 }
  0x49   :  { %760 = vmatpush.bf16.msra.mxu1 %v2504_v53 }
  0x4a   :  { %773 = vmatpush.bf16.msra.mxu2 %v2522_v59 }
  0x4b   :  { %786 = vmatpush.bf16.msra.mxu3 %v2526_v60 }
  0x4c   :  { %748 = vmatpush.bf16.msra.mxu0 %v2528_v61 }
  0x4d   :  { %761 = vmatpush.bf16.msra.mxu1 %v2540_v1 }
  0x4e   :  { %774 = vmatpush.bf16.msra.mxu2 %v2558_v7 }
  0x4f   :  { %787 = vmatpush.bf16.msra.mxu3 %v2562_v8 }
  0x50   :  { %749 = vmatpush.bf16.msra.mxu0 %v2564_v9 }
  0x51   :  { %762 = vmatpush.bf16.msra.mxu1 %v2576_v13 }
  0x52   :  { %775 = vmatpush.bf16.msra.mxu2 %v2597_v20 }
  0x53   :  { %788 = vmatpush.bf16.msra.mxu3 %v2601_v21  ;;  %317 = vmatmul.bf16.gmra.mxu0 %v2039_v19 }
  0x54   :  { %750 = vmatpush.bf16.msra.mxu0 %v2603_v22  ;;  %346 = vmatmul.bf16.gmra.mxu1 %v2039_v19 }
  0x55   :  { %763 = vmatpush.bf16.msra.mxu1 %v2615_v26  ;;  %375 = vmatmul.bf16.gmra.mxu2 %v2039_v19 }
  0x56   :  { %776 = vmatpush.bf16.msra.mxu2 %v2633_v32  ;;  %404 = vmatmul.bf16.gmra.mxu3 %v2039_v19 }
  0x57   :  { %789 = vmatpush.bf16.msra.mxu3 %v2637_v33 }
  0x58   :  { %751 = vmatpush.bf16.msra.mxu0 %v2639_v34 }
  0x59   :  { %764 = vmatpush.bf16.msra.mxu1 %v2642_v35 }
  0x5a   :  { %777 = vmatpush.bf16.msra.mxu2 %v2678_v52 }
  0x5b   :  { %790 = vmatpush.bf16.msra.mxu3 %v2662_v43 }
  0x5c   :  { %752 = vmatpush.bf16.msra.mxu0 %v2664_v44 }
  0x5d   :  { %765 = vmatpush.bf16.msra.mxu1 %v2676_v51 }
  0x5e   :  { %778 = vmatpush.bf16.msra.mxu2 %v2711_v4 }
  0x5f   :  { %791 = vmatpush.bf16.msra.mxu3 %v2707_v2 }
  0x60   :  { %753 = vmatpush.bf16.msra.mxu0 %v2709_v3 }
  0x61   :  { %766 = vmatpush.bf16.msra.mxu1 %v2720_v10 }
  0x62   :  { %779 = vmatpush.bf16.msra.mxu2 %v2729_v14 }
  0x63   :  { %792 = vmatpush.bf16.msra.mxu3 %v2733_v15  ;;  %622 = vmatmul.bf16.vlgmr.msrb.gmra.mxu0 %v2216_v23 }
  0x64   :  { %635 = vmatmul.bf16.vlgmr.msrb.gmra.mxu1 %v2216_v23  ;;  %880 = vmatpush.bf16.msrb.mxu0 %v2459_v37 }
  0x65   :  { %648 = vmatmul.bf16.vlgmr.msrb.gmra.mxu2 %v2216_v23  ;;  %893 = vmatpush.bf16.msrb.mxu1 %v2470_v41 }
  0x66   :  { %661 = vmatmul.bf16.vlgmr.msrb.gmra.mxu3 %v2216_v23  ;;  %906 = vmatpush.bf16.msrb.mxu2 %v2487_v47 }
  0x67   :  { %919 = vmatpush.bf16.msrb.mxu3 %v2490_v48 }
  0x68   :  { %881 = vmatpush.bf16.msrb.mxu0 %v2492_v49 }
  0x69   :  { %894 = vmatpush.bf16.msrb.mxu1 %v2504_v53 }
  0x6a   :  { %907 = vmatpush.bf16.msrb.mxu2 %v2522_v59 }
  0x6b   :  { %920 = vmatpush.bf16.msrb.mxu3 %v2526_v60 }
  0x6c   :  { %882 = vmatpush.bf16.msrb.mxu0 %v2528_v61 }
  0x6d   :  { %895 = vmatpush.bf16.msrb.mxu1 %v2540_v1 }
  0x6e   :  { %908 = vmatpush.bf16.msrb.mxu2 %v2558_v7 }
  0x6f   :  { %921 = vmatpush.bf16.msrb.mxu3 %v2562_v8 }
  0x70   :  { %883 = vmatpush.bf16.msrb.mxu0 %v2564_v9 }
  0x71   :  { %896 = vmatpush.bf16.msrb.mxu1 %v2576_v13 }
  0x72   :  { %909 = vmatpush.bf16.msrb.mxu2 %v2597_v20 }
  0x73   :  { %922 = vmatpush.bf16.msrb.mxu3 %v2601_v21 }
  0x74   :  { %884 = vmatpush.bf16.msrb.mxu0 %v2603_v22 }
  0x75   :  { %897 = vmatpush.bf16.msrb.mxu1 %v2615_v26 }
  0x76   :  { %910 = vmatpush.bf16.msrb.mxu2 %v2633_v32 }
  0x77   :  { %923 = vmatpush.bf16.msrb.mxu3 %v2637_v33 }
  0x78   :  { %885 = vmatpush.bf16.msrb.mxu0 %v2639_v34 }
  0x79   :  { %898 = vmatpush.bf16.msrb.mxu1 %v2642_v35 }
  0x7a   :  { %911 = vmatpush.bf16.msrb.mxu2 %v2678_v52 }
  0x7b   :  { %924 = vmatpush.bf16.msrb.mxu3 %v2662_v43 }
  0x7c   :  { %886 = vmatpush.bf16.msrb.mxu0 %v2664_v44 }
  0x7d   :  { %899 = vmatpush.bf16.msrb.mxu1 %v2676_v51 }
  0x7e   :  { %912 = vmatpush.bf16.msrb.mxu2 %v2711_v4 }
  0x7f   :  { %925 = vmatpush.bf16.msrb.mxu3 %v2707_v2 }
  0x80   :  { %887 = vmatpush.bf16.msrb.mxu0 %v2709_v3 }
  0x81   :  { %900 = vmatpush.bf16.msrb.mxu1 %v2720_v10 }
  0x82   :  { %913 = vmatpush.bf16.msrb.mxu2 %v2729_v14 }
  0x83   :  { %926 = vmatpush.bf16.msrb.mxu3 %v2733_v15 }
  0xa0   :  { %v303_v24 = vpop.f32.mrf.mxu0 }
  0xa1   :  { %v332_v25 = vpop.f32.mrf.mxu1 }
  0xa8   :  { %v2814_v29 = vpop.f32.mrf.mxu2  ;;  %v305_v36 = vpop.f32.mrf.mxu0 }
  0xa9   :  { %v2816_v31 = vpop.f32.mrf.mxu3  ;;  %v2818_v38 = vadd.f32 %v305_v36, %v102_v28  ;;  %v334_v39 = vpop.f32.mrf.mxu1 }
  0xaa   :  { %v2820_v40 = vadd.f32 %v334_v39, %v103_v30 }
  0xb0   :  { %v363_v46 = vpop.f32.mrf.mxu2  ;;  %v308_v55 = vpop.f32.mrf.mxu0 }
  0xb1   :  { %v2827_v50 = vadd.f32 %v363_v46, %v2822_v42  ;;  %v392_v54 = vpop.f32.mrf.mxu3  ;;  %v2832_v57 = vadd.f32 %v308_v55, %v102_v28  ;;  %v337_v58 = vpop.f32.mrf.mxu1 }
  0xb2   :  { %v2830_v56 = vadd.f32 %v392_v54, %v2824_v45  ;;  %v2834_v62 = vadd.f32 %v337_v58, %v103_v30 }
  0xb8   :  { %v366_v63 = vpop.f32.mrf.mxu2  ;;  %v310_v6 = vpop.f32.mrf.mxu0 }
  0xb9   :  { %v2837_v0 = vadd.f32 %v366_v63, %v2822_v42  ;;  %v395_v5 = vpop.f32.mrf.mxu3  ;;  %v2842_v12 = vadd.f32 %v310_v6, %v102_v28  ;;  %v339_v16 = vpop.f32.mrf.mxu1 }
  0xba   :  { %v2840_v11 = vadd.f32 %v395_v5, %v2824_v45  ;;  %v2844_v17 = vadd.f32 %v339_v16, %v103_v30 }
  0xbb   :  { %3197 = vst [vmem:[#allocation5_spill] sm:$0xff] %v2837_v0 }
  0xbc   :  { %3198 = vst [vmem:[#allocation6_spill] sm:$0xff] %v2842_v12 }
  0xbd   :  { %3199 = vst [vmem:[#allocation7_spill] sm:$0xff] %v2844_v17 }
  0xc0   :  { %v368_v18 = vpop.f32.mrf.mxu2  ;;  %v313_v27 = vpop.f32.mrf.mxu0 }
  0xc1   :  { %v2847_v19 = vadd.f32 %v368_v18, %v2822_v42  ;;  %v397_v23 = vpop.f32.mrf.mxu3  ;;  %v2852_v39 = vadd.f32 %v313_v27, %v102_v28  ;;  %v342_v46 = vpop.f32.mrf.mxu1 }
  0xc2   :  { %v2850_v36 = vadd.f32 %v397_v23, %v2824_v45  ;;  %v2854_v54 = vadd.f32 %v342_v46, %v103_v30 }
  0xc3   :  { %3200 = vst [vmem:[#allocation8_spill] sm:$0xff] %v2847_v19 }
  0xc4   :  { %3201 = vst [vmem:[#allocation9_spill] sm:$0xff] %v2850_v36 }
  0xc5   :  { %3202 = vst [vmem:[#allocation10_spill] sm:$0xff] %v2852_v39 }
  0xc6   :  { %3203 = vst [vmem:[#allocation11_spill] sm:$0xff] %v2854_v54 }
  0xc8   :  { %v371_v55 = vpop.f32.mrf.mxu2  ;;  %v315_v5 = vpop.f32.mrf.mxu0 }
  0xc9   :  { %v2857_v58 = vadd.f32 %v371_v55, %v2822_v42  ;;  %v400_v63 = vpop.f32.mrf.mxu3  ;;  %v2862_v16 = vadd.f32 %v315_v5, %v102_v28  ;;  %v344_v18 = vpop.f32.mrf.mxu1 }
  0xca   :  { %v2860_v6 = vadd.f32 %v400_v63, %v2824_v45  ;;  %v2864_v19 = vadd.f32 %v344_v18, %v103_v30 }
  0xcb   :  { %3204 = vst [vmem:[#allocation12_spill] sm:$0xff] %v2857_v58 }
  0xcc   :  { %3205 = vst [vmem:[#allocation13_spill] sm:$0xff] %v2860_v6 }
  0xcd   :  { %3206 = vst [vmem:[#allocation14_spill] sm:$0xff] %v2862_v16 }
  0xce   :  { %3207 = vst [vmem:[#allocation15_spill] sm:$0xff] %v2864_v19 }
  0xd0   :  { %v373_v23 = vpop.f32.mrf.mxu2  ;;  %v318_v54 = vpop.f32.mrf.mxu0 }
  0xd1   :  { %v2867_v27 = vadd.f32 %v373_v23, %v2822_v42  ;;  %v402_v46 = vpop.f32.mrf.mxu3  ;;  %v2872_v55 = vadd.f32 %v318_v54, %v102_v28  ;;  %v347_v58 = vpop.f32.mrf.mxu1 }
  0xd2   :  { %v2870_v39 = vadd.f32 %v402_v46, %v2824_v45  ;;  %v2874_v36 = vadd.f32 %v347_v58, %v103_v30  ;;  %v304_v46 = vadd.f32 %v303_v24, %v102_v28  ;;  %v391_v24 = vadd.f32 %v2816_v31, %v2824_v45 }
  0xd3   :  { %3208 = vst [vmem:[#allocation16_spill] sm:$0xff] %v2867_v27 }
  0xd4   :  { %3209 = vst [vmem:[#allocation17_spill] sm:$0xff] %v2870_v39 }
  0xd5   :  { %3210 = vst [vmem:[#allocation18_spill] sm:$0xff] %v2872_v55  ;;  %v333_v55 = vadd.f32 %v332_v25, %v103_v30 }
  0xd6   :  { %3211 = vst [vmem:[#allocation19_spill] sm:$0xff] %v2874_v36 }
  0xd8   :  { %v376_v63 = vpop.f32.mrf.mxu2  ;;  %v320_v19 = vpop.f32.mrf.mxu0 }
  0xd9   :  { %v2877_v5 = vadd.f32 %v376_v63, %v2822_v42  ;;  %v405_v18 = vpop.f32.mrf.mxu3  ;;  %v2882_v23 = vadd.f32 %v320_v19, %v102_v28  ;;  %v349_v27 = vpop.f32.mrf.mxu1 }
  0xda   :  { %v2880_v16 = vadd.f32 %v405_v18, %v2824_v45  ;;  %v2884_v6 = vadd.f32 %v349_v27, %v103_v30 }
  0xdb   :  { %3212 = vst [vmem:[#allocation20_spill] sm:$0xff] %v2877_v5 }
  0xdc   :  { %3213 = vst [vmem:[#allocation21_spill] sm:$0xff] %v2880_v16 }
  0xdd   :  { %3214 = vst [vmem:[#allocation22_spill] sm:$0xff] %v2882_v23 }
  0xde   :  { %3215 = vst [vmem:[#allocation23_spill] sm:$0xff] %v2884_v6 }
  0xe0   :  { %v378_v54 = vpop.f32.mrf.mxu2  ;;  %v623_v39 = vpop.f32.mrf.mxu0 }
  0xe1   :  { %v2887_v58 = vadd.f32 %v378_v54, %v2822_v42  ;;  %v407_v36 = vpop.f32.mrf.mxu3  ;;  %v666_v5 = vadd.f32 %v623_v39, %v304_v46  ;;  %v636_v17 = vpop.f32.mrf.mxu1 }
  0xe2   :  { %v2890_v63 = vadd.f32 %v407_v36, %v2824_v45  ;;  %v667_v18 = vadd.f32 %v636_v17, %v333_v55 }
  0xe3   :  { %3216 = vst [vmem:[#allocation24_spill] sm:$0xff] %v2887_v58  ;;  %v1965_v16 = vmul.f32 -1.442695, %v666_v5 }
  0xe4   :  { %3217 = vst [vmem:[#allocation25_spill] sm:$0xff] %v2890_v63  ;;  %v1966_v19 = vmul.f32 -1.442695, %v667_v18 }
  0xe5   :  { %2087 = vpow2.f32 %v1965_v16  ;;  %v362_v16 = vadd.f32 %v2814_v29, %v2822_v42 }
  0xe6   :  { %2089 = vpow2.f32 %v1966_v19 }
  0xe8   :  { %v649_v28 = vpop.f32.mrf.mxu2  ;;  %v625_v30 = vpop.f32.mrf.mxu0 }
  0xe9   :  { %v662_v25 = vpop.f32.mrf.mxu3  ;;  %v638_v54 = vpop.f32.mrf.mxu1  ;;  %v668_v45 = vadd.f32 %v649_v28, %v362_v16 }
  0xea   :  { %v669_v27 = vadd.f32 %v662_v25, %v391_v24 }
  0xeb   :  { %v2088_v58 = vpop.eup %2087 }
  0xec   :  { %v1967_v6 = vmul.f32 -1.442695, %v669_v27  ;;  %v2090_v23 = vpop.eup %2089  ;;  %v673_v36 = vadd.f32 1.0, %v2088_v58 }
  0xed   :  { %v692_v63 = vadd.f32 1.0, %v2090_v23 }
  0xee   :  { %2091 = vpow2.f32 %v1967_v6  ;;  %v685_v58 = vand.u32 2147483648, %v673_v36  ;;  %v683_v30 = vand.u32 2147483647, %v673_v36  ;;  %vm679_vm2 = vweird.f32 %v673_v36 }
  0xef   :  { %2093 = vrcp.f32 %v673_v36  ;;  %v704_v6 = vand.u32 2147483648, %v692_v63  ;;  %v702_v54 = vand.u32 2147483647, %v692_v63  ;;  %vm698_vm3 = vweird.f32 %v692_v63 }
  0xf0   :  { %2095 = vrcp.f32 %v692_v63  ;;  %v651_v17 = vpop.f32.mrf.mxu2  ;;  %v686_v28 = vor.u32 1.1754944e-38, %v685_v58  ;;  %vm684_vm5 = vcmp.eq.f32.partialorder %v683_v30, 8.507059e+37 }
  0xf1   :  { %v664_v39 = vpop.f32.mrf.mxu3  ;;  %vm703_vm7 = vcmp.eq.f32.partialorder %v702_v54, 8.507059e+37 }
  0xf2   :  { %v705_v39 = vor.u32 1.1754944e-38, %v704_v6 }
  0xf4   :  { %v2092_v55 = vpop.eup %2091 }
  0xf5   :  { %v2094_v31 = vpop.eup %2093  ;;  %v712_v5 = vadd.f32 1.0, %v2092_v55 }
  0xf6   :  { %v2096_v46 = vpop.eup %2095  ;;  %v675_v18 = vmul.f32 %v2094_v31, %v673_v36  ;;  %vm680_vm0 = vweird.f32 %v2094_v31 }
  0xf7   :  { %v694_v19 = vmul.f32 %v2096_v46, %v692_v63  ;;  %2097 = vrcp.f32 %v712_v5  ;;  %vm699_vm1 = vweird.f32 %v2096_v46  ;;  %vm681_vm4 = vmor %vm679_vm2, %vm680_vm0  ;;  %vm718_vm10 = vweird.f32 %v712_v5 }
  0xf8   :  { %v676_v24 = vsub.f32 1.0, %v675_v18  ;;  %2099 = vtanh.f32 %v668_v45  ;;  %vm700_vm6 = vmor %vm698_vm3, %vm699_vm1 }
  0xf9   :  { %v695_v25 = vsub.f32 1.0, %v694_v19 }
  0xfa   :  { %v677_v23 = vmul.f32 %v2094_v31, %v676_v24  ;;  %v2896_v24 = vpop.permute.xlu0 %444 }
  0xfb   :  { %v696_v27 = vmul.f32 %v2096_v46, %v695_v25  ;;  %vm1968_vm8 = vcmp.gt.s32.totalorder %v2896_v24, 0 }
  0xfc   :  { %v678_v29 = vadd.f32 %v2094_v31, %v677_v23  ;;  %vm2072_vm13 = vmpackc.low %vm1968_vm8, %vm1968_vm8 }
  0xfd   :  { %v2098_v42 = vpop.eup %2097  ;;  %v697_v17 = vadd.f32 %v2096_v46, %v696_v27 }
  0xfe   :  { %v682_v16 = vsel %vm681_vm4, %v2094_v31, %v678_v29  ;;  %v714_v55 = vmul.f32 %v2098_v42, %v712_v5  ;;  %v2100_v45 = vpop.eup %2099  ;;  %vm719_vm9 = vweird.f32 %v2098_v42  ;;  %v724_v31 = vand.u32 2147483648, %v712_v5 }
  0xff   :  { %v687_v18 = vsel %vm684_vm5, %v686_v28, %v682_v16  ;;  %v701_v19 = vsel %vm700_vm6, %v2096_v46, %v697_v17  ;;  %v722_v46 = vand.u32 2147483647, %v712_v5  ;;  %vm720_vm11 = vmor %vm718_vm10, %vm719_vm9 }
 0x100   :  { %v706_v25 = vsel %vm703_vm7, %v705_v39, %v701_v19  ;;  %v729_v12 = vmul.f32 %v2100_v45, %v687_v18  ;;  %v715_v23 = vsub.f32 1.0, %v714_v55  ;;  %v725_v27 = vor.u32 1.1754944e-38, %v724_v31 }
 0x101   :  { %v728_v36 = vmul.f32 0.0, %v706_v25  ;;  %vm723_vm12 = vcmp.eq.f32.partialorder %v722_v46, 8.507059e+37  ;;  %vm1972_vm7 = vcmp.gt.s32.totalorder %v2896_v24, 1 }
 0x102   :  { %v716_v0 = vmul.f32 %v2098_v42, %v715_v23 }
 0x103   :  { %v730_v63 = vadd.f32 %v729_v12, %v728_v36 }
 0x104   :  { %v717_v58 = vadd.f32 %v2098_v42, %v716_v0 }
 0x105   :  { %2101 = vtanh.f32 %v730_v63  ;;  %v2901_v6 = vsel %vm1968_vm8, %v730_v63, 0.0 }
 0x106   :  { %v721_v30 = vsel %vm720_vm11, %v2098_v42, %v717_v58 }
 0x107   :  { %v726_v29 = vsel %vm723_vm12, %v725_v27, %v721_v30 }
 0x10b   :  { %v2102_v54 = vpop.eup %2101 }
 0x10c   :  { %v732_v28 = vmul.f32 %v2102_v54, %v726_v29 }
 0x10e   :  { %v2908_v0 = vsel %vm1968_vm8, %v732_v28, 0.0  ;;  %v2073_v12 = vpack.c.bf16 %v732_v28, %v732_v28 }
 0x10f   :  { %v738_v17 = vpack.c.bf16 %v2908_v0, %v2908_v0 }
 0x110   :  { %2074 = vmatmul.msk.bf16.vlgmr.msra.gmra.mxu0 %vm2072_vm13, %v2073_v12  ;;  %2077 = vmatmul.msk.bf16.vlgmr.msra.gmra.mxu1 %vm2072_vm13, %v2073_v12 }
 0x111   :  { %739 = vst [vmem:[%s3195_s5] sm:$0xf] %v738_v17  ;;  %2080 = vmatmul.msk.bf16.vlgmr.msra.gmra.mxu2 %vm2072_vm13, %v2073_v12  ;;  %2083 = vmatmul.msk.bf16.vlgmr.msra.gmra.mxu3 %vm2072_vm13, %v2073_v12 }
 0x112   :  { %1014 = vmatpush.bf16.msra.mxu0 %v2459_v37  ;;  %1027 = vmatpush.bf16.msra.mxu1 %v2470_v41 }
 0x113   :  { %1040 = vmatpush.bf16.msra.mxu2 %v2487_v47  ;;  %1053 = vmatpush.bf16.msra.mxu3 %v2490_v48 }
 0x116   :  { %1015 = vmatpush.bf16.msra.mxu0 %v2492_v49  ;;  %1028 = vmatpush.bf16.msra.mxu1 %v2504_v53 }
 0x117   :  { %1041 = vmatpush.bf16.msra.mxu2 %v2522_v59  ;;  %1054 = vmatpush.bf16.msra.mxu3 %v2526_v60 }
 0x11a   :  { %1016 = vmatpush.bf16.msra.mxu0 %v2528_v61  ;;  %1029 = vmatpush.bf16.msra.mxu1 %v2540_v1 }
 0x11b   :  { %1042 = vmatpush.bf16.msra.mxu2 %v2558_v7  ;;  %1055 = vmatpush.bf16.msra.mxu3 %v2562_v8 }
 0x11e   :  { %1017 = vmatpush.bf16.msra.mxu0 %v2564_v9  ;;  %1030 = vmatpush.bf16.msra.mxu1 %v2576_v13 }
 0x11f   :  { %1043 = vmatpush.bf16.msra.mxu2 %v2597_v20  ;;  %1056 = vmatpush.bf16.msra.mxu3 %v2601_v21 }
 0x122   :  { %1018 = vmatpush.bf16.msra.mxu0 %v2603_v22  ;;  %1031 = vmatpush.bf16.msra.mxu1 %v2615_v26 }
 0x123   :  { %1044 = vmatpush.bf16.msra.mxu2 %v2633_v32  ;;  %1057 = vmatpush.bf16.msra.mxu3 %v2637_v33 }
 0x126   :  { %1019 = vmatpush.bf16.msra.mxu0 %v2639_v34  ;;  %1032 = vmatpush.bf16.msra.mxu1 %v2642_v35 }
 0x127   :  { %1045 = vmatpush.bf16.msra.mxu2 %v2678_v52  ;;  %1058 = vmatpush.bf16.msra.mxu3 %v2662_v43 }
 0x12a   :  { %1020 = vmatpush.bf16.msra.mxu0 %v2664_v44  ;;  %1033 = vmatpush.bf16.msra.mxu1 %v2676_v51 }
 0x12b   :  { %1046 = vmatpush.bf16.msra.mxu2 %v2711_v4  ;;  %1059 = vmatpush.bf16.msra.mxu3 %v2707_v2 }
 0x12e   :  { %1021 = vmatpush.bf16.msra.mxu0 %v2709_v3  ;;  %1034 = vmatpush.bf16.msra.mxu1 %v2720_v10 }
 0x12f   :  { %1047 = vmatpush.bf16.msra.mxu2 %v2729_v14  ;;  %1060 = vmatpush.bf16.msra.mxu3 %v2733_v15 }
 0x18d   :  { %v755_v5 = vpop.f32.mrf.mxu0  ;;  %v768_v42 = vpop.f32.mrf.mxu1 }
 0x18e   :  { %v798_v39 = vadd.f32 %v755_v5, %v2818_v38  ;;  %v799_v16 = vadd.f32 %v768_v42, %v2820_v40 }
 0x190   :  { %v1969_v55 = vmul.f32 -1.442695, %v798_v39  ;;  %v1970_v45 = vmul.f32 -1.442695, %v799_v16 }
 0x192   :  { %2103 = vpow2.f32 %v1969_v55 }
 0x193   :  { %2105 = vpow2.f32 %v1970_v45 }
 0x194   :  { %v781_v18 = vpop.f32.mrf.mxu2  ;;  %v794_v19 = vpop.f32.mrf.mxu3 }
 0x195   :  { %v801_v25 = vadd.f32 %v794_v19, %v2830_v56  ;;  %v757_v23 = vpop.f32.mrf.mxu0  ;;  %v770_v36 = vpop.f32.mrf.mxu1  ;;  %v800_v28 = vadd.f32 %v781_v18, %v2827_v50 }
 0x197   :  { %v1971_v63 = vmul.f32 -1.442695, %v801_v25 }
 0x198   :  { %v2104_v58 = vpop.eup %2103 }
 0x199   :  { %v2106_v31 = vpop.eup %2105  ;;  %v805_v46 = vadd.f32 1.0, %v2104_v58  ;;  %2107 = vpow2.f32 %v1971_v63 }
 0x19a   :  { %v824_v30 = vadd.f32 1.0, %v2106_v31 }
 0x19b   :  { %2109 = vrcp.f32 %v805_v46  ;;  %v817_v39 = vand.u32 2147483648, %v805_v46  ;;  %v815_v45 = vand.u32 2147483647, %v805_v46  ;;  %vm811_vm0 = vweird.f32 %v805_v46 }
 0x19c   :  { %2111 = vrcp.f32 %v824_v30  ;;  %v783_v38 = vpop.f32.mrf.mxu2  ;;  %v796_v40 = vpop.f32.mrf.mxu3  ;;  %v836_v16 = vand.u32 2147483648, %v824_v30  ;;  %v834_v25 = vand.u32 2147483647, %v824_v30  ;;  %vm830_vm1 = vweird.f32 %v824_v30 }
 0x19d   :  { %v818_v50 = vor.u32 1.1754944e-38, %v817_v39  ;;  %vm816_vm4 = vcmp.eq.f32.partialorder %v815_v45, 8.507059e+37 }
 0x19e   :  { %v837_v58 = vor.u32 1.1754944e-38, %v836_v16  ;;  %vm835_vm5 = vcmp.eq.f32.partialorder %v834_v25, 8.507059e+37 }
 0x19f   :  { %v2108_v27 = vpop.eup %2107 }
 0x1a0   :  { %v844_v54 = vadd.f32 1.0, %v2108_v27 }
 0x1a1   :  { %v2110_v29 = vpop.eup %2109 }
 0x1a2   :  { %v2112_v12 = vpop.eup %2111  ;;  %v807_v17 = vmul.f32 %v2110_v29, %v805_v46  ;;  %2113 = vrcp.f32 %v844_v54  ;;  %vm812_vm14 = vweird.f32 %v2110_v29  ;;  %v856_v39 = vand.u32 2147483648, %v844_v54 }
 0x1a3   :  { %v826_v56 = vmul.f32 %v2112_v12, %v824_v30  ;;  %2115 = vtanh.f32 %v800_v28  ;;  %vm831_vm15 = vweird.f32 %v2112_v12  ;;  %vm813_vm2 = vmor %vm811_vm0, %vm812_vm14  ;;  %vm850_vm8 = vweird.f32 %v844_v54 }
 0x1a4   :  { %v808_v5 = vsub.f32 1.0, %v807_v17  ;;  %vm832_vm3 = vmor %vm830_vm1, %vm831_vm15  ;;  %v854_v16 = vand.u32 2147483647, %v844_v54 }
 0x1a5   :  { %v827_v42 = vsub.f32 1.0, %v826_v56 }
 0x1a6   :  { %v809_v55 = vmul.f32 %v2110_v29, %v808_v5  ;;  %vm855_vm10 = vcmp.eq.f32.partialorder %v854_v16, 8.507059e+37 }
 0x1a7   :  { %v828_v19 = vmul.f32 %v2112_v12, %v827_v42 }
 0x1a8   :  { %v2114_v23 = vpop.eup %2113  ;;  %v810_v36 = vadd.f32 %v2110_v29, %v809_v55  ;;  %v857_v55 = vor.u32 1.1754944e-38, %v856_v39 }
 0x1a9   :  { %v829_v18 = vadd.f32 %v2112_v12, %v828_v19  ;;  %v846_v63 = vmul.f32 %v2114_v23, %v844_v54  ;;  %v2116_v38 = vpop.eup %2115  ;;  %vm851_vm6 = vweird.f32 %v2114_v23 }
 0x1aa   :  { %v814_v31 = vsel %vm813_vm2, %v2110_v29, %v810_v36  ;;  %vm852_vm9 = vmor %vm850_vm8, %vm851_vm6 }
 0x1ab   :  { %v819_v40 = vsel %vm816_vm4, %v818_v50, %v814_v31  ;;  %v833_v27 = vsel %vm832_vm3, %v2112_v12, %v829_v18  ;;  %v847_v28 = vsub.f32 1.0, %v846_v63  ;;  %vm1977_vm4 = vcmp.gt.s32.totalorder %v2896_v24, 2 }
 0x1ac   :  { %v838_v17 = vsel %vm835_vm5, %v837_v58, %v833_v27  ;;  %v861_v56 = vmul.f32 %v2116_v38, %v819_v40 }
 0x1ad   :  { %v860_v5 = vmul.f32 %v838_v17, %v2901_v6  ;;  %v848_v42 = vmul.f32 %v2114_v23, %v847_v28 }
 0x1af   :  { %v862_v46 = vadd.f32 %v861_v56, %v860_v5  ;;  %v849_v30 = vadd.f32 %v2114_v23, %v848_v42 }
 0x1b1   :  { %2117 = vtanh.f32 %v862_v46  ;;  %v2954_v29 = vsel %vm1972_vm7, %v862_v46, %v2901_v6  ;;  %v853_v12 = vsel %vm852_vm9, %v2114_v23, %v849_v30 }
 0x1b2   :  { %v858_v19 = vsel %vm855_vm10, %v857_v55, %v853_v12  ;;  %v3218_v55 = vld [vmem:[#allocation5_spill] sm:$0xff] }
 0x1b7   :  { %v2118_v45 = vpop.eup %2117 }
 0x1b8   :  { %v864_v25 = vmul.f32 %v2118_v45, %v858_v19 }
 0x1ba   :  { %v2957_v36 = vsel %vm1972_vm7, %v864_v25, %v2908_v0  ;;  %v870_v50 = vsel %vm1972_vm7, %v864_v25, 0.0 }
 0x1bb   :  { %v871_v18 = vpack.c.bf16 %v870_v50, %v870_v50  ;;  %v879_v63 = vpack.c.bf16 %v2957_v36, %v2957_v36 }
 0x1bd   :  { %1973 = vst [vmem:[%s3195_s5 + $0x4] sm:$0xf] %v871_v18  ;;  %888 = vmatmul.bf16.vlgmr.msrb.gmra.mxu0 %v879_v63  ;;  %901 = vmatmul.bf16.vlgmr.msrb.gmra.mxu1 %v879_v63 }
 0x1be   :  { %914 = vmatmul.bf16.vlgmr.msrb.gmra.mxu2 %v879_v63  ;;  %927 = vmatmul.bf16.vlgmr.msrb.gmra.mxu3 %v879_v63 }
 0x1bf   :  { %1148 = vmatpush.bf16.msrb.mxu0 %v2459_v37  ;;  %1161 = vmatpush.bf16.msrb.mxu1 %v2470_v41 }
 0x1c0   :  { %1174 = vmatpush.bf16.msrb.mxu2 %v2487_v47  ;;  %1187 = vmatpush.bf16.msrb.mxu3 %v2490_v48 }
 0x1c3   :  { %1149 = vmatpush.bf16.msrb.mxu0 %v2492_v49  ;;  %1162 = vmatpush.bf16.msrb.mxu1 %v2504_v53 }
 0x1c4   :  { %1175 = vmatpush.bf16.msrb.mxu2 %v2522_v59  ;;  %1188 = vmatpush.bf16.msrb.mxu3 %v2526_v60 }
 0x1c7   :  { %1150 = vmatpush.bf16.msrb.mxu0 %v2528_v61  ;;  %1163 = vmatpush.bf16.msrb.mxu1 %v2540_v1 }
 0x1c8   :  { %1176 = vmatpush.bf16.msrb.mxu2 %v2558_v7  ;;  %1189 = vmatpush.bf16.msrb.mxu3 %v2562_v8 }
 0x1cb   :  { %1151 = vmatpush.bf16.msrb.mxu0 %v2564_v9  ;;  %1164 = vmatpush.bf16.msrb.mxu1 %v2576_v13 }
 0x1cc   :  { %1177 = vmatpush.bf16.msrb.mxu2 %v2597_v20  ;;  %1190 = vmatpush.bf16.msrb.mxu3 %v2601_v21 }
 0x1cf   :  { %1152 = vmatpush.bf16.msrb.mxu0 %v2603_v22  ;;  %1165 = vmatpush.bf16.msrb.mxu1 %v2615_v26 }
 0x1d0   :  { %1178 = vmatpush.bf16.msrb.mxu2 %v2633_v32  ;;  %1191 = vmatpush.bf16.msrb.mxu3 %v2637_v33 }
 0x1d3   :  { %1153 = vmatpush.bf16.msrb.mxu0 %v2639_v34  ;;  %1166 = vmatpush.bf16.msrb.mxu1 %v2642_v35 }
 0x1d4   :  { %1179 = vmatpush.bf16.msrb.mxu2 %v2678_v52  ;;  %1192 = vmatpush.bf16.msrb.mxu3 %v2662_v43 }
 0x1d7   :  { %1154 = vmatpush.bf16.msrb.mxu0 %v2664_v44  ;;  %1167 = vmatpush.bf16.msrb.mxu1 %v2676_v51 }
 0x1d8   :  { %1180 = vmatpush.bf16.msrb.mxu2 %v2711_v4  ;;  %1193 = vmatpush.bf16.msrb.mxu3 %v2707_v2 }
 0x1db   :  { %1155 = vmatpush.bf16.msrb.mxu0 %v2709_v3  ;;  %1168 = vmatpush.bf16.msrb.mxu1 %v2720_v10 }
 0x1dc   :  { %1181 = vmatpush.bf16.msrb.mxu2 %v2729_v14  ;;  %1194 = vmatpush.bf16.msrb.mxu3 %v2733_v15 }
 0x23a   :  { %v889_v6 = vpop.f32.mrf.mxu0  ;;  %v902_v0 = vpop.f32.mrf.mxu1 }
 0x23b   :  { %v932_v54 = vadd.f32 %v889_v6, %v2832_v57  ;;  %v933_v23 = vadd.f32 %v902_v0, %v2834_v62 }
 0x23d   :  { %v1974_v58 = vmul.f32 -1.442695, %v932_v54  ;;  %v1975_v31 = vmul.f32 -1.442695, %v933_v23 }
 0x23f   :  { %2119 = vpow2.f32 %v1974_v58 }
 0x240   :  { %2121 = vpow2.f32 %v1975_v31 }
 0x241   :  { %v915_v38 = vpop.f32.mrf.mxu2  ;;  %v928_v40 = vpop.f32.mrf.mxu3 }
 0x242   :  { %v935_v27 = vadd.f32 %v928_v40, %v2840_v11  ;;  %v891_v28 = vpop.f32.mrf.mxu0  ;;  %v904_v17 = vpop.f32.mrf.mxu1  ;;  %v934_v45 = vadd.f32 %v915_v38, %v3218_v55 }
 0x244   :  { %v1976_v56 = vmul.f32 -1.442695, %v935_v27 }
 0x245   :  { %v2120_v5 = vpop.eup %2119 }
 0x246   :  { %v2122_v42 = vpop.eup %2121  ;;  %v939_v46 = vadd.f32 1.0, %v2120_v5  ;;  %2123 = vpow2.f32 %v1976_v56 }
 0x247   :  { %v958_v30 = vadd.f32 1.0, %v2122_v42 }
 0x248   :  { %2125 = vrcp.f32 %v939_v46  ;;  %v951_v63 = vand.u32 2147483648, %v939_v46  ;;  %v949_v54 = vand.u32 2147483647, %v939_v46  ;;  %vm945_vm13 = vweird.f32 %v939_v46 }
 0x249   :  { %2127 = vrcp.f32 %v958_v30  ;;  %v917_v57 = vpop.f32.mrf.mxu2  ;;  %v930_v62 = vpop.f32.mrf.mxu3  ;;  %v970_v6 = vand.u32 2147483648, %v958_v30  ;;  %v968_v58 = vand.u32 2147483647, %v958_v30  ;;  %vm964_vm14 = vweird.f32 %v958_v30 }
 0x24a   :  { %v952_v38 = vor.u32 1.1754944e-38, %v951_v63  ;;  %vm950_vm1 = vcmp.eq.f32.partialorder %v949_v54, 8.507059e+37 }
 0x24b   :  { %v971_v17 = vor.u32 1.1754944e-38, %v970_v6  ;;  %vm969_vm2 = vcmp.eq.f32.partialorder %v968_v58, 8.507059e+37 }
 0x24c   :  { %v2124_v39 = vpop.eup %2123 }
 0x24d   :  { %v978_v16 = vadd.f32 1.0, %v2124_v39 }
 0x24e   :  { %v2126_v12 = vpop.eup %2125 }
 0x24f   :  { %v2128_v19 = vpop.eup %2127  ;;  %v941_v25 = vmul.f32 %v2126_v12, %v939_v46  ;;  %2129 = vrcp.f32 %v978_v16  ;;  %vm946_vm11 = vweird.f32 %v2126_v12  ;;  %vm984_vm5 = vweird.f32 %v978_v16 }
 0x250   :  { %v960_v11 = vmul.f32 %v2128_v19, %v958_v30  ;;  %2131 = vtanh.f32 %v934_v45  ;;  %vm965_vm12 = vweird.f32 %v2128_v19  ;;  %vm947_vm15 = vmor %vm945_vm13, %vm946_vm11 }
 0x251   :  { %v942_v50 = vsub.f32 1.0, %v941_v25  ;;  %vm966_vm0 = vmor %vm964_vm14, %vm965_vm12 }
 0x252   :  { %v961_v18 = vsub.f32 1.0, %v960_v11  ;;  %v990_v11 = vand.u32 2147483648, %v978_v16 }
 0x253   :  { %v943_v0 = vmul.f32 %v2126_v12, %v942_v50  ;;  %v988_v50 = vand.u32 2147483647, %v978_v16 }
 0x254   :  { %v962_v23 = vmul.f32 %v2128_v19, %v961_v18  ;;  %v991_v18 = vor.u32 1.1754944e-38, %v990_v11 }
 0x255   :  { %v2130_v31 = vpop.eup %2129  ;;  %v944_v40 = vadd.f32 %v2126_v12, %v943_v0  ;;  %vm989_vm7 = vcmp.eq.f32.partialorder %v988_v50, 8.507059e+37 }
 0x256   :  { %v963_v27 = vadd.f32 %v2128_v19, %v962_v23  ;;  %v980_v28 = vmul.f32 %v2130_v31, %v978_v16  ;;  %v2132_v5 = vpop.eup %2131  ;;  %vm985_vm3 = vweird.f32 %v2130_v31  ;;  %v3219_v16 = vld [vmem:[#allocation6_spill] sm:$0xff] }
 0x257   :  { %v948_v56 = vsel %vm947_vm15, %v2126_v12, %v944_v40  ;;  %vm986_vm6 = vmor %vm984_vm5, %vm985_vm3 }
 0x258   :  { %v953_v42 = vsel %vm950_vm1, %v952_v38, %v948_v56  ;;  %v967_v57 = vsel %vm966_vm0, %v2128_v19, %v963_v27  ;;  %v981_v62 = vsub.f32 1.0, %v980_v28  ;;  %v3220_v38 = vld [vmem:[#allocation7_spill] sm:$0xff]  ;;  %vm1982_vm1 = vcmp.gt.s32.totalorder %v2896_v24, 3 }
 0x259   :  { %v972_v39 = vsel %vm969_vm2, %v971_v17, %v967_v57  ;;  %v995_v55 = vmul.f32 %v2132_v5, %v953_v42  ;;  %v3221_v42 = vld [vmem:[#allocation9_spill] sm:$0xff] }
 0x25a   :  { %v994_v45 = vmul.f32 %v972_v39, %v2954_v29  ;;  %v982_v25 = vmul.f32 %v2130_v31, %v981_v62 }
 0x25c   :  { %v996_v46 = vadd.f32 %v995_v55, %v994_v45  ;;  %v983_v30 = vadd.f32 %v2130_v31, %v982_v25 }
 0x25e   :  { %2133 = vtanh.f32 %v996_v46  ;;  %v3003_v12 = vsel %vm1977_vm4, %v996_v46, %v2954_v29  ;;  %v987_v19 = vsel %vm986_vm6, %v2130_v31, %v983_v30 }
 0x25f   :  { %v992_v6 = vsel %vm989_vm7, %v991_v18, %v987_v19 }
 0x264   :  { %v2134_v63 = vpop.eup %2133 }
 0x265   :  { %v998_v0 = vmul.f32 %v2134_v63, %v992_v6  ;;  %v3222_v6 = vld [vmem:[#allocation8_spill] sm:$0xff] }
 0x267   :  { %v3006_v54 = vsel %vm1977_vm4, %v998_v0, %v2957_v36  ;;  %v1004_v23 = vsel %vm1977_vm4, %v998_v0, 0.0 }
 0x268   :  { %v1005_v58 = vpack.c.bf16 %v1004_v23, %v1004_v23  ;;  %v1013_v40 = vpack.c.bf16 %v3006_v54, %v3006_v54 }
 0x26a   :  { %1978 = vst [vmem:[%s3195_s5 + $0x8] sm:$0xf] %v1005_v58  ;;  %1022 = vmatmul.bf16.vlgmr.msra.gmra.mxu0 %v1013_v40  ;;  %1035 = vmatmul.bf16.vlgmr.msra.gmra.mxu1 %v1013_v40 }
 0x26b   :  { %1048 = vmatmul.bf16.vlgmr.msra.gmra.mxu2 %v1013_v40  ;;  %1061 = vmatmul.bf16.vlgmr.msra.gmra.mxu3 %v1013_v40 }
 0x26c   :  { %1282 = vmatpush.bf16.msra.mxu0 %v2459_v37  ;;  %1295 = vmatpush.bf16.msra.mxu1 %v2470_v41 }
 0x26d   :  { %1308 = vmatpush.bf16.msra.mxu2 %v2487_v47  ;;  %1321 = vmatpush.bf16.msra.mxu3 %v2490_v48 }
 0x270   :  { %1283 = vmatpush.bf16.msra.mxu0 %v2492_v49  ;;  %1296 = vmatpush.bf16.msra.mxu1 %v2504_v53 }
 0x271   :  { %1309 = vmatpush.bf16.msra.mxu2 %v2522_v59  ;;  %1322 = vmatpush.bf16.msra.mxu3 %v2526_v60 }
 0x274   :  { %1284 = vmatpush.bf16.msra.mxu0 %v2528_v61  ;;  %1297 = vmatpush.bf16.msra.mxu1 %v2540_v1 }
 0x275   :  { %1310 = vmatpush.bf16.msra.mxu2 %v2558_v7  ;;  %1323 = vmatpush.bf16.msra.mxu3 %v2562_v8 }
 0x278   :  { %1285 = vmatpush.bf16.msra.mxu0 %v2564_v9  ;;  %1298 = vmatpush.bf16.msra.mxu1 %v2576_v13 }
 0x279   :  { %1311 = vmatpush.bf16.msra.mxu2 %v2597_v20  ;;  %1324 = vmatpush.bf16.msra.mxu3 %v2601_v21 }
 0x27c   :  { %1286 = vmatpush.bf16.msra.mxu0 %v2603_v22  ;;  %1299 = vmatpush.bf16.msra.mxu1 %v2615_v26 }
 0x27d   :  { %1312 = vmatpush.bf16.msra.mxu2 %v2633_v32  ;;  %1325 = vmatpush.bf16.msra.mxu3 %v2637_v33 }
 0x280   :  { %1287 = vmatpush.bf16.msra.mxu0 %v2639_v34  ;;  %1300 = vmatpush.bf16.msra.mxu1 %v2642_v35 }
 0x281   :  { %1313 = vmatpush.bf16.msra.mxu2 %v2678_v52  ;;  %1326 = vmatpush.bf16.msra.mxu3 %v2662_v43 }
 0x284   :  { %1288 = vmatpush.bf16.msra.mxu0 %v2664_v44  ;;  %1301 = vmatpush.bf16.msra.mxu1 %v2676_v51 }
 0x285   :  { %1314 = vmatpush.bf16.msra.mxu2 %v2711_v4  ;;  %1327 = vmatpush.bf16.msra.mxu3 %v2707_v2 }
 0x288   :  { %1289 = vmatpush.bf16.msra.mxu0 %v2709_v3  ;;  %1302 = vmatpush.bf16.msra.mxu1 %v2720_v10 }
 0x289   :  { %1315 = vmatpush.bf16.msra.mxu2 %v2729_v14  ;;  %1328 = vmatpush.bf16.msra.mxu3 %v2733_v15 }
 0x2e7   :  { %v1023_v29 = vpop.f32.mrf.mxu0  ;;  %v1036_v36 = vpop.f32.mrf.mxu1 }
 0x2e8   :  { %v1066_v31 = vadd.f32 %v1023_v29, %v3219_v16  ;;  %v1067_v27 = vadd.f32 %v1036_v36, %v3220_v38 }
 0x2ea   :  { %v1979_v28 = vmul.f32 -1.442695, %v1066_v31  ;;  %v1980_v17 = vmul.f32 -1.442695, %v1067_v27 }
 0x2ec   :  { %2135 = vpow2.f32 %v1979_v28 }
 0x2ed   :  { %2137 = vpow2.f32 %v1980_v17 }
 0x2ee   :  { %v1049_v56 = vpop.f32.mrf.mxu2  ;;  %v1062_v5 = vpop.f32.mrf.mxu3 }
 0x2ef   :  { %v1069_v57 = vadd.f32 %v1062_v5, %v3221_v42  ;;  %v1025_v62 = vpop.f32.mrf.mxu0  ;;  %v1038_v39 = vpop.f32.mrf.mxu1  ;;  %v1068_v0 = vadd.f32 %v1049_v56, %v3222_v6 }
 0x2f1   :  { %v1981_v55 = vmul.f32 -1.442695, %v1069_v57 }
 0x2f2   :  { %v2136_v45 = vpop.eup %2135 }
 0x2f3   :  { %v2138_v25 = vpop.eup %2137  ;;  %v1073_v46 = vadd.f32 1.0, %v2136_v45  ;;  %2139 = vpow2.f32 %v1981_v55 }
 0x2f4   :  { %v1092_v30 = vadd.f32 1.0, %v2138_v25 }
 0x2f5   :  { %2141 = vrcp.f32 %v1073_v46  ;;  %v1085_v16 = vand.u32 2147483648, %v1073_v46  ;;  %v1083_v27 = vand.u32 2147483647, %v1073_v46  ;;  %vm1079_vm10 = vweird.f32 %v1073_v46 }
 0x2f6   :  { %2143 = vrcp.f32 %v1092_v30  ;;  %v1051_v11 = vpop.f32.mrf.mxu2  ;;  %v1064_v50 = vpop.f32.mrf.mxu3  ;;  %v1104_v31 = vand.u32 2147483648, %v1092_v30  ;;  %v1102_v17 = vand.u32 2147483647, %v1092_v30  ;;  %vm1098_vm11 = vweird.f32 %v1092_v30 }
 0x2f7   :  { %v1086_v56 = vor.u32 1.1754944e-38, %v1085_v16  ;;  %vm1084_vm14 = vcmp.eq.f32.partialorder %v1083_v27, 8.507059e+37 }
 0x2f8   :  { %v1105_v39 = vor.u32 1.1754944e-38, %v1104_v31  ;;  %vm1103_vm15 = vcmp.eq.f32.partialorder %v1102_v17, 8.507059e+37 }
 0x2f9   :  { %v2140_v19 = vpop.eup %2139 }
 0x2fa   :  { %v1112_v18 = vadd.f32 1.0, %v2140_v19 }
 0x2fb   :  { %v2142_v63 = vpop.eup %2141 }
 0x2fc   :  { %v2144_v23 = vpop.eup %2143  ;;  %v1075_v58 = vmul.f32 %v2142_v63, %v1073_v46  ;;  %2145 = vrcp.f32 %v1112_v18  ;;  %vm1080_vm8 = vweird.f32 %v2142_v63  ;;  %vm1118_vm2 = vweird.f32 %v1112_v18 }
 0x2fd   :  { %v1094_v40 = vmul.f32 %v2144_v23, %v1092_v30  ;;  %2147 = vtanh.f32 %v1068_v0  ;;  %vm1099_vm9 = vweird.f32 %v2144_v23  ;;  %vm1081_vm12 = vmor %vm1079_vm10, %vm1080_vm8 }
 0x2fe   :  { %v1076_v29 = vsub.f32 1.0, %v1075_v58  ;;  %vm1100_vm13 = vmor %vm1098_vm11, %vm1099_vm9 }
 0x2ff   :  { %v1095_v36 = vsub.f32 1.0, %v1094_v40  ;;  %v1124_v40 = vand.u32 2147483648, %v1112_v18 }
 0x300   :  { %v1077_v38 = vmul.f32 %v2142_v63, %v1076_v29  ;;  %v1122_v29 = vand.u32 2147483647, %v1112_v18 }
 0x301   :  { %v1096_v28 = vmul.f32 %v2144_v23, %v1095_v36  ;;  %v1125_v36 = vor.u32 1.1754944e-38, %v1124_v40 }
 0x302   :  { %v2146_v5 = vpop.eup %2145  ;;  %v1078_v42 = vadd.f32 %v2142_v63, %v1077_v38  ;;  %vm1123_vm4 = vcmp.eq.f32.partialorder %v1122_v29, 8.507059e+37 }
 0x303   :  { %v1097_v57 = vadd.f32 %v2144_v23, %v1096_v28  ;;  %v1114_v62 = vmul.f32 %v2146_v5, %v1112_v18  ;;  %v2148_v45 = vpop.eup %2147  ;;  %vm1119_vm0 = vweird.f32 %v2146_v5  ;;  %v3223_v18 = vld [vmem:[#allocation10_spill] sm:$0xff] }
 0x304   :  { %v1082_v55 = vsel %vm1081_vm12, %v2142_v63, %v1078_v42  ;;  %vm1120_vm3 = vmor %vm1118_vm2, %vm1119_vm0 }
 0x305   :  { %v1087_v25 = vsel %vm1084_vm14, %v1086_v56, %v1082_v55  ;;  %v1101_v11 = vsel %vm1100_vm13, %v2144_v23, %v1097_v57  ;;  %v1115_v50 = vsub.f32 1.0, %v1114_v62  ;;  %v3224_v56 = vld [vmem:[#allocation11_spill] sm:$0xff]  ;;  %vm1987_vm14 = vcmp.gt.s32.totalorder %v2896_v24, 4 }
 0x306   :  { %v1106_v19 = vsel %vm1103_vm15, %v1105_v39, %v1101_v11  ;;  %v1129_v6 = vmul.f32 %v2148_v45, %v1087_v25  ;;  %v3225_v25 = vld [vmem:[#allocation13_spill] sm:$0xff] }
 0x307   :  { %v1128_v0 = vmul.f32 %v1106_v19, %v3003_v12  ;;  %v1116_v58 = vmul.f32 %v2146_v5, %v1115_v50 }
 0x309   :  { %v1130_v46 = vadd.f32 %v1129_v6, %v1128_v0  ;;  %v1117_v30 = vadd.f32 %v2146_v5, %v1116_v58 }
 0x30b   :  { %2149 = vtanh.f32 %v1130_v46  ;;  %v3052_v63 = vsel %vm1982_vm1, %v1130_v46, %v3003_v12  ;;  %v1121_v23 = vsel %vm1120_vm3, %v2146_v5, %v1117_v30 }
 0x30c   :  { %v1126_v31 = vsel %vm1123_vm4, %v1125_v36, %v1121_v23 }
 0x311   :  { %v2150_v16 = vpop.eup %2149 }
 0x312   :  { %v1132_v38 = vmul.f32 %v2150_v16, %v1126_v31  ;;  %v3226_v31 = vld [vmem:[#allocation12_spill] sm:$0xff] }
 0x314   :  { %v3055_v27 = vsel %vm1982_vm1, %v1132_v38, %v3006_v54  ;;  %v1138_v28 = vsel %vm1982_vm1, %v1132_v38, 0.0 }
 0x315   :  { %v1139_v17 = vpack.c.bf16 %v1138_v28, %v1138_v28  ;;  %v1147_v42 = vpack.c.bf16 %v3055_v27, %v3055_v27 }
 0x317   :  { %1983 = vst [vmem:[%s3195_s5 + $0xc] sm:$0xf] %v1139_v17  ;;  %1156 = vmatmul.bf16.vlgmr.msrb.gmra.mxu0 %v1147_v42  ;;  %1169 = vmatmul.bf16.vlgmr.msrb.gmra.mxu1 %v1147_v42 }
 0x318   :  { %1182 = vmatmul.bf16.vlgmr.msrb.gmra.mxu2 %v1147_v42  ;;  %1195 = vmatmul.bf16.vlgmr.msrb.gmra.mxu3 %v1147_v42 }
 0x319   :  { %1416 = vmatpush.bf16.msrb.mxu0 %v2459_v37  ;;  %1429 = vmatpush.bf16.msrb.mxu1 %v2470_v41 }
 0x31a   :  { %1442 = vmatpush.bf16.msrb.mxu2 %v2487_v47  ;;  %1455 = vmatpush.bf16.msrb.mxu3 %v2490_v48 }
 0x31d   :  { %1417 = vmatpush.bf16.msrb.mxu0 %v2492_v49  ;;  %1430 = vmatpush.bf16.msrb.mxu1 %v2504_v53 }
 0x31e   :  { %1443 = vmatpush.bf16.msrb.mxu2 %v2522_v59  ;;  %1456 = vmatpush.bf16.msrb.mxu3 %v2526_v60 }
 0x321   :  { %1418 = vmatpush.bf16.msrb.mxu0 %v2528_v61  ;;  %1431 = vmatpush.bf16.msrb.mxu1 %v2540_v1 }
 0x322   :  { %1444 = vmatpush.bf16.msrb.mxu2 %v2558_v7  ;;  %1457 = vmatpush.bf16.msrb.mxu3 %v2562_v8 }
 0x325   :  { %1419 = vmatpush.bf16.msrb.mxu0 %v2564_v9  ;;  %1432 = vmatpush.bf16.msrb.mxu1 %v2576_v13 }
 0x326   :  { %1445 = vmatpush.bf16.msrb.mxu2 %v2597_v20  ;;  %1458 = vmatpush.bf16.msrb.mxu3 %v2601_v21 }
 0x329   :  { %1420 = vmatpush.bf16.msrb.mxu0 %v2603_v22  ;;  %1433 = vmatpush.bf16.msrb.mxu1 %v2615_v26 }
 0x32a   :  { %1446 = vmatpush.bf16.msrb.mxu2 %v2633_v32  ;;  %1459 = vmatpush.bf16.msrb.mxu3 %v2637_v33 }
 0x32d   :  { %1421 = vmatpush.bf16.msrb.mxu0 %v2639_v34  ;;  %1434 = vmatpush.bf16.msrb.mxu1 %v2642_v35 }
 0x32e   :  { %1447 = vmatpush.bf16.msrb.mxu2 %v2678_v52  ;;  %1460 = vmatpush.bf16.msrb.mxu3 %v2662_v43 }
 0x331   :  { %1422 = vmatpush.bf16.msrb.mxu0 %v2664_v44  ;;  %1435 = vmatpush.bf16.msrb.mxu1 %v2676_v51 }
 0x332   :  { %1448 = vmatpush.bf16.msrb.mxu2 %v2711_v4  ;;  %1461 = vmatpush.bf16.msrb.mxu3 %v2707_v2 }
 0x335   :  { %1423 = vmatpush.bf16.msrb.mxu0 %v2709_v3  ;;  %1436 = vmatpush.bf16.msrb.mxu1 %v2720_v10 }
 0x336   :  { %1449 = vmatpush.bf16.msrb.mxu2 %v2729_v14  ;;  %1462 = vmatpush.bf16.msrb.mxu3 %v2733_v15 }
 0x394   :  { %v1157_v12 = vpop.f32.mrf.mxu0  ;;  %v1170_v54 = vpop.f32.mrf.mxu1 }
 0x395   :  { %v1200_v5 = vadd.f32 %v1157_v12, %v3223_v18  ;;  %v1201_v57 = vadd.f32 %v1170_v54, %v3224_v56 }
 0x397   :  { %v1984_v62 = vmul.f32 -1.442695, %v1200_v5  ;;  %v1985_v39 = vmul.f32 -1.442695, %v1201_v57 }
 0x399   :  { %2151 = vpow2.f32 %v1984_v62 }
 0x39a   :  { %2153 = vpow2.f32 %v1985_v39 }
 0x39b   :  { %v1183_v55 = vpop.f32.mrf.mxu2  ;;  %v1196_v45 = vpop.f32.mrf.mxu3 }
 0x39c   :  { %v1203_v11 = vadd.f32 %v1196_v45, %v3225_v25  ;;  %v1159_v50 = vpop.f32.mrf.mxu0  ;;  %v1172_v19 = vpop.f32.mrf.mxu1  ;;  %v1202_v38 = vadd.f32 %v1183_v55, %v3226_v31 }
 0x39e   :  { %v1986_v6 = vmul.f32 -1.442695, %v1203_v11 }
 0x39f   :  { %v2152_v0 = vpop.eup %2151 }
 0x3a0   :  { %v2154_v58 = vpop.eup %2153  ;;  %v1207_v46 = vadd.f32 1.0, %v2152_v0  ;;  %2155 = vpow2.f32 %v1986_v6 }
 0x3a1   :  { %v1226_v30 = vadd.f32 1.0, %v2154_v58 }
 0x3a2   :  { %2157 = vrcp.f32 %v1207_v46  ;;  %v1219_v18 = vand.u32 2147483648, %v1207_v46  ;;  %v1217_v57 = vand.u32 2147483647, %v1207_v46  ;;  %vm1213_vm7 = vweird.f32 %v1207_v46 }
 0x3a3   :  { %2159 = vrcp.f32 %v1226_v30  ;;  %v1185_v40 = vpop.f32.mrf.mxu2  ;;  %v1198_v29 = vpop.f32.mrf.mxu3  ;;  %v1238_v5 = vand.u32 2147483648, %v1226_v30  ;;  %v1236_v39 = vand.u32 2147483647, %v1226_v30  ;;  %vm1232_vm8 = vweird.f32 %v1226_v30 }
 0x3a4   :  { %v1220_v55 = vor.u32 1.1754944e-38, %v1219_v18  ;;  %vm1218_vm11 = vcmp.eq.f32.partialorder %v1217_v57, 8.507059e+37 }
 0x3a5   :  { %v1239_v19 = vor.u32 1.1754944e-38, %v1238_v5  ;;  %vm1237_vm12 = vcmp.eq.f32.partialorder %v1236_v39, 8.507059e+37 }
 0x3a6   :  { %v2156_v23 = vpop.eup %2155 }
 0x3a7   :  { %v1246_v36 = vadd.f32 1.0, %v2156_v23 }
 0x3a8   :  { %v2158_v16 = vpop.eup %2157 }
 0x3a9   :  { %v2160_v28 = vpop.eup %2159  ;;  %v1209_v17 = vmul.f32 %v2158_v16, %v1207_v46  ;;  %2161 = vrcp.f32 %v1246_v36  ;;  %vm1214_vm5 = vweird.f32 %v2158_v16  ;;  %vm1252_vm15 = vweird.f32 %v1246_v36 }
 0x3aa   :  { %v1228_v42 = vmul.f32 %v2160_v28, %v1226_v30  ;;  %2163 = vtanh.f32 %v1202_v38  ;;  %vm1233_vm6 = vweird.f32 %v2160_v28  ;;  %vm1215_vm9 = vmor %vm1213_vm7, %vm1214_vm5 }
 0x3ab   :  { %v1210_v12 = vsub.f32 1.0, %v1209_v17  ;;  %vm1234_vm10 = vmor %vm1232_vm8, %vm1233_vm6 }
 0x3ac   :  { %v1229_v54 = vsub.f32 1.0, %v1228_v42  ;;  %v1258_v42 = vand.u32 2147483648, %v1246_v36 }
 0x3ad   :  { %v1211_v56 = vmul.f32 %v2158_v16, %v1210_v12  ;;  %v1256_v12 = vand.u32 2147483647, %v1246_v36 }
 0x3ae   :  { %v1230_v62 = vmul.f32 %v2160_v28, %v1229_v54  ;;  %v1259_v54 = vor.u32 1.1754944e-38, %v1258_v42 }
 0x3af   :  { %v2162_v45 = vpop.eup %2161  ;;  %v1212_v25 = vadd.f32 %v2158_v16, %v1211_v56  ;;  %vm1257_vm1 = vcmp.eq.f32.partialorder %v1256_v12, 8.507059e+37 }
 0x3b0   :  { %v1231_v11 = vadd.f32 %v2160_v28, %v1230_v62  ;;  %v1248_v50 = vmul.f32 %v2162_v45, %v1246_v36  ;;  %v2164_v0 = vpop.eup %2163  ;;  %vm1253_vm13 = vweird.f32 %v2162_v45 }
 0x3b1   :  { %v1216_v6 = vsel %vm1215_vm9, %v2158_v16, %v1212_v25  ;;  %vm1254_vm0 = vmor %vm1252_vm15, %vm1253_vm13 }
 0x3b2   :  { %v1221_v58 = vsel %vm1218_vm11, %v1220_v55, %v1216_v6  ;;  %v1235_v40 = vsel %vm1234_vm10, %v2160_v28, %v1231_v11  ;;  %v1249_v29 = vsub.f32 1.0, %v1248_v50  ;;  %vm1992_vm11 = vcmp.gt.s32.totalorder %v2896_v24, 5 }
 0x3b3   :  { %v1240_v23 = vsel %vm1237_vm12, %v1239_v19, %v1235_v40  ;;  %v1263_v31 = vmul.f32 %v2164_v0, %v1221_v58 }
 0x3b4   :  { %v1262_v38 = vmul.f32 %v1240_v23, %v3052_v63  ;;  %v1250_v17 = vmul.f32 %v2162_v45, %v1249_v29 }
 0x3b6   :  { %v1264_v46 = vadd.f32 %v1263_v31, %v1262_v38  ;;  %v1251_v30 = vadd.f32 %v2162_v45, %v1250_v17 }
 0x3b8   :  { %2165 = vtanh.f32 %v1264_v46  ;;  %v3101_v16 = vsel %vm1987_vm14, %v1264_v46, %v3052_v63  ;;  %v1255_v28 = vsel %vm1254_vm0, %v2162_v45, %v1251_v30 }
 0x3b9   :  { %v1260_v5 = vsel %vm1257_vm1, %v1259_v54, %v1255_v28 }
 0x3be   :  { %v2166_v18 = vpop.eup %2165 }
 0x3bf   :  { %v1266_v56 = vmul.f32 %v2166_v18, %v1260_v5 }
 0x3c1   :  { %v3104_v57 = vsel %vm1987_vm14, %v1266_v56, %v3055_v27  ;;  %v1272_v62 = vsel %vm1987_vm14, %v1266_v56, 0.0 }
 0x3c2   :  { %v1273_v39 = vpack.c.bf16 %v1272_v62, %v1272_v62  ;;  %v1281_v25 = vpack.c.bf16 %v3104_v57, %v3104_v57 }
 0x3c4   :  { %1988 = vst [vmem:[%s3195_s5 + $0x10] sm:$0xf] %v1273_v39  ;;  %1290 = vmatmul.bf16.vlgmr.msra.gmra.mxu0 %v1281_v25  ;;  %1303 = vmatmul.bf16.vlgmr.msra.gmra.mxu1 %v1281_v25 }
 0x3c5   :  { %1316 = vmatmul.bf16.vlgmr.msra.gmra.mxu2 %v1281_v25  ;;  %1329 = vmatmul.bf16.vlgmr.msra.gmra.mxu3 %v1281_v25 }
 0x3c6   :  { %1550 = vmatpush.bf16.msra.mxu0 %v2459_v37  ;;  %1563 = vmatpush.bf16.msra.mxu1 %v2470_v41 }
 0x3c7   :  { %1576 = vmatpush.bf16.msra.mxu2 %v2487_v47  ;;  %1589 = vmatpush.bf16.msra.mxu3 %v2490_v48  ;;  %v3227_v47 = vld [vmem:[#allocation14_spill] sm:$0xff] }
 0x3ca   :  { %1551 = vmatpush.bf16.msra.mxu0 %v2492_v49  ;;  %1564 = vmatpush.bf16.msra.mxu1 %v2504_v53  ;;  %v3228_v49 = vld [vmem:[#allocation15_spill] sm:$0xff] }
 0x3cb   :  { %1577 = vmatpush.bf16.msra.mxu2 %v2522_v59  ;;  %1590 = vmatpush.bf16.msra.mxu3 %v2526_v60 }
 0x3ce   :  { %1552 = vmatpush.bf16.msra.mxu0 %v2528_v61  ;;  %1565 = vmatpush.bf16.msra.mxu1 %v2540_v1 }
 0x3cf   :  { %1578 = vmatpush.bf16.msra.mxu2 %v2558_v7  ;;  %1591 = vmatpush.bf16.msra.mxu3 %v2562_v8  ;;  %v3229_v7 = vld [vmem:[#allocation17_spill] sm:$0xff] }
 0x3d2   :  { %1553 = vmatpush.bf16.msra.mxu0 %v2564_v9  ;;  %1566 = vmatpush.bf16.msra.mxu1 %v2576_v13 }
 0x3d3   :  { %1579 = vmatpush.bf16.msra.mxu2 %v2597_v20  ;;  %1592 = vmatpush.bf16.msra.mxu3 %v2601_v21 }
 0x3d6   :  { %1554 = vmatpush.bf16.msra.mxu0 %v2603_v22  ;;  %1567 = vmatpush.bf16.msra.mxu1 %v2615_v26 }
 0x3d7   :  { %1580 = vmatpush.bf16.msra.mxu2 %v2633_v32  ;;  %1593 = vmatpush.bf16.msra.mxu3 %v2637_v33 }
 0x3da   :  { %1555 = vmatpush.bf16.msra.mxu0 %v2639_v34  ;;  %1568 = vmatpush.bf16.msra.mxu1 %v2642_v35 }
 0x3db   :  { %1581 = vmatpush.bf16.msra.mxu2 %v2678_v52  ;;  %1594 = vmatpush.bf16.msra.mxu3 %v2662_v43 }
 0x3de   :  { %1556 = vmatpush.bf16.msra.mxu0 %v2664_v44  ;;  %1569 = vmatpush.bf16.msra.mxu1 %v2676_v51  ;;  %v3230_v51 = vld [vmem:[#allocation16_spill] sm:$0xff] }
 0x3df   :  { %1582 = vmatpush.bf16.msra.mxu2 %v2711_v4  ;;  %1595 = vmatpush.bf16.msra.mxu3 %v2707_v2 }
 0x3e2   :  { %1557 = vmatpush.bf16.msra.mxu0 %v2709_v3  ;;  %1570 = vmatpush.bf16.msra.mxu1 %v2720_v10 }
 0x3e3   :  { %1583 = vmatpush.bf16.msra.mxu2 %v2729_v14  ;;  %1596 = vmatpush.bf16.msra.mxu3 %v2733_v15 }
 0x441   :  { %v1291_v37 = vpop.f32.mrf.mxu0  ;;  %v1304_v41 = vpop.f32.mrf.mxu1 }
 0x442   :  { %v1334_v48 = vadd.f32 %v1291_v37, %v3227_v47  ;;  %v1335_v53 = vadd.f32 %v1304_v41, %v3228_v49 }
 0x444   :  { %v1989_v59 = vmul.f32 -1.442695, %v1334_v48  ;;  %v1990_v60 = vmul.f32 -1.442695, %v1335_v53 }
 0x446   :  { %2167 = vpow2.f32 %v1989_v59  ;;  %v3231_v59 = vld [vmem:[#allocation18_spill] sm:$0xff] }
 0x447   :  { %2169 = vpow2.f32 %v1990_v60 }
 0x448   :  { %v1317_v61 = vpop.f32.mrf.mxu2  ;;  %v1330_v1 = vpop.f32.mrf.mxu3 }
 0x449   :  { %v1337_v8 = vadd.f32 %v1330_v1, %v3229_v7  ;;  %v1293_v9 = vpop.f32.mrf.mxu0  ;;  %v1306_v13 = vpop.f32.mrf.mxu1  ;;  %v1336_v52 = vadd.f32 %v1317_v61, %v3230_v51  ;;  %v3232_v61 = vld [vmem:[#allocation19_spill] sm:$0xff] }
 0x44a   :  { %v3233_v13 = vld [vmem:[#allocation21_spill] sm:$0xff] }
 0x44b   :  { %v1991_v20 = vmul.f32 -1.442695, %v1337_v8 }
 0x44c   :  { %v2168_v21 = vpop.eup %2167 }
 0x44d   :  { %v2170_v22 = vpop.eup %2169  ;;  %v1341_v26 = vadd.f32 1.0, %v2168_v21  ;;  %2171 = vpow2.f32 %v1991_v20 }
 0x44e   :  { %v1360_v32 = vadd.f32 1.0, %v2170_v22 }
 0x44f   :  { %2173 = vrcp.f32 %v1341_v26  ;;  %v1353_v15 = vand.u32 2147483648, %v1341_v26  ;;  %v1351_v36 = vand.u32 2147483647, %v1341_v26  ;;  %vm1347_vm4 = vweird.f32 %v1341_v26 }
 0x450   :  { %2175 = vrcp.f32 %v1360_v32  ;;  %v1319_v33 = vpop.f32.mrf.mxu2  ;;  %v1332_v34 = vpop.f32.mrf.mxu3  ;;  %v1372_v63 = vand.u32 2147483648, %v1360_v32  ;;  %v1370_v55 = vand.u32 2147483647, %v1360_v32  ;;  %vm1366_vm5 = vweird.f32 %v1360_v32 }
 0x451   :  { %v1354_v19 = vor.u32 1.1754944e-38, %v1353_v15  ;;  %vm1352_vm8 = vcmp.eq.f32.partialorder %v1351_v36, 8.507059e+37 }
 0x452   :  { %v1373_v58 = vor.u32 1.1754944e-38, %v1372_v63  ;;  %vm1371_vm9 = vcmp.eq.f32.partialorder %v1370_v55, 8.507059e+37 }
 0x453   :  { %v2172_v35 = vpop.eup %2171 }
 0x454   :  { %v1380_v43 = vadd.f32 1.0, %v2172_v35 }
 0x455   :  { %v2174_v44 = vpop.eup %2173 }
 0x456   :  { %v2176_v2 = vpop.eup %2175  ;;  %v1343_v3 = vmul.f32 %v2174_v44, %v1341_v26  ;;  %2177 = vrcp.f32 %v1380_v43  ;;  %vm1348_vm2 = vweird.f32 %v2174_v44  ;;  %v1392_v54 = vand.u32 2147483648, %v1380_v43 }
 0x457   :  { %v1362_v4 = vmul.f32 %v2176_v2, %v1360_v32  ;;  %2179 = vtanh.f32 %v1336_v52  ;;  %vm1367_vm3 = vweird.f32 %v2176_v2  ;;  %vm1349_vm6 = vmor %vm1347_vm4, %vm1348_vm2  ;;  %vm1386_vm12 = vweird.f32 %v1380_v43 }
 0x458   :  { %v1344_v10 = vsub.f32 1.0, %v1343_v3  ;;  %vm1368_vm7 = vmor %vm1366_vm5, %vm1367_vm3  ;;  %v1390_v5 = vand.u32 2147483647, %v1380_v43  ;;  %v1393_v62 = vor.u32 1.1754944e-38, %v1392_v54  ;;  %v3234_v3 = vld [vmem:[#allocation20_spill] sm:$0xff] }
 0x459   :  { %v1363_v14 = vsub.f32 1.0, %v1362_v4 }
 0x45a   :  { %v1345_v27 = vmul.f32 %v2174_v44, %v1344_v10  ;;  %vm1391_vm14 = vcmp.eq.f32.partialorder %v1390_v5, 8.507059e+37 }
 0x45b   :  { %v1364_v45 = vmul.f32 %v2176_v2, %v1363_v14 }
 0x45c   :  { %v2178_v11 = vpop.eup %2177  ;;  %v1346_v50 = vadd.f32 %v2174_v44, %v1345_v27 }
 0x45d   :  { %v1365_v6 = vadd.f32 %v2176_v2, %v1364_v45  ;;  %v1382_v0 = vmul.f32 %v2178_v11, %v1380_v43  ;;  %v2180_v29 = vpop.eup %2179  ;;  %vm1387_vm10 = vweird.f32 %v2178_v11 }
 0x45e   :  { %v1350_v40 = vsel %vm1349_vm6, %v2174_v44, %v1346_v50  ;;  %vm1388_vm13 = vmor %vm1386_vm12, %vm1387_vm10 }
 0x45f   :  { %v1355_v23 = vsel %vm1352_vm8, %v1354_v19, %v1350_v40  ;;  %v1369_v31 = vsel %vm1368_vm7, %v2176_v2, %v1365_v6  ;;  %v1383_v38 = vsub.f32 1.0, %v1382_v0  ;;  %vm1997_vm8 = vcmp.gt.s32.totalorder %v2896_v24, 6 }
 0x460   :  { %v1374_v17 = vsel %vm1371_vm9, %v1373_v58, %v1369_v31  ;;  %v1397_v46 = vmul.f32 %v2180_v29, %v1355_v23 }
 0x461   :  { %v1396_v30 = vmul.f32 %v1374_v17, %v3101_v16  ;;  %v1384_v42 = vmul.f32 %v2178_v11, %v1383_v38 }
 0x463   :  { %v1398_v12 = vadd.f32 %v1397_v46, %v1396_v30  ;;  %v1385_v28 = vadd.f32 %v2178_v11, %v1384_v42 }
 0x465   :  { %2181 = vtanh.f32 %v1398_v12  ;;  %v3150_v18 = vsel %vm1992_vm11, %v1398_v12, %v3101_v16  ;;  %v1389_v56 = vsel %vm1388_vm13, %v2178_v11, %v1385_v28 }
 0x466   :  { %v1394_v25 = vsel %vm1391_vm14, %v1393_v62, %v1389_v56 }
 0x46b   :  { %v2182_v39 = vpop.eup %2181 }
 0x46c   :  { %v1400_v37 = vmul.f32 %v2182_v39, %v1394_v25 }
 0x46e   :  { %v3153_v41 = vsel %vm1992_vm11, %v1400_v37, %v3104_v57  ;;  %v1406_v47 = vsel %vm1992_vm11, %v1400_v37, 0.0 }
 0x46f   :  { %v1407_v48 = vpack.c.bf16 %v1406_v47, %v1406_v47  ;;  %v1415_v49 = vpack.c.bf16 %v3153_v41, %v3153_v41 }
 0x471   :  { %1993 = vst [vmem:[%s3195_s5 + $0x14] sm:$0xf] %v1407_v48  ;;  %1424 = vmatmul.bf16.vlgmr.msrb.gmra.mxu0 %v1415_v49  ;;  %1437 = vmatmul.bf16.vlgmr.msrb.gmra.mxu1 %v1415_v49 }
 0x472   :  { %1450 = vmatmul.bf16.vlgmr.msrb.gmra.mxu2 %v1415_v49  ;;  %1463 = vmatmul.bf16.vlgmr.msrb.gmra.mxu3 %v1415_v49 }
 0x4ee   :  { %v1425_v16 = vpop.f32.mrf.mxu0  ;;  %v1438_v53 = vpop.f32.mrf.mxu1 }
 0x4ef   :  { %v1468_v60 = vadd.f32 %v1425_v16, %v3231_v59  ;;  %v1469_v57 = vadd.f32 %v1438_v53, %v3232_v61 }
 0x4f1   :  { %v1994_v1 = vmul.f32 -1.442695, %v1468_v60  ;;  %v1995_v7 = vmul.f32 -1.442695, %v1469_v57 }
 0x4f3   :  { %2183 = vpow2.f32 %v1994_v1  ;;  %v3235_v1 = vld [vmem:[#allocation22_spill] sm:$0xff] }
 0x4f4   :  { %2185 = vpow2.f32 %v1995_v7 }
 0x4f5   :  { %v1451_v8 = vpop.f32.mrf.mxu2  ;;  %v1464_v9 = vpop.f32.mrf.mxu3 }
 0x4f6   :  { %v1471_v20 = vadd.f32 %v1464_v9, %v3233_v13  ;;  %v1427_v21 = vpop.f32.mrf.mxu0  ;;  %v1440_v22 = vpop.f32.mrf.mxu1  ;;  %v1470_v4 = vadd.f32 %v1451_v8, %v3234_v3  ;;  %v3236_v8 = vld [vmem:[#allocation23_spill] sm:$0xff] }
 0x4f7   :  { %v3237_v22 = vld [vmem:[#allocation25_spill] sm:$0xff] }
 0x4f8   :  { %v1996_v26 = vmul.f32 -1.442695, %v1471_v20 }
 0x4f9   :  { %v2184_v32 = vpop.eup %2183 }
 0x4fa   :  { %v2186_v33 = vpop.eup %2185  ;;  %v1475_v34 = vadd.f32 1.0, %v2184_v32  ;;  %2187 = vpow2.f32 %v1996_v26 }
 0x4fb   :  { %v1494_v35 = vadd.f32 1.0, %v2186_v33 }
 0x4fc   :  { %2189 = vrcp.f32 %v1475_v34  ;;  %v1487_v36 = vand.u32 2147483648, %v1475_v34  ;;  %v1485_v11 = vand.u32 2147483647, %v1475_v34  ;;  %vm1481_vm1 = vweird.f32 %v1475_v34 }
 0x4fd   :  { %2191 = vrcp.f32 %v1494_v35  ;;  %v1453_v43 = vpop.f32.mrf.mxu2  ;;  %v1466_v44 = vpop.f32.mrf.mxu3  ;;  %v1506_v45 = vand.u32 2147483648, %v1494_v35  ;;  %v1504_v19 = vand.u32 2147483647, %v1494_v35  ;;  %vm1500_vm2 = vweird.f32 %v1494_v35 }
 0x4fe   :  { %v1488_v58 = vor.u32 1.1754944e-38, %v1487_v36  ;;  %vm1486_vm5 = vcmp.eq.f32.partialorder %v1485_v11, 8.507059e+37 }
 0x4ff   :  { %v1507_v23 = vor.u32 1.1754944e-38, %v1506_v45  ;;  %vm1505_vm6 = vcmp.eq.f32.partialorder %v1504_v19, 8.507059e+37 }
 0x500   :  { %v2188_v51 = vpop.eup %2187 }
 0x501   :  { %v1514_v52 = vadd.f32 1.0, %v2188_v51 }
 0x502   :  { %v2190_v2 = vpop.eup %2189 }
 0x503   :  { %v2192_v10 = vpop.eup %2191  ;;  %v1477_v14 = vmul.f32 %v2190_v2, %v1475_v34  ;;  %2193 = vrcp.f32 %v1514_v52  ;;  %vm1482_vm15 = vweird.f32 %v2190_v2  ;;  %v1526_v62 = vand.u32 2147483648, %v1514_v52 }
 0x504   :  { %v1496_v15 = vmul.f32 %v2192_v10, %v1494_v35  ;;  %2195 = vtanh.f32 %v1470_v4  ;;  %vm1501_vm0 = vweird.f32 %v2192_v10  ;;  %vm1483_vm3 = vmor %vm1481_vm1, %vm1482_vm15  ;;  %vm1520_vm9 = vweird.f32 %v1514_v52 }
 0x505   :  { %v1478_v63 = vsub.f32 1.0, %v1477_v14  ;;  %vm1502_vm4 = vmor %vm1500_vm2, %vm1501_vm0  ;;  %v1524_v25 = vand.u32 2147483647, %v1514_v52  ;;  %v1527_v47 = vor.u32 1.1754944e-38, %v1526_v62  ;;  %v3238_v14 = vld [vmem:[#allocation24_spill] sm:$0xff] }
 0x506   :  { %v1497_v27 = vsub.f32 1.0, %v1496_v15 }
 0x507   :  { %v1479_v55 = vmul.f32 %v2190_v2, %v1478_v63  ;;  %vm1525_vm11 = vcmp.eq.f32.partialorder %v1524_v25, 8.507059e+37 }
 0x508   :  { %v1498_v50 = vmul.f32 %v2192_v10, %v1497_v27 }
 0x509   :  { %v2194_v6 = vpop.eup %2193  ;;  %v1480_v0 = vadd.f32 %v2190_v2, %v1479_v55 }
 0x50a   :  { %v1499_v40 = vadd.f32 %v2192_v10, %v1498_v50  ;;  %v1516_v29 = vmul.f32 %v2194_v6, %v1514_v52  ;;  %v2196_v38 = vpop.eup %2195  ;;  %vm1521_vm7 = vweird.f32 %v2194_v6 }
 0x50b   :  { %v1484_v31 = vsel %vm1483_vm3, %v2190_v2, %v1480_v0  ;;  %vm1522_vm10 = vmor %vm1520_vm9, %vm1521_vm7 }
 0x50c   :  { %v1489_v17 = vsel %vm1486_vm5, %v1488_v58, %v1484_v31  ;;  %v1503_v46 = vsel %vm1502_vm4, %v2192_v10, %v1499_v40  ;;  %v1517_v30 = vsub.f32 1.0, %v1516_v29 }
 0x50d   :  { %v1508_v42 = vsel %vm1505_vm6, %v1507_v23, %v1503_v46  ;;  %v1531_v12 = vmul.f32 %v2196_v38, %v1489_v17 }
 0x50e   :  { %v1530_v28 = vmul.f32 %v1508_v42, %v3150_v18  ;;  %v1518_v54 = vmul.f32 %v2194_v6, %v1517_v30 }
 0x510   :  { %v1532_v5 = vadd.f32 %v1531_v12, %v1530_v28  ;;  %v1519_v56 = vadd.f32 %v2194_v6, %v1518_v54 }
 0x512   :  { %2197 = vtanh.f32 %v1532_v5  ;;  %v3167_v39 = vsel %vm1997_vm8, %v1532_v5, %v3150_v18  ;;  %v1523_v37 = vsel %vm1522_vm10, %v2194_v6, %v1519_v56 }
 0x513   :  { %v1528_v49 = vsel %vm1525_vm11, %v1527_v47, %v1523_v37 }
 0x518   :  { %v2198_v48 = vpop.eup %2197 }
 0x519   :  { %v1534_v16 = vmul.f32 %v2198_v48, %v1528_v49 }
 0x51b   :  { %v3170_v53 = vsel %vm1997_vm8, %v1534_v16, %v3153_v41  ;;  %v1540_v59 = vsel %vm1997_vm8, %v1534_v16, 0.0  ;;  %vm2002_vm8 = vcmp.gt.s32.totalorder %v2896_v24, 7 }
 0x51c   :  { %v1541_v60 = vpack.c.bf16 %v1540_v59, %v1540_v59  ;;  %v1549_v61 = vpack.c.bf16 %v3170_v53, %v3170_v53 }
 0x51e   :  { %1998 = vst [vmem:[%s3195_s5 + $0x18] sm:$0xf] %v1541_v60  ;;  %1558 = vmatmul.bf16.vlgmr.msra.gmra.mxu0 %v1549_v61  ;;  %1571 = vmatmul.bf16.vlgmr.msra.gmra.mxu1 %v1549_v61 }
 0x51f   :  { %1584 = vmatmul.bf16.vlgmr.msra.gmra.mxu2 %v1549_v61  ;;  %1597 = vmatmul.bf16.vlgmr.msra.gmra.mxu3 %v1549_v61 }
 0x59b   :  { %v1559_v18 = vpop.f32.mrf.mxu0  ;;  %v1572_v57 = vpop.f32.mrf.mxu1 }
 0x59c   :  { %v1602_v7 = vadd.f32 %v1559_v18, %v3235_v1  ;;  %v1603_v41 = vadd.f32 %v1572_v57, %v3236_v8 }
 0x59e   :  { %v1999_v9 = vmul.f32 -1.442695, %v1602_v7  ;;  %v2000_v13 = vmul.f32 -1.442695, %v1603_v41 }
 0x5a0   :  { %2199 = vpow2.f32 %v1999_v9 }
 0x5a1   :  { %2201 = vpow2.f32 %v2000_v13 }
 0x5a2   :  { %v1585_v20 = vpop.f32.mrf.mxu2  ;;  %v1598_v21 = vpop.f32.mrf.mxu3 }
 0x5a3   :  { %v1605_v26 = vadd.f32 %v1598_v21, %v3237_v22  ;;  %v1561_v32 = vpop.f32.mrf.mxu0  ;;  %v1574_v33 = vpop.f32.mrf.mxu1  ;;  %v1604_v15 = vadd.f32 %v1585_v20, %v3238_v14 }
 0x5a5   :  { %v2001_v34 = vmul.f32 -1.442695, %v1605_v26 }
 0x5a6   :  { %v2200_v35 = vpop.eup %2199 }
 0x5a7   :  { %v2202_v43 = vpop.eup %2201  ;;  %v1609_v44 = vadd.f32 1.0, %v2200_v35  ;;  %2203 = vpow2.f32 %v2001_v34 }
 0x5a8   :  { %v1628_v51 = vadd.f32 1.0, %v2202_v43 }
 0x5a9   :  { %2205 = vrcp.f32 %v1609_v44  ;;  %v1621_v11 = vand.u32 2147483648, %v1609_v44  ;;  %v1619_v6 = vand.u32 2147483647, %v1609_v44  ;;  %vm1615_vm14 = vweird.f32 %v1609_v44 }
 0x5aa   :  { %2207 = vrcp.f32 %v1628_v51  ;;  %v1587_v52 = vpop.f32.mrf.mxu2  ;;  %v1600_v2 = vpop.f32.mrf.mxu3  ;;  %v1640_v50 = vand.u32 2147483648, %v1628_v51  ;;  %v1638_v58 = vand.u32 2147483647, %v1628_v51  ;;  %vm1634_vm15 = vweird.f32 %v1628_v51 }
 0x5ab   :  { %v1622_v23 = vor.u32 1.1754944e-38, %v1621_v11  ;;  %vm1620_vm2 = vcmp.eq.f32.partialorder %v1619_v6, 8.507059e+37 }
 0x5ac   :  { %v1641_v17 = vor.u32 1.1754944e-38, %v1640_v50  ;;  %vm1639_vm3 = vcmp.eq.f32.partialorder %v1638_v58, 8.507059e+37 }
 0x5ad   :  { %v2204_v3 = vpop.eup %2203 }
 0x5ae   :  { %v1648_v4 = vadd.f32 1.0, %v2204_v3 }
 0x5af   :  { %v2206_v10 = vpop.eup %2205 }
 0x5b0   :  { %v2208_v63 = vpop.eup %2207  ;;  %v1611_v27 = vmul.f32 %v2206_v10, %v1609_v44  ;;  %2209 = vrcp.f32 %v1648_v4  ;;  %vm1616_vm12 = vweird.f32 %v2206_v10  ;;  %v1660_v47 = vand.u32 2147483648, %v1648_v4 }
 0x5b1   :  { %v1630_v36 = vmul.f32 %v2208_v63, %v1628_v51  ;;  %2211 = vtanh.f32 %v1604_v15  ;;  %vm1635_vm13 = vweird.f32 %v2208_v63  ;;  %vm1617_vm0 = vmor %vm1615_vm14, %vm1616_vm12  ;;  %vm1654_vm5 = vweird.f32 %v1648_v4 }
 0x5b2   :  { %v1612_v45 = vsub.f32 1.0, %v1611_v27  ;;  %vm1636_vm1 = vmor %vm1634_vm15, %vm1635_vm13  ;;  %v1658_v48 = vand.u32 2147483647, %v1648_v4  ;;  %v1661_v16 = vor.u32 1.1754944e-38, %v1660_v47 }
 0x5b3   :  { %v1631_v55 = vsub.f32 1.0, %v1630_v36 }
 0x5b4   :  { %v1613_v19 = vmul.f32 %v2206_v10, %v1612_v45  ;;  %vm1659_vm7 = vcmp.eq.f32.partialorder %v1658_v48, 8.507059e+37 }
 0x5b5   :  { %v1632_v0 = vmul.f32 %v2208_v63, %v1631_v55 }
 0x5b6   :  { %v2210_v40 = vpop.eup %2209  ;;  %v1614_v29 = vadd.f32 %v2206_v10, %v1613_v19 }
 0x5b7   :  { %v1633_v31 = vadd.f32 %v2208_v63, %v1632_v0  ;;  %v1650_v38 = vmul.f32 %v2210_v40, %v1648_v4  ;;  %v2212_v30 = vpop.eup %2211  ;;  %vm1655_vm4 = vweird.f32 %v2210_v40 }
 0x5b8   :  { %v1618_v46 = vsel %vm1617_vm0, %v2206_v10, %v1614_v29  ;;  %vm1656_vm6 = vmor %vm1654_vm5, %vm1655_vm4 }
 0x5b9   :  { %v1623_v42 = vsel %vm1620_vm2, %v1622_v23, %v1618_v46  ;;  %v1637_v12 = vsel %vm1636_vm1, %v2208_v63, %v1633_v31  ;;  %v1651_v28 = vsub.f32 1.0, %v1650_v38 }
 0x5ba   :  { %v1642_v54 = vsel %vm1639_vm3, %v1641_v17, %v1637_v12  ;;  %v1665_v5 = vmul.f32 %v2212_v30, %v1623_v42 }
 0x5bb   :  { %v1664_v56 = vmul.f32 %v1642_v54, %v3167_v39  ;;  %v1652_v62 = vmul.f32 %v2210_v40, %v1651_v28 }
 0x5bd   :  { %v1666_v25 = vadd.f32 %v1665_v5, %v1664_v56  ;;  %v1653_v37 = vadd.f32 %v2210_v40, %v1652_v62 }
 0x5bf   :  { %2213 = vtanh.f32 %v1666_v25  ;;  %v1657_v49 = vsel %vm1656_vm6, %v2210_v40, %v1653_v37 }
 0x5c0   :  { %v1662_v60 = vsel %vm1659_vm7, %v1661_v16, %v1657_v49 }
 0x5c5   :  { %v2214_v59 = vpop.eup %2213 }
 0x5c6   :  { %v1668_v61 = vmul.f32 %v2214_v59, %v1662_v60 }
 0x5c8   :  { %v1672_v18 = vsel %vm2002_vm8, %v1668_v61, %v3170_v53  ;;  %v1674_v39 = vsel %vm2002_vm8, %v1668_v61, 0.0 }
 0x5c9   :  { %v1675_v57 = vpack.c.bf16 %v1674_v39, %v1674_v39  ;;  %v1683_v1 = vpack.c.bf16 %v1672_v18, %v1672_v18 }
 0x5cb   :  { %2003 = vst [vmem:[%s3195_s5 + $0x1c] sm:$0xf] %v1675_v57 }
 0x5cc   :  { %1684 = vst [vmem:[%s3196_s6] sm:$0xf] %v1683_v1 }

</bundles_post_ra>
